<compile_context>
chip_gen: v7x
topology: tpu7x:2x2x1
jax: 0.10.0
libtpu: 0.0.40
codegen_flags: <defaults>
</compile_context>

<pallas_src>
import jax
import jax.numpy as jnp
from jax.experimental import pallas as pl
from jax.experimental.pallas import tpu as pltpu

BN_EPS = 1e-4  # nn.BatchNorm2d(out_chl, eps=0.0001)


# ----------------------------------------------------------------------------
# Tile-size chooser (VMEM-budget aware; conservative for v7x's 64 MiB VMEM).
# ----------------------------------------------------------------------------
def _pick_tile_rows(H, W, cin, cout, vmem_budget=20 * 1024 * 1024, max_rows=4096):
    wp = W + 2
    best = 1
    for th in range(1, H + 1):
        if H % th:
            continue
        r_out = th * wp
        r_in = (th + 2) * wp + 2
        need = (2 * r_in * cin * 4        # double-buffered f32 input tile
                + 2 * r_out * cout * 4    # double-buffered f32 conv-out tile
                + r_out * 9 * cin * 2     # bf16 on-chip im2col scratch
                + r_out * cout * 4        # f32 matmul accumulator value
                + r_out * 4)              # valid-row mask
        if r_out <= max_rows and need <= vmem_budget:
            best = th
    return best


# ----------------------------------------------------------------------------
# Pass 1: Conv3x3 as a single K=9*Cin matmul per row tile + partial BN stats.
#
# The tile arrives as flattened padded rows (R_in = (TH+2)*(W+2)+2, Cin).
# Tap (dy, dx) of the 3x3 kernel is then just a *contiguous* row slice at
# offset dy*(W+2)+dx; the 9 slices are packed side-by-side (bf16) in a VMEM
# scratch and fed to one MXU matmul.  Output rows with (r mod W+2) >= W are
# row-seam junk: they are masked out of the statistics and sliced away later.
# ----------------------------------------------------------------------------
def _make_conv_stats_kernel(wp, r_out, cin):
    taps_order = [(dy, dx) for dy in range(3) for dx in range(3)]

    def kernel(x_ref, w_ref, mask_ref, y_ref, stat_ref, taps_ref):
        # x_ref    : (1, R_in, Cin)   f32  flattened padded halo tile (+2 slack rows)
        # w_ref    : (9*Cin, Cout)    bf16 conv weights, tap-major
        # mask_ref : (R_out, 1)       f32  1.0 on valid rows, 0.0 on seam junk
        # y_ref    : (1, R_out, Cout) f32  raw conv output for this tile
        # stat_ref : (1, 2, Cout)     f32  per-tile [sum, sum-of-squares]
        # taps_ref : (R_out, 9*Cin)   bf16 on-chip im2col scratch
        for t, (dy, dx) in enumerate(taps_order):
            start = dy * wp + dx
            slab = x_ref[0, pl.ds(start, r_out), :]                # (R_out, Cin) f32
            taps_ref[:, t * cin:(t + 1) * cin] = slab.astype(jnp.bfloat16)

        acc = jnp.dot(taps_ref[...], w_ref[...],
                      preferred_element_type=jnp.float32)          # (R_out, Cout)
        y_ref[0] = acc

        masked = acc * mask_ref[...]                               # zero junk rows
        stat_ref[0, 0:1, :] = jnp.sum(masked, axis=0, keepdims=True)
        stat_ref[0, 1:2, :] = jnp.sum(masked * acc, axis=0, keepdims=True)

    return kernel


# ----------------------------------------------------------------------------
# Pass 2: elementwise BN affine (precomputed scale/shift) + ReLU.
# ----------------------------------------------------------------------------
def _bn_relu_kernel(y_ref, scale_ref, shift_ref, o_ref):
    o_ref[0] = jnp.maximum(y_ref[0] * scale_ref[...] + shift_ref[...], 0.0)


# ----------------------------------------------------------------------------
# One ConvBnRelu2d layer (NHWC in / NHWC out).
# ----------------------------------------------------------------------------
def conv_bn_relu_2d(x_nhwc, w_oihw, bias, gamma, beta, *, eps=BN_EPS):
    N, H, W, cin = x_nhwc.shape
    cout = w_oihw.shape[0]
    # Conv bias cancels exactly under training-mode BN (mean subtraction);
    # dropping it saves one (M, Cout) VALU pass and one DMA.
    del bias

    wp = W + 2
    th = _pick_tile_rows(H, W, cin, cout)
    n_t = H // th
    G = N * n_t
    r_out = th * wp
    r_in = (th + 2) * wp + 2
    k9 = 9 * cin

    # --- wrapper glue: zero-pad, build overlapping (halo) row tiles, fold weights.
    xp = jnp.pad(x_nhwc, ((0, 0), (1, 1), (1, 1), (0, 0)))           # (N, H+2, Wp, Cin)
    tiles = jnp.stack([xp[:, i * th: i * th + th + 2] for i in range(n_t)], axis=1)
    tiles = tiles.reshape(G, (th + 2) * wp, cin)
    tiles = jnp.pad(tiles, ((0, 0), (0, 2), (0, 0)))                 # +2 slack rows
    # tiles stay f32 in HBM so in-kernel unaligned row slices use the 32-bit
    # path; they are cast to bf16 on-chip for the MXU.

    w_mat = jnp.transpose(w_oihw, (2, 3, 1, 0)).reshape(k9, cout).astype(jnp.bfloat16)

    r_idx = jnp.arange(r_out, dtype=jnp.int32)
    mask = ((r_idx % wp) < W).astype(jnp.float32).reshape(r_out, 1)

    flops = 2 * G * r_out * k9 * cout
    bytes_accessed = (G * r_in * cin * 4 + k9 * cout * 2 + r_out * 4
                      + G * r_out * cout * 4 + G * 2 * cout * 4)
    vmem_est = (2 * r_in * cin * 4 + 2 * r_out * cout * 4
                + r_out * k9 * 2 + r_out * cout * 4)
    vmem_limit = int(min(max(2 * vmem_est, 32 * 1024 * 1024), 56 * 1024 * 1024))
    cparams = pltpu.CompilerParams(dimension_semantics=("parallel",),
                                   vmem_limit_bytes=vmem_limit)

    conv_kernel = _make_conv_stats_kernel(wp, r_out, cin)

    y_conv, part = pl.pallas_call(
        conv_kernel,
        out_shape=(jax.ShapeDtypeStruct((G, r_out, cout), jnp.float32),
                   jax.ShapeDtypeStruct((G, 2, cout), jnp.float32)),
        grid_spec=pltpu.PrefetchScalarGridSpec(
            num_scalar_prefetch=0,
            grid=(G,),
            in_specs=[
                pl.BlockSpec((1, r_in, cin), lambda g: (g, 0, 0)),
                pl.BlockSpec((k9, cout), lambda g: (0, 0)),
                pl.BlockSpec((r_out, 1), lambda g: (0, 0)),
            ],
            out_specs=[
                pl.BlockSpec((1, r_out, cout), lambda g: (g, 0, 0)),
                pl.BlockSpec((1, 2, cout), lambda g: (g, 0, 0)),
            ],
            scratch_shapes=[pltpu.VMEM((r_out, k9), jnp.bfloat16)],
        ),
        compiler_params=cparams,
        cost_estimate=pl.CostEstimate(flops=flops, transcendentals=0,
                                      bytes_accessed=bytes_accessed),
    )(tiles, w_mat, mask)

    # --- tiny cross-tile reduction + BN(train) scale/shift (O(Cout) wrapper math).
    totals = jnp.sum(part, axis=0)                           # (2, Cout)
    count = jnp.float32(N * H * W)
    mean = totals[0] / count
    var = jnp.maximum(totals[1] / count - mean * mean, 0.0)  # biased var (BN train)
    scale = gamma * jax.lax.rsqrt(var + eps)
    shift = beta - mean * scale

    y = pl.pallas_call(
        _bn_relu_kernel,
        out_shape=jax.ShapeDtypeStruct((G, r_out, cout), jnp.float32),
        grid_spec=pltpu.PrefetchScalarGridSpec(
            num_scalar_prefetch=0,
            grid=(G,),
            in_specs=[
                pl.BlockSpec((1, r_out, cout), lambda g: (g, 0, 0)),
                pl.BlockSpec((1, cout), lambda g: (0, 0)),
                pl.BlockSpec((1, cout), lambda g: (0, 0)),
            ],
            out_specs=pl.BlockSpec((1, r_out, cout), lambda g: (g, 0, 0)),
        ),
        compiler_params=cparams,
    )(y_conv, scale.reshape(1, cout), shift.reshape(1, cout))

    # --- strip the per-row seam junk and restore (N, H, W, Cout).
    y = y.reshape(N, n_t, th, wp, cout).reshape(N, H, wp, cout)[:, :, :W, :]
    return y


# ----------------------------------------------------------------------------
# Bilinear upsample (F.upsample(..., mode='bilinear')) -- plain-JAX glue.
# Modern F.upsample/interpolate uses align_corners=False; flip the flag for
# the legacy (PyTorch <= 0.3) align_corners=True behaviour if required.
# ----------------------------------------------------------------------------
def _src_coords(out_size, in_size, align_corners):
    if align_corners and out_size > 1:
        src = jnp.arange(out_size, dtype=jnp.float32) * ((in_size - 1) / (out_size - 1))
    else:
        scale = in_size / out_size
        src = (jnp.arange(out_size, dtype=jnp.float32) + 0.5) * scale - 0.5
        src = jnp.clip(src, 0.0, float(in_size - 1))
    i0 = jnp.clip(jnp.floor(src).astype(jnp.int32), 0, in_size - 1)
    i1 = jnp.clip(i0 + 1, 0, in_size - 1)
    frac = src - i0.astype(jnp.float32)
    return i0, i1, frac


def bilinear_upsample_nhwc(x, H, W, align_corners=False):
    _, h, w, _ = x.shape
    y0, y1, fy = _src_coords(H, h, align_corners)
    x0, x1, fx = _src_coords(W, w, align_corners)
    fy = fy.reshape(1, H, 1, 1)
    fx = fx.reshape(1, 1, W, 1)
    r0 = x[:, y0, :, :]
    r1 = x[:, y1, :, :]
    top = r0[:, :, x0, :] * (1.0 - fx) + r0[:, :, x1, :] * fx
    bot = r1[:, :, x0, :] * (1.0 - fx) + r1[:, :, x1, :] * fx
    return top * (1.0 - fy) + bot * fy


# ----------------------------------------------------------------------------
# StackDecoder2d forward (NCHW in / NCHW out, like the PyTorch module).
# ----------------------------------------------------------------------------
def stack_decoder_2d(up_in, conv_res, params, *, align_corners=False):
    _, _, H, W = conv_res.shape
    up = jnp.transpose(up_in, (0, 2, 3, 1))       # NCHW -> NHWC (once)
    res = jnp.transpose(conv_res, (0, 2, 3, 1))
    up = bilinear_upsample_nhwc(up, H, W, align_corners)
    x = jnp.concatenate([up, res], axis=-1)       # channel concat (NHWC)
    y = conv_bn_relu_2d(x, params["w1"], params["b1"], params["g1"], params["bt1"])
    y = conv_bn_relu_2d(y, params["w2"], params["b2"], params["g2"], params["bt2"])
    return jnp.transpose(y, (0, 3, 1, 2))         # NHWC -> NCHW (once)


# ----------------------------------------------------------------------------
# Pure-JAX reference (lax.conv) used only to sanity-check the Pallas path.
# ----------------------------------------------------------------------------
def _conv_bn_relu_ref(x_nchw, w, b, gamma, beta):
    y = jax.lax.conv_general_dilated(
        x_nchw.astype(jnp.bfloat16), w.astype(jnp.bfloat16),
        window_strides=(1, 1), padding="SAME",
        dimension_numbers=("NCHW", "OIHW", "NCHW"),
        preferred_element_type=jnp.float32)
    y = y + b[None, :, None, None]
    mean = jnp.mean(y, axis=(0, 2, 3), keepdims=True)
    var = jnp.mean((y - mean) ** 2, axis=(0, 2, 3), keepdims=True)
    y = (y - mean) * jax.lax.rsqrt(var + BN_EPS)
    y = y * gamma[None, :, None, None] + beta[None, :, None, None]
    return jnp.maximum(y, 0.0)


if __name__ == "__main__":
    N, in_chl, out_chl = 2, 4, 4
    key = jax.random.PRNGKey(0)
    ks = jax.random.split(key, 10)

    # up_in at half resolution, conv_res (skip connection) at full resolution.
    up_in = jax.random.normal(ks[0], (N, in_chl, 8, 8), jnp.float32)
    conv_res = jax.random.normal(ks[1], (N, out_chl, 16, 16), jnp.float32)

    params = dict(
        w1=0.1 * jax.random.normal(ks[2], (out_chl, in_chl + out_chl, 3, 3), jnp.float32),
        b1=0.1 * jax.random.normal(ks[3], (out_chl,), jnp.float32),
        g1=1.0 + 0.1 * jax.random.normal(ks[4], (out_chl,), jnp.float32),
        bt1=0.1 * jax.random.normal(ks[5], (out_chl,), jnp.float32),
        w2=0.1 * jax.random.normal(ks[6], (out_chl, out_chl, 3, 3), jnp.float32),
        b2=0.1 * jax.random.normal(ks[7], (out_chl,), jnp.float32),
        g2=1.0 + 0.1 * jax.random.normal(ks[8], (out_chl,), jnp.float32),
        bt2=0.1 * jax.random.normal(ks[9], (out_chl,), jnp.float32),
    )

    out = jax.jit(stack_decoder_2d)(up_in, conv_res, params)
    out = jax.block_until_ready(out)
    assert out.shape == (N, out_chl, 16, 16)

    # Sanity check against a pure-JAX reference of the same forward pass.
    up_ref = bilinear_upsample_nhwc(jnp.transpose(up_in, (0, 2, 3, 1)), 16, 16)
    x_ref = jnp.concatenate([jnp.transpose(up_ref, (0, 3, 1, 2)), conv_res], axis=1)
    r = _conv_bn_relu_ref(x_ref, params["w1"], params["b1"], params["g1"], params["bt1"])
    r = _conv_bn_relu_ref(r, params["w2"], params["b2"], params["g2"], params["bt2"])
    err = float(jnp.max(jnp.abs(out - r)))
    assert jnp.allclose(out, r, atol=2e-2, rtol=2e-2), f"max|diff|={err}"

    print("KERNEL_OK")
</pallas_src>

<mosaic_0001>
module attributes {stable_mosaic.version = 11 : i64} {
  func.func @kernel(%arg0: i32, %arg1: memref<1x326x8xf32, #tpu.memory_space<vmem>>, %arg2: memref<72x4xbf16, #tpu.memory_space<vmem>>, %arg3: memref<288x1xf32, #tpu.memory_space<vmem>>, %arg4: memref<1x288x4xf32, #tpu.memory_space<vmem>>, %arg5: memref<1x2x4xf32, #tpu.memory_space<vmem>>, %arg6: memref<288x72xbf16, #tpu.memory_space<vmem>>) attributes {dimension_semantics = [#tpu.dimension_semantics<parallel>], iteration_bounds = array<i64: 2>, scalar_prefetch = 0 : i64, scratch_operands = 1 : i64, tpu.core_type = #tpu.core_type<tc>, window_params = [{transform_indices = @transform_0, window_bounds = array<i64: 1, 326, 8>}, {pipeline_mode = #tpu.pipeline_mode<synchronous>, transform_indices = @transform_1, window_bounds = array<i64: 72, 4>}, {pipeline_mode = #tpu.pipeline_mode<synchronous>, transform_indices = @transform_2, window_bounds = array<i64: 288, 1>}, {transform_indices = @transform_3, window_bounds = array<i64: 1, 288, 4>}, {transform_indices = @transform_4, window_bounds = array<i64: 1, 2, 4>}]} {
    %c0 = arith.constant 0 : index
    %c0_0 = arith.constant 0 : index
    %c0_1 = arith.constant 0 : index
    %0 = vector.load %arg1[%c0, %c0_0, %c0_1] : memref<1x326x8xf32, #tpu.memory_space<vmem>>, vector<1x288x8xf32>
    %1 = vector.shape_cast %0 : vector<1x288x8xf32> to vector<288x8xf32>
    %2 = arith.truncf %1 : vector<288x8xf32> to vector<288x8xbf16>
    %c0_2 = arith.constant 0 : index
    %c0_3 = arith.constant 0 : index
    %3 = vector.load %arg6[%c0_2, %c0_3] : memref<288x72xbf16, #tpu.memory_space<vmem>>, vector<288x8xbf16>
    tpu.vector_store %arg6[%c0_2, %c0_3], %2 {strides = array<i32>} : memref<288x72xbf16, #tpu.memory_space<vmem>>, vector<288x8xbf16>,
    %c0_4 = arith.constant 0 : index
    %c1 = arith.constant 1 : index
    %c0_5 = arith.constant 0 : index
    %4 = vector.load %arg1[%c0_4, %c1, %c0_5] : memref<1x326x8xf32, #tpu.memory_space<vmem>>, vector<1x288x8xf32>
    %5 = vector.shape_cast %4 : vector<1x288x8xf32> to vector<288x8xf32>
    %6 = arith.truncf %5 : vector<288x8xf32> to vector<288x8xbf16>
    %c0_6 = arith.constant 0 : index
    %c8 = arith.constant 8 : index
    %7 = vector.load %arg6[%c0_6, %c8] : memref<288x72xbf16, #tpu.memory_space<vmem>>, vector<288x8xbf16>
    tpu.vector_store %arg6[%c0_6, %c8], %6 {strides = array<i32>} : memref<288x72xbf16, #tpu.memory_space<vmem>>, vector<288x8xbf16>,
    %c0_7 = arith.constant 0 : index
    %c2 = arith.constant 2 : index
    %c0_8 = arith.constant 0 : index
    %8 = vector.load %arg1[%c0_7, %c2, %c0_8] : memref<1x326x8xf32, #tpu.memory_space<vmem>>, vector<1x288x8xf32>
    %9 = vector.shape_cast %8 : vector<1x288x8xf32> to vector<288x8xf32>
    %10 = arith.truncf %9 : vector<288x8xf32> to vector<288x8xbf16>
    %c0_9 = arith.constant 0 : index
    %c16 = arith.constant 16 : index
    %11 = vector.load %arg6[%c0_9, %c16] : memref<288x72xbf16, #tpu.memory_space<vmem>>, vector<288x8xbf16>
    tpu.vector_store %arg6[%c0_9, %c16], %10 {strides = array<i32>} : memref<288x72xbf16, #tpu.memory_space<vmem>>, vector<288x8xbf16>,
    %c0_10 = arith.constant 0 : index
    %c18 = arith.constant 18 : index
    %c0_11 = arith.constant 0 : index
    %12 = vector.load %arg1[%c0_10, %c18, %c0_11] : memref<1x326x8xf32, #tpu.memory_space<vmem>>, vector<1x288x8xf32>
    %13 = vector.shape_cast %12 : vector<1x288x8xf32> to vector<288x8xf32>
    %14 = arith.truncf %13 : vector<288x8xf32> to vector<288x8xbf16>
    %c0_12 = arith.constant 0 : index
    %c24 = arith.constant 24 : index
    %15 = vector.load %arg6[%c0_12, %c24] : memref<288x72xbf16, #tpu.memory_space<vmem>>, vector<288x8xbf16>
    tpu.vector_store %arg6[%c0_12, %c24], %14 {strides = array<i32>} : memref<288x72xbf16, #tpu.memory_space<vmem>>, vector<288x8xbf16>,
    %c0_13 = arith.constant 0 : index
    %c19 = arith.constant 19 : index
    %c0_14 = arith.constant 0 : index
    %16 = vector.load %arg1[%c0_13, %c19, %c0_14] : memref<1x326x8xf32, #tpu.memory_space<vmem>>, vector<1x288x8xf32>
    %17 = vector.shape_cast %16 : vector<1x288x8xf32> to vector<288x8xf32>
    %18 = arith.truncf %17 : vector<288x8xf32> to vector<288x8xbf16>
    %c0_15 = arith.constant 0 : index
    %c32 = arith.constant 32 : index
    %19 = vector.load %arg6[%c0_15, %c32] : memref<288x72xbf16, #tpu.memory_space<vmem>>, vector<288x8xbf16>
    tpu.vector_store %arg6[%c0_15, %c32], %18 {strides = array<i32>} : memref<288x72xbf16, #tpu.memory_space<vmem>>, vector<288x8xbf16>,
    %c0_16 = arith.constant 0 : index
    %c20 = arith.constant 20 : index
    %c0_17 = arith.constant 0 : index
    %20 = vector.load %arg1[%c0_16, %c20, %c0_17] : memref<1x326x8xf32, #tpu.memory_space<vmem>>, vector<1x288x8xf32>
    %21 = vector.shape_cast %20 : vector<1x288x8xf32> to vector<288x8xf32>
    %22 = arith.truncf %21 : vector<288x8xf32> to vector<288x8xbf16>
    %c0_18 = arith.constant 0 : index
    %c40 = arith.constant 40 : index
    %23 = vector.load %arg6[%c0_18, %c40] : memref<288x72xbf16, #tpu.memory_space<vmem>>, vector<288x8xbf16>
    tpu.vector_store %arg6[%c0_18, %c40], %22 {strides = array<i32>} : memref<288x72xbf16, #tpu.memory_space<vmem>>, vector<288x8xbf16>,
    %c0_19 = arith.constant 0 : index
    %c36 = arith.constant 36 : index
    %c0_20 = arith.constant 0 : index
    %24 = vector.load %arg1[%c0_19, %c36, %c0_20] : memref<1x326x8xf32, #tpu.memory_space<vmem>>, vector<1x288x8xf32>
    %25 = vector.shape_cast %24 : vector<1x288x8xf32> to vector<288x8xf32>
    %26 = arith.truncf %25 : vector<288x8xf32> to vector<288x8xbf16>
    %c0_21 = arith.constant 0 : index
    %c48 = arith.constant 48 : index
    %27 = vector.load %arg6[%c0_21, %c48] : memref<288x72xbf16, #tpu.memory_space<vmem>>, vector<288x8xbf16>
    tpu.vector_store %arg6[%c0_21, %c48], %26 {strides = array<i32>} : memref<288x72xbf16, #tpu.memory_space<vmem>>, vector<288x8xbf16>,
    %c0_22 = arith.constant 0 : index
    %c37 = arith.constant 37 : index
    %c0_23 = arith.constant 0 : index
    %28 = vector.load %arg1[%c0_22, %c37, %c0_23] : memref<1x326x8xf32, #tpu.memory_space<vmem>>, vector<1x288x8xf32>
    %29 = vector.shape_cast %28 : vector<1x288x8xf32> to vector<288x8xf32>
    %30 = arith.truncf %29 : vector<288x8xf32> to vector<288x8xbf16>
    %c0_24 = arith.constant 0 : index
    %c56 = arith.constant 56 : index
    %31 = vector.load %arg6[%c0_24, %c56] : memref<288x72xbf16, #tpu.memory_space<vmem>>, vector<288x8xbf16>
    tpu.vector_store %arg6[%c0_24, %c56], %30 {strides = array<i32>} : memref<288x72xbf16, #tpu.memory_space<vmem>>, vector<288x8xbf16>,
    %c0_25 = arith.constant 0 : index
    %c38 = arith.constant 38 : index
    %c0_26 = arith.constant 0 : index
    %32 = vector.load %arg1[%c0_25, %c38, %c0_26] : memref<1x326x8xf32, #tpu.memory_space<vmem>>, vector<1x288x8xf32>
    %33 = vector.shape_cast %32 : vector<1x288x8xf32> to vector<288x8xf32>
    %34 = arith.truncf %33 : vector<288x8xf32> to vector<288x8xbf16>
    %c0_27 = arith.constant 0 : index
    %c64 = arith.constant 64 : index
    %35 = vector.load %arg6[%c0_27, %c64] : memref<288x72xbf16, #tpu.memory_space<vmem>>, vector<288x8xbf16>
    tpu.vector_store %arg6[%c0_27, %c64], %34 {strides = array<i32>} : memref<288x72xbf16, #tpu.memory_space<vmem>>, vector<288x8xbf16>,
    %c0_28 = arith.constant 0 : index
    %c0_29 = arith.constant 0 : index
    %36 = vector.load %arg6[%c0_28, %c0_29] : memref<288x72xbf16, #tpu.memory_space<vmem>>, vector<288x72xbf16>
    %c0_30 = arith.constant 0 : index
    %c0_31 = arith.constant 0 : index
    %37 = vector.load %arg2[%c0_30, %c0_31] : memref<72x4xbf16, #tpu.memory_space<vmem>>, vector<72x4xbf16>
    %cst = arith.constant dense<0.000000e+00> : vector<288x4xf32>
    %38 = tpu.matmul %36, %37, %cst {dimension_numbers = #tpu.dot_dimension_numbers<[1], [0], [0], [1], [0, 0, 1, 1], [], []>} : vector<288x72xbf16>, vector<72x4xbf16>, vector<288x4xf32> -> vector<288x4xf32>
    %c0_32 = arith.constant 0 : index
    %c0_33 = arith.constant 0 : index
    %c0_34 = arith.constant 0 : index
    %39 = vector.load %arg4[%c0_32, %c0_33, %c0_34] : memref<1x288x4xf32, #tpu.memory_space<vmem>>, vector<1x288x4xf32>
    %40 = vector.shape_cast %39 : vector<1x288x4xf32> to vector<288x4xf32>
    %41 = vector.shape_cast %38 : vector<288x4xf32> to vector<1x288x4xf32>
    tpu.vector_store %arg4[%c0_32, %c0_33, %c0_34], %41 {strides = array<i32>} : memref<1x288x4xf32, #tpu.memory_space<vmem>>, vector<1x288x4xf32>,
    %c0_35 = arith.constant 0 : index
    %c0_36 = arith.constant 0 : index
    %42 = vector.load %arg3[%c0_35, %c0_36] : memref<288x1xf32, #tpu.memory_space<vmem>>, vector<288x1xf32>
    %43 = vector.broadcast %42 : vector<288x1xf32> to vector<288x4xf32>
    %44 = arith.mulf %38, %43 : vector<288x4xf32>
    %cst_37 = arith.constant dense<0.000000e+00> : vector<4xf32>
    %45 = vector.multi_reduction <add>, %44, %cst_37 [0] : vector<288x4xf32> to vector<4xf32>
    %46 = vector.shape_cast %45 : vector<4xf32> to vector<1x4xf32>
    %c0_38 = arith.constant 0 : index
    %c0_39 = arith.constant 0 : index
    %c0_40 = arith.constant 0 : index
    %47 = vector.load %arg5[%c0_38, %c0_39, %c0_40] : memref<1x2x4xf32, #tpu.memory_space<vmem>>, vector<1x1x4xf32>
    %48 = vector.shape_cast %47 : vector<1x1x4xf32> to vector<1x4xf32>
    %49 = vector.shape_cast %46 : vector<1x4xf32> to vector<1x1x4xf32>
    tpu.vector_store %arg5[%c0_38, %c0_39, %c0_40], %49 {strides = array<i32>} : memref<1x2x4xf32, #tpu.memory_space<vmem>>, vector<1x1x4xf32>,
    %50 = arith.mulf %44, %38 : vector<288x4xf32>
    %cst_41 = arith.constant dense<0.000000e+00> : vector<4xf32>
    %51 = vector.multi_reduction <add>, %50, %cst_41 [0] : vector<288x4xf32> to vector<4xf32>
    %52 = vector.shape_cast %51 : vector<4xf32> to vector<1x4xf32>
    %c0_42 = arith.constant 0 : index
    %c1_43 = arith.constant 1 : index
    %c0_44 = arith.constant 0 : index
    %53 = vector.load %arg5[%c0_42, %c1_43, %c0_44] : memref<1x2x4xf32, #tpu.memory_space<vmem>>, vector<1x1x4xf32>
    %54 = vector.shape_cast %53 : vector<1x1x4xf32> to vector<1x4xf32>
    %55 = vector.shape_cast %52 : vector<1x4xf32> to vector<1x1x4xf32>
    tpu.vector_store %arg5[%c0_42, %c1_43, %c0_44], %55 {strides = array<i32>} : memref<1x2x4xf32, #tpu.memory_space<vmem>>, vector<1x1x4xf32>,
    return
  }
  func.func @transform_0(%arg0: i32) -> (i32, i32, i32) {
    %c0_i32 = arith.constant 0 : i32
    %c0_i32_0 = arith.constant 0 : i32
    %c0_i32_1 = arith.constant 0 : i32
    return %arg0, %c0_i32, %c0_i32_0 : i32, i32, i32
  }
  func.func @transform_1(%arg0: i32) -> (i32, i32) {
    %c0_i32 = arith.constant 0 : i32
    %c0_i32_0 = arith.constant 0 : i32
    %c0_i32_1 = arith.constant 0 : i32
    return %c0_i32, %c0_i32_0 : i32, i32
  }
  func.func @transform_2(%arg0: i32) -> (i32, i32) {
    %c0_i32 = arith.constant 0 : i32
    %c0_i32_0 = arith.constant 0 : i32
    %c0_i32_1 = arith.constant 0 : i32
    return %c0_i32, %c0_i32_0 : i32, i32
  }
  func.func @transform_3(%arg0: i32) -> (i32, i32, i32) {
    %c0_i32 = arith.constant 0 : i32
    %c0_i32_0 = arith.constant 0 : i32
    %c0_i32_1 = arith.constant 0 : i32
    return %arg0, %c0_i32, %c0_i32_0 : i32, i32, i32
  }
  func.func @transform_4(%arg0: i32) -> (i32, i32, i32) {
    %c0_i32 = arith.constant 0 : i32
    %c0_i32_0 = arith.constant 0 : i32
    %c0_i32_1 = arith.constant 0 : i32
    return %arg0, %c0_i32, %c0_i32_0 : i32, i32, i32
  }
}

module attributes {stable_mosaic.version = 11 : i64} {
  func.func @_bn_relu_kernel(%arg0: i32, %arg1: memref<1x288x4xf32, #tpu.memory_space<vmem>>, %arg2: memref<1x4xf32, #tpu.memory_space<vmem>>, %arg3: memref<1x4xf32, #tpu.memory_space<vmem>>, %arg4: memref<1x288x4xf32, #tpu.memory_space<vmem>>) attributes {dimension_semantics = [#tpu.dimension_semantics<parallel>], iteration_bounds = array<i64: 2>, scalar_prefetch = 0 : i64, scratch_operands = 0 : i64, tpu.core_type = #tpu.core_type<tc>, window_params = [{transform_indices = @transform_0, window_bounds = array<i64: 1, 288, 4>}, {pipeline_mode = #tpu.pipeline_mode<synchronous>, transform_indices = @transform_1, window_bounds = array<i64: 1, 4>}, {pipeline_mode = #tpu.pipeline_mode<synchronous>, transform_indices = @transform_2, window_bounds = array<i64: 1, 4>}, {transform_indices = @transform_3, window_bounds = array<i64: 1, 288, 4>}]} {
    %c0 = arith.constant 0 : index
    %c0_0 = arith.constant 0 : index
    %c0_1 = arith.constant 0 : index
    %0 = vector.load %arg1[%c0, %c0_0, %c0_1] : memref<1x288x4xf32, #tpu.memory_space<vmem>>, vector<1x288x4xf32>
    %1 = vector.shape_cast %0 : vector<1x288x4xf32> to vector<288x4xf32>
    %c0_2 = arith.constant 0 : index
    %c0_3 = arith.constant 0 : index
    %2 = vector.load %arg2[%c0_2, %c0_3] : memref<1x4xf32, #tpu.memory_space<vmem>>, vector<1x4xf32>
    %3 = vector.broadcast %2 : vector<1x4xf32> to vector<288x4xf32>
    %4 = arith.mulf %1, %3 : vector<288x4xf32>
    %c0_4 = arith.constant 0 : index
    %c0_5 = arith.constant 0 : index
    %5 = vector.load %arg3[%c0_4, %c0_5] : memref<1x4xf32, #tpu.memory_space<vmem>>, vector<1x4xf32>
    %6 = vector.broadcast %5 : vector<1x4xf32> to vector<288x4xf32>
    %7 = arith.addf %4, %6 : vector<288x4xf32>
    %cst = arith.constant 0.000000e+00 : f32
    %8 = vector.broadcast %cst : f32 to vector<288x4xf32>
    %9 = arith.maximumf %7, %8 : vector<288x4xf32>
    %c0_6 = arith.constant 0 : index
    %c0_7 = arith.constant 0 : index
    %c0_8 = arith.constant 0 : index
    %10 = vector.load %arg4[%c0_6, %c0_7, %c0_8] : memref<1x288x4xf32, #tpu.memory_space<vmem>>, vector<1x288x4xf32>
    %11 = vector.shape_cast %10 : vector<1x288x4xf32> to vector<288x4xf32>
    %12 = vector.shape_cast %9 : vector<288x4xf32> to vector<1x288x4xf32>
    tpu.vector_store %arg4[%c0_6, %c0_7, %c0_8], %12 {strides = array<i32>} : memref<1x288x4xf32, #tpu.memory_space<vmem>>, vector<1x288x4xf32>,
    return
  }
  func.func @transform_0(%arg0: i32) -> (i32, i32, i32) {
    %c0_i32 = arith.constant 0 : i32
    %c0_i32_0 = arith.constant 0 : i32
    %c0_i32_1 = arith.constant 0 : i32
    return %arg0, %c0_i32, %c0_i32_0 : i32, i32, i32
  }
  func.func @transform_1(%arg0: i32) -> (i32, i32) {
    %c0_i32 = arith.constant 0 : i32
    %c0_i32_0 = arith.constant 0 : i32
    %c0_i32_1 = arith.constant 0 : i32
    return %c0_i32, %c0_i32_0 : i32, i32
  }
  func.func @transform_2(%arg0: i32) -> (i32, i32) {
    %c0_i32 = arith.constant 0 : i32
    %c0_i32_0 = arith.constant 0 : i32
    %c0_i32_1 = arith.constant 0 : i32
    return %c0_i32, %c0_i32_0 : i32, i32
  }
  func.func @transform_3(%arg0: i32) -> (i32, i32, i32) {
    %c0_i32 = arith.constant 0 : i32
    %c0_i32_0 = arith.constant 0 : i32
    %c0_i32_1 = arith.constant 0 : i32
    return %arg0, %c0_i32, %c0_i32_0 : i32, i32, i32
  }
}

module attributes {stable_mosaic.version = 11 : i64} {
  func.func @kernel(%arg0: i32, %arg1: memref<1x326x4xf32, #tpu.memory_space<vmem>>, %arg2: memref<36x4xbf16, #tpu.memory_space<vmem>>, %arg3: memref<288x1xf32, #tpu.memory_space<vmem>>, %arg4: memref<1x288x4xf32, #tpu.memory_space<vmem>>, %arg5: memref<1x2x4xf32, #tpu.memory_space<vmem>>, %arg6: memref<288x36xbf16, #tpu.memory_space<vmem>>) attributes {dimension_semantics = [#tpu.dimension_semantics<parallel>], iteration_bounds = array<i64: 2>, scalar_prefetch = 0 : i64, scratch_operands = 1 : i64, tpu.core_type = #tpu.core_type<tc>, window_params = [{transform_indices = @transform_0, window_bounds = array<i64: 1, 326, 4>}, {pipeline_mode = #tpu.pipeline_mode<synchronous>, transform_indices = @transform_1, window_bounds = array<i64: 36, 4>}, {pipeline_mode = #tpu.pipeline_mode<synchronous>, transform_indices = @transform_2, window_bounds = array<i64: 288, 1>}, {transform_indices = @transform_3, window_bounds = array<i64: 1, 288, 4>}, {transform_indices = @transform_4, window_bounds = array<i64: 1, 2, 4>}]} {
    %c0 = arith.constant 0 : index
    %c0_0 = arith.constant 0 : index
    %c0_1 = arith.constant 0 : index
    %0 = vector.load %arg1[%c0, %c0_0, %c0_1] : memref<1x326x4xf32, #tpu.memory_space<vmem>>, vector<1x288x4xf32>
    %1 = vector.shape_cast %0 : vector<1x288x4xf32> to vector<288x4xf32>
    %2 = arith.truncf %1 : vector<288x4xf32> to vector<288x4xbf16>
    %c0_2 = arith.constant 0 : index
    %c0_3 = arith.constant 0 : index
    %3 = vector.load %arg6[%c0_2, %c0_3] : memref<288x36xbf16, #tpu.memory_space<vmem>>, vector<288x4xbf16>
    tpu.vector_store %arg6[%c0_2, %c0_3], %2 {strides = array<i32>} : memref<288x36xbf16, #tpu.memory_space<vmem>>, vector<288x4xbf16>,
    %c0_4 = arith.constant 0 : index
    %c1 = arith.constant 1 : index
    %c0_5 = arith.constant 0 : index
    %4 = vector.load %arg1[%c0_4, %c1, %c0_5] : memref<1x326x4xf32, #tpu.memory_space<vmem>>, vector<1x288x4xf32>
    %5 = vector.shape_cast %4 : vector<1x288x4xf32> to vector<288x4xf32>
    %6 = arith.truncf %5 : vector<288x4xf32> to vector<288x4xbf16>
    %c0_6 = arith.constant 0 : index
    %c4 = arith.constant 4 : index
    %7 = vector.load %arg6[%c0_6, %c4] : memref<288x36xbf16, #tpu.memory_space<vmem>>, vector<288x4xbf16>
    tpu.vector_store %arg6[%c0_6, %c4], %6 {strides = array<i32>} : memref<288x36xbf16, #tpu.memory_space<vmem>>, vector<288x4xbf16>,
    %c0_7 = arith.constant 0 : index
    %c2 = arith.constant 2 : index
    %c0_8 = arith.constant 0 : index
    %8 = vector.load %arg1[%c0_7, %c2, %c0_8] : memref<1x326x4xf32, #tpu.memory_space<vmem>>, vector<1x288x4xf32>
    %9 = vector.shape_cast %8 : vector<1x288x4xf32> to vector<288x4xf32>
    %10 = arith.truncf %9 : vector<288x4xf32> to vector<288x4xbf16>
    %c0_9 = arith.constant 0 : index
    %c8 = arith.constant 8 : index
    %11 = vector.load %arg6[%c0_9, %c8] : memref<288x36xbf16, #tpu.memory_space<vmem>>, vector<288x4xbf16>
    tpu.vector_store %arg6[%c0_9, %c8], %10 {strides = array<i32>} : memref<288x36xbf16, #tpu.memory_space<vmem>>, vector<288x4xbf16>,
    %c0_10 = arith.constant 0 : index
    %c18 = arith.constant 18 : index
    %c0_11 = arith.constant 0 : index
    %12 = vector.load %arg1[%c0_10, %c18, %c0_11] : memref<1x326x4xf32, #tpu.memory_space<vmem>>, vector<1x288x4xf32>
    %13 = vector.shape_cast %12 : vector<1x288x4xf32> to vector<288x4xf32>
    %14 = arith.truncf %13 : vector<288x4xf32> to vector<288x4xbf16>
    %c0_12 = arith.constant 0 : index
    %c12 = arith.constant 12 : index
    %15 = vector.load %arg6[%c0_12, %c12] : memref<288x36xbf16, #tpu.memory_space<vmem>>, vector<288x4xbf16>
    tpu.vector_store %arg6[%c0_12, %c12], %14 {strides = array<i32>} : memref<288x36xbf16, #tpu.memory_space<vmem>>, vector<288x4xbf16>,
    %c0_13 = arith.constant 0 : index
    %c19 = arith.constant 19 : index
    %c0_14 = arith.constant 0 : index
    %16 = vector.load %arg1[%c0_13, %c19, %c0_14] : memref<1x326x4xf32, #tpu.memory_space<vmem>>, vector<1x288x4xf32>
    %17 = vector.shape_cast %16 : vector<1x288x4xf32> to vector<288x4xf32>
    %18 = arith.truncf %17 : vector<288x4xf32> to vector<288x4xbf16>
    %c0_15 = arith.constant 0 : index
    %c16 = arith.constant 16 : index
    %19 = vector.load %arg6[%c0_15, %c16] : memref<288x36xbf16, #tpu.memory_space<vmem>>, vector<288x4xbf16>
    tpu.vector_store %arg6[%c0_15, %c16], %18 {strides = array<i32>} : memref<288x36xbf16, #tpu.memory_space<vmem>>, vector<288x4xbf16>,
    %c0_16 = arith.constant 0 : index
    %c20 = arith.constant 20 : index
    %c0_17 = arith.constant 0 : index
    %20 = vector.load %arg1[%c0_16, %c20, %c0_17] : memref<1x326x4xf32, #tpu.memory_space<vmem>>, vector<1x288x4xf32>
    %21 = vector.shape_cast %20 : vector<1x288x4xf32> to vector<288x4xf32>
    %22 = arith.truncf %21 : vector<288x4xf32> to vector<288x4xbf16>
    %c0_18 = arith.constant 0 : index
    %c20_19 = arith.constant 20 : index
    %23 = vector.load %arg6[%c0_18, %c20_19] : memref<288x36xbf16, #tpu.memory_space<vmem>>, vector<288x4xbf16>
    tpu.vector_store %arg6[%c0_18, %c20_19], %22 {strides = array<i32>} : memref<288x36xbf16, #tpu.memory_space<vmem>>, vector<288x4xbf16>,
    %c0_20 = arith.constant 0 : index
    %c36 = arith.constant 36 : index
    %c0_21 = arith.constant 0 : index
    %24 = vector.load %arg1[%c0_20, %c36, %c0_21] : memref<1x326x4xf32, #tpu.memory_space<vmem>>, vector<1x288x4xf32>
    %25 = vector.shape_cast %24 : vector<1x288x4xf32> to vector<288x4xf32>
    %26 = arith.truncf %25 : vector<288x4xf32> to vector<288x4xbf16>
    %c0_22 = arith.constant 0 : index
    %c24 = arith.constant 24 : index
    %27 = vector.load %arg6[%c0_22, %c24] : memref<288x36xbf16, #tpu.memory_space<vmem>>, vector<288x4xbf16>
    tpu.vector_store %arg6[%c0_22, %c24], %26 {strides = array<i32>} : memref<288x36xbf16, #tpu.memory_space<vmem>>, vector<288x4xbf16>,
    %c0_23 = arith.constant 0 : index
    %c37 = arith.constant 37 : index
    %c0_24 = arith.constant 0 : index
    %28 = vector.load %arg1[%c0_23, %c37, %c0_24] : memref<1x326x4xf32, #tpu.memory_space<vmem>>, vector<1x288x4xf32>
    %29 = vector.shape_cast %28 : vector<1x288x4xf32> to vector<288x4xf32>
    %30 = arith.truncf %29 : vector<288x4xf32> to vector<288x4xbf16>
    %c0_25 = arith.constant 0 : index
    %c28 = arith.constant 28 : index
    %31 = vector.load %arg6[%c0_25, %c28] : memref<288x36xbf16, #tpu.memory_space<vmem>>, vector<288x4xbf16>
    tpu.vector_store %arg6[%c0_25, %c28], %30 {strides = array<i32>} : memref<288x36xbf16, #tpu.memory_space<vmem>>, vector<288x4xbf16>,
    %c0_26 = arith.constant 0 : index
    %c38 = arith.constant 38 : index
    %c0_27 = arith.constant 0 : index
    %32 = vector.load %arg1[%c0_26, %c38, %c0_27] : memref<1x326x4xf32, #tpu.memory_space<vmem>>, vector<1x288x4xf32>
    %33 = vector.shape_cast %32 : vector<1x288x4xf32> to vector<288x4xf32>
    %34 = arith.truncf %33 : vector<288x4xf32> to vector<288x4xbf16>
    %c0_28 = arith.constant 0 : index
    %c32 = arith.constant 32 : index
    %35 = vector.load %arg6[%c0_28, %c32] : memref<288x36xbf16, #tpu.memory_space<vmem>>, vector<288x4xbf16>
    tpu.vector_store %arg6[%c0_28, %c32], %34 {strides = array<i32>} : memref<288x36xbf16, #tpu.memory_space<vmem>>, vector<288x4xbf16>,
    %c0_29 = arith.constant 0 : index
    %c0_30 = arith.constant 0 : index
    %36 = vector.load %arg6[%c0_29, %c0_30] : memref<288x36xbf16, #tpu.memory_space<vmem>>, vector<288x36xbf16>
    %c0_31 = arith.constant 0 : index
    %c0_32 = arith.constant 0 : index
    %37 = vector.load %arg2[%c0_31, %c0_32] : memref<36x4xbf16, #tpu.memory_space<vmem>>, vector<36x4xbf16>
    %cst = arith.constant dense<0.000000e+00> : vector<288x4xf32>
    %38 = tpu.matmul %36, %37, %cst {dimension_numbers = #tpu.dot_dimension_numbers<[1], [0], [0], [1], [0, 0, 1, 1], [], []>} : vector<288x36xbf16>, vector<36x4xbf16>, vector<288x4xf32> -> vector<288x4xf32>
    %c0_33 = arith.constant 0 : index
    %c0_34 = arith.constant 0 : index
    %c0_35 = arith.constant 0 : index
    %39 = vector.load %arg4[%c0_33, %c0_34, %c0_35] : memref<1x288x4xf32, #tpu.memory_space<vmem>>, vector<1x288x4xf32>
    %40 = vector.shape_cast %39 : vector<1x288x4xf32> to vector<288x4xf32>
    %41 = vector.shape_cast %38 : vector<288x4xf32> to vector<1x288x4xf32>
    tpu.vector_store %arg4[%c0_33, %c0_34, %c0_35], %41 {strides = array<i32>} : memref<1x288x4xf32, #tpu.memory_space<vmem>>, vector<1x288x4xf32>,
    %c0_36 = arith.constant 0 : index
    %c0_37 = arith.constant 0 : index
    %42 = vector.load %arg3[%c0_36, %c0_37] : memref<288x1xf32, #tpu.memory_space<vmem>>, vector<288x1xf32>
    %43 = vector.broadcast %42 : vector<288x1xf32> to vector<288x4xf32>
    %44 = arith.mulf %38, %43 : vector<288x4xf32>
    %cst_38 = arith.constant dense<0.000000e+00> : vector<4xf32>
    %45 = vector.multi_reduction <add>, %44, %cst_38 [0] : vector<288x4xf32> to vector<4xf32>
    %46 = vector.shape_cast %45 : vector<4xf32> to vector<1x4xf32>
    %c0_39 = arith.constant 0 : index
    %c0_40 = arith.constant 0 : index
    %c0_41 = arith.constant 0 : index
    %47 = vector.load %arg5[%c0_39, %c0_40, %c0_41] : memref<1x2x4xf32, #tpu.memory_space<vmem>>, vector<1x1x4xf32>
    %48 = vector.shape_cast %47 : vector<1x1x4xf32> to vector<1x4xf32>
    %49 = vector.shape_cast %46 : vector<1x4xf32> to vector<1x1x4xf32>
    tpu.vector_store %arg5[%c0_39, %c0_40, %c0_41], %49 {strides = array<i32>} : memref<1x2x4xf32, #tpu.memory_space<vmem>>, vector<1x1x4xf32>,
    %50 = arith.mulf %44, %38 : vector<288x4xf32>
    %cst_42 = arith.constant dense<0.000000e+00> : vector<4xf32>
    %51 = vector.multi_reduction <add>, %50, %cst_42 [0] : vector<288x4xf32> to vector<4xf32>
    %52 = vector.shape_cast %51 : vector<4xf32> to vector<1x4xf32>
    %c0_43 = arith.constant 0 : index
    %c1_44 = arith.constant 1 : index
    %c0_45 = arith.constant 0 : index
    %53 = vector.load %arg5[%c0_43, %c1_44, %c0_45] : memref<1x2x4xf32, #tpu.memory_space<vmem>>, vector<1x1x4xf32>
    %54 = vector.shape_cast %53 : vector<1x1x4xf32> to vector<1x4xf32>
    %55 = vector.shape_cast %52 : vector<1x4xf32> to vector<1x1x4xf32>
    tpu.vector_store %arg5[%c0_43, %c1_44, %c0_45], %55 {strides = array<i32>} : memref<1x2x4xf32, #tpu.memory_space<vmem>>, vector<1x1x4xf32>,
    return
  }
  func.func @transform_0(%arg0: i32) -> (i32, i32, i32) {
    %c0_i32 = arith.constant 0 : i32
    %c0_i32_0 = arith.constant 0 : i32
    %c0_i32_1 = arith.constant 0 : i32
    return %arg0, %c0_i32, %c0_i32_0 : i32, i32, i32
  }
  func.func @transform_1(%arg0: i32) -> (i32, i32) {
    %c0_i32 = arith.constant 0 : i32
    %c0_i32_0 = arith.constant 0 : i32
    %c0_i32_1 = arith.constant 0 : i32
    return %c0_i32, %c0_i32_0 : i32, i32
  }
  func.func @transform_2(%arg0: i32) -> (i32, i32) {
    %c0_i32 = arith.constant 0 : i32
    %c0_i32_0 = arith.constant 0 : i32
    %c0_i32_1 = arith.constant 0 : i32
    return %c0_i32, %c0_i32_0 : i32, i32
  }
  func.func @transform_3(%arg0: i32) -> (i32, i32, i32) {
    %c0_i32 = arith.constant 0 : i32
    %c0_i32_0 = arith.constant 0 : i32
    %c0_i32_1 = arith.constant 0 : i32
    return %arg0, %c0_i32, %c0_i32_0 : i32, i32, i32
  }
  func.func @transform_4(%arg0: i32) -> (i32, i32, i32) {
    %c0_i32 = arith.constant 0 : i32
    %c0_i32_0 = arith.constant 0 : i32
    %c0_i32_1 = arith.constant 0 : i32
    return %arg0, %c0_i32, %c0_i32_0 : i32, i32, i32
  }
}

</mosaic_0001>

<bundles_post_ra>
// kernel: stack_decoder_2d.5
= control target key start
LH: loop header
LB: loop body
LE: loop exit
PB: predicated region body
PF: predicated region fallthrough
CT: control target
= control target key end

     0   :  { %s469_s12 = smov 0   ;;  %s680_s0 = inlined_call_operand.vmem [shape: f32[2,288,4], index: 0, kind: input, shape index: {}]   ;;  %s681_s1 = inlined_call_operand.vmem [shape: f32[1,4], index: 1, kind: input, shape index: {}]   ;;  %s682_s2 = inlined_call_operand.vmem [shape: f32[1,4], index: 2, kind: input, shape index: {}]   ;;  %s683_s3 = inlined_call_operand.vmem [shape: f32[2,288,4], index: 3, kind: output, shape index: {}]  }
   0x1 LB: > { %s421_s13 = sadd.s32 4294967295, %s447_s12   ;;  %p425_p0 = scmp.ge.s32.totalorder %s447_s12, 1  ;;  %s447_s12 = sphi %s469_s12, %s13_s12  }
   0x2   : > { %p137_p1 = scmp.lt.s32.totalorder %s447_s12, 3 }
   0x4   : > { %p138_p2 = pnand %p425_p0, %p137_p1 }
   0x5   : > { %p161_p3 = scmp.lt.s32.totalorder (!%p138_p2), %s421_s13, 1  ;;  %v480_v0 = vld [vmem:[%s681_s1] ss:$0 sm:$0xff] (!%p138_p2)  ;;  %vm329_vm0 = vcmask (!%p138_p2), 31744  }
   0x6   : > { %141 = sbr.rel (%p138_p2) target bundleno = 50 (0x32), region = 32  ;;  %v490_v1 = vld [vmem:[%s682_s2] ss:$0 sm:$0xff] (!%p138_p2) }
   0xd   : > { %s685_s13 = smov (!%p161_p3, %s421_s13), 1 }
   0xe   : > { %s432_s14 = smul.u32 288, %s685_s13 }
  0x10   : > { %s485_s19 = scalar_lea.vmem %s680_s0, %s432_s14  ;;  %s513_s24 = scalar_lea.vmem %s683_s3, %s432_s14 }
  0x11   : > { %v171_v2 = vld [vmem:[%s485_s19] sm:$0xff]  ;;  %v172_v3 = vld [vmem:[%s485_s19 + $0x8] sm:$0xff]  ;;  %v173_v4 = vld [vmem:[%s485_s19 + $0x10] sm:$0xff] }
  0x12   : > { %v214_v5 = vmul.f32 %v480_v0, %v171_v2  ;;  %v215_v6 = vmul.f32 %v480_v0, %v172_v3  ;;  %v216_v7 = vmul.f32 %v480_v0, %v173_v4  ;;  %v174_v8 = vld [vmem:[%s485_s19 + $0x18] sm:$0xff]  ;;  %v175_v9 = vld [vmem:[%s485_s19 + $0x20] sm:$0xff]  ;;  %v176_v10 = vld [vmem:[%s485_s19 + $0x28] sm:$0xff] }
  0x13   : > { %v217_v11 = vmul.f32 %v480_v0, %v174_v8  ;;  %v218_v12 = vmul.f32 %v480_v0, %v175_v9  ;;  %v219_v13 = vmul.f32 %v480_v0, %v176_v10  ;;  %v177_v14 = vld [vmem:[%s485_s19 + $0x30] sm:$0xff]  ;;  %v178_v15 = vld [vmem:[%s485_s19 + $0x38] sm:$0xff]  ;;  %v179_v24 = vld [vmem:[%s485_s19 + $0x40] sm:$0xff] }
  0x14   : > { %v257_v16 = vadd.f32 %v490_v1, %v214_v5  ;;  %v258_v17 = vadd.f32 %v490_v1, %v215_v6  ;;  %v259_v18 = vadd.f32 %v490_v1, %v216_v7  ;;  %v220_v19 = vmul.f32 %v480_v0, %v177_v14  ;;  %v180_v25 = vld [vmem:[%s485_s19 + $0x48] sm:$0xff]  ;;  %v181_v26 = vld [vmem:[%s485_s19 + $0x50] sm:$0xff]  ;;  %v182_v31 = vld [vmem:[%s485_s19 + $0x58] sm:$0xff] }
  0x15   : > { %v260_v20 = vadd.f32 %v490_v1, %v217_v11  ;;  %v261_v21 = vadd.f32 %v490_v1, %v218_v12  ;;  %v262_v22 = vadd.f32 %v490_v1, %v219_v13  ;;  %v221_v23 = vmul.f32 %v480_v0, %v178_v15  ;;  %v183_v32 = vld [vmem:[%s485_s19 + $0x60] sm:$0xff]  ;;  %v184_v33 = vld [vmem:[%s485_s19 + $0x68] sm:$0xff]  ;;  %v185_v38 = vld [vmem:[%s485_s19 + $0x70] sm:$0xff] }
  0x16   : > { %v293_v27 = vmax.f32 %v257_v16, 0.0  ;;  %v294_v28 = vmax.f32 %v258_v17, 0.0  ;;  %v295_v29 = vmax.f32 %v259_v18, 0.0  ;;  %v263_v30 = vadd.f32 %v490_v1, %v220_v19  ;;  %v186_v43 = vld [vmem:[%s485_s19 + $0x78] sm:$0xff]  ;;  %v187_v56 = vld [vmem:[%s485_s19 + $0x80] sm:$0xff]  ;;  %v188_v57 = vld [vmem:[%s485_s19 + $0x88] sm:$0xff] }
  0x17   : > { %v296_v34 = vmax.f32 %v260_v20, 0.0  ;;  %v297_v35 = vmax.f32 %v261_v21, 0.0  ;;  %v298_v36 = vmax.f32 %v262_v22, 0.0  ;;  %v264_v37 = vadd.f32 %v490_v1, %v221_v23  ;;  %v189_v58 = vld [vmem:[%s485_s19 + $0x90] sm:$0xff]  ;;  %v190_v63 = vld [vmem:[%s485_s19 + $0x98] sm:$0xff]  ;;  %v191_v2 = vld [vmem:[%s485_s19 + $0xa0] sm:$0xff] }
  0x18   : > { %330 = vst.msk [vmem:[%s513_s24] sm:$0xff] %vm329_vm0, %v293_v27  ;;  %331 = vst.msk [vmem:[%s513_s24 + $0x8] sm:$0xff] %vm329_vm0, %v294_v28  ;;  %v299_v39 = vmax.f32 %v263_v30, 0.0  ;;  %v222_v40 = vmul.f32 %v480_v0, %v179_v24  ;;  %v223_v41 = vmul.f32 %v480_v0, %v180_v25  ;;  %v224_v42 = vmul.f32 %v480_v0, %v181_v26  ;;  %v192_v3 = vld [vmem:[%s485_s19 + $0xa8] sm:$0xff]  ;;  %v193_v8 = vld [vmem:[%s485_s19 + $0xb0] sm:$0xff] }
  0x19   : > { %332 = vst.msk [vmem:[%s513_s24 + $0x10] sm:$0xff] %vm329_vm0, %v295_v29  ;;  %333 = vst.msk [vmem:[%s513_s24 + $0x18] sm:$0xff] %vm329_vm0, %v296_v34  ;;  %v300_v44 = vmax.f32 %v264_v37, 0.0  ;;  %v225_v45 = vmul.f32 %v480_v0, %v182_v31  ;;  %v226_v46 = vmul.f32 %v480_v0, %v183_v32  ;;  %v227_v47 = vmul.f32 %v480_v0, %v184_v33  ;;  %v194_v13 = vld [vmem:[%s485_s19 + $0xb8] sm:$0xff]  ;;  %v195_v26 = vld [vmem:[%s485_s19 + $0xc0] sm:$0xff] }
  0x1a   : > { %334 = vst.msk [vmem:[%s513_s24 + $0x20] sm:$0xff] %vm329_vm0, %v297_v35  ;;  %335 = vst.msk [vmem:[%s513_s24 + $0x28] sm:$0xff] %vm329_vm0, %v298_v36  ;;  %v265_v48 = vadd.f32 %v490_v1, %v222_v40  ;;  %v266_v49 = vadd.f32 %v490_v1, %v223_v41  ;;  %v267_v50 = vadd.f32 %v490_v1, %v224_v42  ;;  %v196_v27 = vld [vmem:[%s485_s19 + $0xc8] sm:$0xff]  ;;  %v197_v28 = vld [vmem:[%s485_s19 + $0xd0] sm:$0xff] }
  0x1b   : > { %336 = vst.msk [vmem:[%s513_s24 + $0x30] sm:$0xff] %vm329_vm0, %v299_v39  ;;  %v228_v51 = vmul.f32 %v480_v0, %v185_v38  ;;  %337 = vst.msk [vmem:[%s513_s24 + $0x38] sm:$0xff] %vm329_vm0, %v300_v44  ;;  %v268_v52 = vadd.f32 %v490_v1, %v225_v45  ;;  %v269_v53 = vadd.f32 %v490_v1, %v226_v46  ;;  %v198_v33 = vld [vmem:[%s485_s19 + $0xd8] sm:$0xff]  ;;  %v199_v34 = vld [vmem:[%s485_s19 + $0xe0] sm:$0xff] }
  0x1c   : > { %v270_v54 = vadd.f32 %v490_v1, %v227_v47  ;;  %v229_v55 = vmul.f32 %v480_v0, %v186_v43  ;;  %v301_v59 = vmax.f32 %v265_v48, 0.0  ;;  %v302_v60 = vmax.f32 %v266_v49, 0.0  ;;  %v200_v35 = vld [vmem:[%s485_s19 + $0xe8] sm:$0xff]  ;;  %v201_v40 = vld [vmem:[%s485_s19 + $0xf0] sm:$0xff]  ;;  %v202_v45 = vld [vmem:[%s485_s19 + $0xf8] sm:$0xff] }
  0x1d   : > { %v303_v61 = vmax.f32 %v267_v50, 0.0  ;;  %v271_v62 = vadd.f32 %v490_v1, %v228_v51  ;;  %v304_v4 = vmax.f32 %v268_v52, 0.0  ;;  %v305_v5 = vmax.f32 %v269_v53, 0.0 }
  0x1e   : > { %v306_v6 = vmax.f32 %v270_v54, 0.0  ;;  %v272_v7 = vadd.f32 %v490_v1, %v229_v55  ;;  %338 = vst.msk [vmem:[%s513_s24 + $0x40] sm:$0xff] %vm329_vm0, %v301_v59  ;;  %339 = vst.msk [vmem:[%s513_s24 + $0x48] sm:$0xff] %vm329_vm0, %v302_v60  ;;  %v230_v10 = vmul.f32 %v480_v0, %v187_v56  ;;  %v231_v11 = vmul.f32 %v480_v0, %v188_v57  ;;  %v204_v59 = vld [vmem:[%s485_s19 + $0x108] sm:$0xff]  ;;  %v205_v60 = vld [vmem:[%s485_s19 + $0x110] sm:$0xff] }
  0x1f   : > { %340 = vst.msk [vmem:[%s513_s24 + $0x50] sm:$0xff] %vm329_vm0, %v303_v61  ;;  %v307_v9 = vmax.f32 %v271_v62, 0.0  ;;  %v232_v12 = vmul.f32 %v480_v0, %v189_v58  ;;  %341 = vst.msk [vmem:[%s513_s24 + $0x58] sm:$0xff] %vm329_vm0, %v304_v4  ;;  %v233_v15 = vmul.f32 %v480_v0, %v190_v63  ;;  %v234_v16 = vmul.f32 %v480_v0, %v191_v2  ;;  %v203_v58 = vld [vmem:[%s485_s19 + $0x100] sm:$0xff] }
  0x20   : > { %342 = vst.msk [vmem:[%s513_s24 + $0x60] sm:$0xff] %vm329_vm0, %v305_v5  ;;  %343 = vst.msk [vmem:[%s513_s24 + $0x68] sm:$0xff] %vm329_vm0, %v306_v6  ;;  %v308_v14 = vmax.f32 %v272_v7, 0.0  ;;  %v235_v17 = vmul.f32 %v480_v0, %v192_v3  ;;  %v273_v18 = vadd.f32 %v490_v1, %v230_v10  ;;  %v274_v19 = vadd.f32 %v490_v1, %v231_v11  ;;  %v206_v3 = vld [vmem:[%s485_s19 + $0x118] sm:$0xff] }
  0x21   : > { %344 = vst.msk [vmem:[%s513_s24 + $0x70] sm:$0xff] %vm329_vm0, %v307_v9  ;;  %v275_v20 = vadd.f32 %v490_v1, %v232_v12  ;;  %v236_v21 = vmul.f32 %v480_v0, %v193_v8  ;;  %v276_v22 = vadd.f32 %v490_v1, %v233_v15  ;;  %v277_v23 = vadd.f32 %v490_v1, %v234_v16 }
  0x22   : > { %345 = vst.msk [vmem:[%s513_s24 + $0x78] sm:$0xff] %vm329_vm0, %v308_v14  ;;  %v278_v24 = vadd.f32 %v490_v1, %v235_v17  ;;  %v237_v25 = vmul.f32 %v480_v0, %v194_v13  ;;  %v309_v29 = vmax.f32 %v273_v18, 0.0  ;;  %v310_v30 = vmax.f32 %v274_v19, 0.0 }
  0x23   : > { %v311_v31 = vmax.f32 %v275_v20, 0.0  ;;  %v279_v32 = vadd.f32 %v490_v1, %v236_v21  ;;  %v312_v36 = vmax.f32 %v276_v22, 0.0  ;;  %v313_v37 = vmax.f32 %v277_v23, 0.0 }
  0x24   : > { %v314_v38 = vmax.f32 %v278_v24, 0.0  ;;  %v280_v39 = vadd.f32 %v490_v1, %v237_v25  ;;  %346 = vst.msk [vmem:[%s513_s24 + $0x80] sm:$0xff] %vm329_vm0, %v309_v29  ;;  %347 = vst.msk [vmem:[%s513_s24 + $0x88] sm:$0xff] %vm329_vm0, %v310_v30  ;;  %v238_v42 = vmul.f32 %v480_v0, %v195_v26  ;;  %v239_v43 = vmul.f32 %v480_v0, %v196_v27 }
  0x25   : > { %348 = vst.msk [vmem:[%s513_s24 + $0x90] sm:$0xff] %vm329_vm0, %v311_v31  ;;  %v315_v41 = vmax.f32 %v279_v32, 0.0  ;;  %v240_v44 = vmul.f32 %v480_v0, %v197_v28  ;;  %349 = vst.msk [vmem:[%s513_s24 + $0x98] sm:$0xff] %vm329_vm0, %v312_v36  ;;  %v241_v47 = vmul.f32 %v480_v0, %v198_v33  ;;  %v242_v48 = vmul.f32 %v480_v0, %v199_v34 }
  0x26   : > { %350 = vst.msk [vmem:[%s513_s24 + $0xa0] sm:$0xff] %vm329_vm0, %v313_v37  ;;  %351 = vst.msk [vmem:[%s513_s24 + $0xa8] sm:$0xff] %vm329_vm0, %v314_v38  ;;  %v316_v46 = vmax.f32 %v280_v39, 0.0  ;;  %v243_v49 = vmul.f32 %v480_v0, %v200_v35  ;;  %v281_v50 = vadd.f32 %v490_v1, %v238_v42  ;;  %v282_v51 = vadd.f32 %v490_v1, %v239_v43 }
  0x27   : > { %352 = vst.msk [vmem:[%s513_s24 + $0xb0] sm:$0xff] %vm329_vm0, %v315_v41  ;;  %v283_v52 = vadd.f32 %v490_v1, %v240_v44  ;;  %v244_v53 = vmul.f32 %v480_v0, %v201_v40  ;;  %v284_v54 = vadd.f32 %v490_v1, %v241_v47  ;;  %v285_v55 = vadd.f32 %v490_v1, %v242_v48 }
  0x28   : > { %353 = vst.msk [vmem:[%s513_s24 + $0xb8] sm:$0xff] %vm329_vm0, %v316_v46  ;;  %v286_v56 = vadd.f32 %v490_v1, %v243_v49  ;;  %v245_v57 = vmul.f32 %v480_v0, %v202_v45  ;;  %v317_v61 = vmax.f32 %v281_v50, 0.0  ;;  %v318_v62 = vmax.f32 %v282_v51, 0.0 }
  0x29   : > { %v319_v63 = vmax.f32 %v283_v52, 0.0  ;;  %v287_v2 = vadd.f32 %v490_v1, %v244_v53  ;;  %v320_v4 = vmax.f32 %v284_v54, 0.0  ;;  %v321_v5 = vmax.f32 %v285_v55, 0.0 }
  0x2a   : > { %v322_v6 = vmax.f32 %v286_v56, 0.0  ;;  %v288_v7 = vadd.f32 %v490_v1, %v245_v57  ;;  %354 = vst.msk [vmem:[%s513_s24 + $0xc0] sm:$0xff] %vm329_vm0, %v317_v61  ;;  %355 = vst.msk [vmem:[%s513_s24 + $0xc8] sm:$0xff] %vm329_vm0, %v318_v62  ;;  %v246_v9 = vmul.f32 %v480_v0, %v203_v58  ;;  %v247_v10 = vmul.f32 %v480_v0, %v204_v59 }
  0x2b   : > { %356 = vst.msk [vmem:[%s513_s24 + $0xd0] sm:$0xff] %vm329_vm0, %v319_v63  ;;  %v323_v8 = vmax.f32 %v287_v2, 0.0  ;;  %v248_v11 = vmul.f32 %v480_v0, %v205_v60  ;;  %357 = vst.msk [vmem:[%s513_s24 + $0xd8] sm:$0xff] %vm329_vm0, %v320_v4  ;;  %v249_v13 = vmul.f32 %v480_v0, %v206_v3 }
  0x2c   : > { %358 = vst.msk [vmem:[%s513_s24 + $0xe0] sm:$0xff] %vm329_vm0, %v321_v5  ;;  %359 = vst.msk [vmem:[%s513_s24 + $0xe8] sm:$0xff] %vm329_vm0, %v322_v6  ;;  %v324_v12 = vmax.f32 %v288_v7, 0.0  ;;  %v289_v14 = vadd.f32 %v490_v1, %v246_v9  ;;  %v290_v15 = vadd.f32 %v490_v1, %v247_v10 }
  0x2d   : > { %360 = vst.msk [vmem:[%s513_s24 + $0xf0] sm:$0xff] %vm329_vm0, %v323_v8  ;;  %v291_v16 = vadd.f32 %v490_v1, %v248_v11  ;;  %v292_v17 = vadd.f32 %v490_v1, %v249_v13 }
  0x2e   : > { %361 = vst.msk [vmem:[%s513_s24 + $0xf8] sm:$0xff] %vm329_vm0, %v324_v12  ;;  %v325_v18 = vmax.f32 %v289_v14, 0.0  ;;  %v326_v19 = vmax.f32 %v290_v15, 0.0 }
  0x2f   : > { %v327_v20 = vmax.f32 %v291_v16, 0.0  ;;  %v328_v21 = vmax.f32 %v292_v17, 0.0 }
  0x30   : > { %362 = vst.msk [vmem:[%s513_s24 + $0x100] sm:$0xff] %vm329_vm0, %v325_v18  ;;  %363 = vst.msk [vmem:[%s513_s24 + $0x108] sm:$0xff] %vm329_vm0, %v326_v19 }
  0x31   : > { %364 = vst.msk [vmem:[%s513_s24 + $0x110] sm:$0xff] %vm329_vm0, %v327_v20  ;;  %365 = vst.msk [vmem:[%s513_s24 + $0x118] sm:$0xff] %vm329_vm0, %v328_v21 }
  0x32 PF: > { %s13_s12 = sadd.s32 1, %s447_s12  }
  0x33   : > { %p10_p4 = scmp.ge.s32.totalorder %s13_s12, 4  }
  0x35   :  { %12 = sbr.rel (!%p10_p4) target bundleno = 1 (0x1), region = 62 }

// kernel: stack_decoder_2d.4
= control target key start
LH: loop header
LB: loop body
LE: loop exit
PB: predicated region body
PF: predicated region fallthrough
CT: control target
= control target key end

     0   :  { %s2483_s15 = smov 0   ;;  %s3427_s0 = inlined_call_operand.vmem [shape: f32[2,326,8], index: 0, kind: input, shape index: {}]   ;;  %s3428_s1 = inlined_call_operand.vmem [shape: bf16[72,4], index: 1, kind: input, shape index: {}]   ;;  %s3429_s2 = inlined_call_operand.vmem [shape: f32[288,1], index: 2, kind: input, shape index: {}]   ;;  %s3430_s3 = inlined_call_operand.vmem [shape: f32[2,288,4], index: 3, kind: output, shape index: {0}]   ;;  %s3431_s4 = inlined_call_operand.vmem [shape: f32[2,2,4], index: 4, kind: output, shape index: {1}]  }
   0x1 LB: > { %s2301_s16 = sadd.s32 4294967295, %s2447_s15   ;;  %p2305_p0 = scmp.ge.s32.totalorder %s2447_s15, 1  ;;  %s2447_s15 = sphi %s2483_s15, %s15_s15  }
   0x2   : > { %p165_p1 = scmp.lt.s32.totalorder %s2447_s15, 3 }
   0x4   : > { %p166_p2 = pnand %p2305_p0, %p165_p1 }
   0x5   : > { %p195_p3 = scmp.lt.s32.totalorder (!%p166_p2), %s2301_s16, 1  ;;  %s2449_s21 = smov (!%p166_p2), 8   ;;  %vm264_vm0 = vcmask (!%p166_p2), 64512   ;;  %vm1552_vm1 = vcmask (!%p166_p2), 1043456   ;;  %vm409_vm2 = vcmask (!%p166_p2), 130112   ;;  %vm554_vm3 = vcmask (!%p166_p2), 195712  }
   0x6   : > { %169 = sbr.rel (%p166_p2) target bundleno = 668 (0x29c), region = 32  ;;  %s2450_s22 = smov (!%p166_p2), 16   ;;  %vm699_vm4 = vcmask (!%p166_p2), 261312   ;;  %vm844_vm5 = vcmask (!%p166_p2), 326912   ;;  %vm989_vm6 = vcmask (!%p166_p2), 392512   ;;  %vm1134_vm7 = vcmask (!%p166_p2), 458112  }
   0x7   : > { %s2451_s23 = smov (!%p166_p2), 24   ;;  %s2452_s28 = smov (!%p166_p2), 32   ;;  %vm1279_vm8 = vcmask (!%p166_p2), 523712   ;;  %vm1424_vm9 = vcmask (!%p166_p2), 589312   ;;  %vm1497_vm10 = vcmask (!%p166_p2), 588800   ;;  %vm1733_vm11 = vcmask (!%p166_p2), 31744  }
   0x8   : > { %s2453_s5 = smov (!%p166_p2), 40   ;;  %s2454_s8 = smov (!%p166_p2), 48   ;;  %vm2099_vm12 = vcmask (!%p166_p2), 24576  }
   0x9   : > { %s2455_s11 = smov (!%p166_p2), 56   ;;  %s2456_s12 = smov (!%p166_p2), 64  }
   0xd   : > { %s3433_s16 = smov (!%p195_p3, %s2301_s16), 1 }
   0xe   : > { %s2415_s17 = smul.u32 328, %s3433_s16  ;;  %s2308_s19 = sshll.u32 %s3433_s16, 1 }
   0xf   : > { %s2416_s13 = smul.u32 288, %s3433_s16 }
  0x10   : > { %s2497_s20 = scalar_lea.vmem %s3427_s0, %s2415_s17 }
  0x11   : > { %v287_v0 = vld [vmem:[%s2497_s20 + $0x21] sm:$0xff]  ;;  %v288_v1 = vld [vmem:[%s2497_s20 + $0x29] sm:$0xff]  ;;  %v289_v5 = vld [vmem:[%s2497_s20 + $0x31] sm:$0xff]  ;;  %s3274_s18 = scalar_lea.vmem %s3430_s3, %s2416_s13 }
  0x12   : > { %v283_v2 = vld [vmem:[%s2497_s20 + $0x1] sm:$0xff]  ;;  %v321_v3 = vpack.c.bf16 %v288_v1, %v287_v0  ;;  %v284_v4 = vld [vmem:[%s2497_s20 + $0x9] sm:$0xff]  ;;  %v290_v6 = vld [vmem:[%s2497_s20 + $0x39] sm:$0xff] }
  0x13   : > { %v319_v7 = vpack.c.bf16 %v284_v4, %v283_v2  ;;  %v285_v8 = vld [vmem:[%s2497_s20 + $0x11] sm:$0xff]  ;;  %v286_v9 = vld [vmem:[%s2497_s20 + $0x19] sm:$0xff]  ;;  %v322_v10 = vpack.c.bf16 %v290_v6, %v289_v5  ;;  %v291_v14 = vld [vmem:[%s2497_s20 + $0x41] sm:$0xff] }
  0x14   : > { %359 = vrot.lane.b32.xlu1 %v321_v3, %s2449_s21  ;;  %v320_v11 = vpack.c.bf16 %v286_v9, %v285_v8  ;;  %v293_v12 = vld [vmem:[%s2497_s20 + $0x51] sm:$0xff]  ;;  %v294_v13 = vld [vmem:[%s2497_s20 + $0x59] sm:$0xff]  ;;  %v292_v15 = vld [vmem:[%s2497_s20 + $0x49] sm:$0xff] }
  0x15   : > { %355 = vrot.lane.b32.xlu0 %v319_v7, %s2449_s21  ;;  %v324_v16 = vpack.c.bf16 %v294_v13, %v293_v12  ;;  %v323_v17 = vpack.c.bf16 %v292_v15, %v291_v14  ;;  %v297_v18 = vld [vmem:[%s2497_s20 + $0x71] sm:$0xff]  ;;  %v298_v19 = vld [vmem:[%s2497_s20 + $0x79] sm:$0xff]  ;;  %v295_v20 = vld [vmem:[%s2497_s20 + $0x61] sm:$0xff] }
  0x16   : > { %v296_v21 = vld [vmem:[%s2497_s20 + $0x69] sm:$0xff]  ;;  %v326_v22 = vpack.c.bf16 %v298_v19, %v297_v18  ;;  %v301_v24 = vld [vmem:[%s2497_s20 + $0x91] sm:$0xff]  ;;  %v302_v25 = vld [vmem:[%s2497_s20 + $0x99] sm:$0xff] }
  0x17   : > { %v325_v23 = vpack.c.bf16 %v296_v21, %v295_v20  ;;  %v299_v26 = vld [vmem:[%s2497_s20 + $0x81] sm:$0xff]  ;;  %v300_v27 = vld [vmem:[%s2497_s20 + $0x89] sm:$0xff]  ;;  %v328_v28 = vpack.c.bf16 %v302_v25, %v301_v24  ;;  %v305_v30 = vld [vmem:[%s2497_s20 + $0xb1] sm:$0xff] }
  0x18   : > { %361 = vrot.lane.b32.xlu1 %v322_v10, %s2449_s21  ;;  %v327_v29 = vpack.c.bf16 %v300_v27, %v299_v26  ;;  %v306_v31 = vld [vmem:[%s2497_s20 + $0xb9] sm:$0xff]  ;;  %v303_v32 = vld [vmem:[%s2497_s20 + $0xa1] sm:$0xff]  ;;  %v304_v33 = vld [vmem:[%s2497_s20 + $0xa9] sm:$0xff] }
  0x19   : > { %357 = vrot.lane.b32.xlu0 %v320_v11, %s2449_s21  ;;  %v330_v34 = vpack.c.bf16 %v306_v31, %v305_v30  ;;  %v329_v35 = vpack.c.bf16 %v304_v33, %v303_v32  ;;  %v309_v36 = vld [vmem:[%s2497_s20 + $0xd1] sm:$0xff]  ;;  %v310_v37 = vld [vmem:[%s2497_s20 + $0xd9] sm:$0xff]  ;;  %v307_v38 = vld [vmem:[%s2497_s20 + $0xc1] sm:$0xff] }
  0x1a   : > { %v308_v39 = vld [vmem:[%s2497_s20 + $0xc9] sm:$0xff]  ;;  %v332_v40 = vpack.c.bf16 %v310_v37, %v309_v36  ;;  %v313_v42 = vld [vmem:[%s2497_s20 + $0xf1] sm:$0xff]  ;;  %v314_v43 = vld [vmem:[%s2497_s20 + $0xf9] sm:$0xff] }
  0x1b   : > { %v331_v41 = vpack.c.bf16 %v308_v39, %v307_v38  ;;  %v311_v44 = vld [vmem:[%s2497_s20 + $0xe1] sm:$0xff]  ;;  %v312_v45 = vld [vmem:[%s2497_s20 + $0xe9] sm:$0xff]  ;;  %v334_v46 = vpack.c.bf16 %v314_v43, %v313_v42  ;;  %v317_v48 = vld [vmem:[%s2497_s20 + $0x111] sm:$0xff] }
  0x1c   : > { %365 = vrot.lane.b32.xlu1 %v324_v16, %s2449_s21  ;;  %v333_v47 = vpack.c.bf16 %v312_v45, %v311_v44  ;;  %v318_v49 = vld [vmem:[%s2497_s20 + $0x119] sm:$0xff]  ;;  %v315_v50 = vld [vmem:[%s2497_s20 + $0x101] sm:$0xff]  ;;  %v316_v51 = vld [vmem:[%s2497_s20 + $0x109] sm:$0xff] }
  0x1d   : > { %363 = vrot.lane.b32.xlu0 %v323_v17, %s2449_s21  ;;  %v336_v52 = vpack.c.bf16 %v318_v49, %v317_v48  ;;  %v430_v53 = vld [vmem:[%s2497_s20 + $0x12] sm:$0xff]  ;;  %v431_v54 = vld [vmem:[%s2497_s20 + $0x1a] sm:$0xff]  ;;  %v335_v55 = vpack.c.bf16 %v316_v51, %v315_v50  ;;  %v211_v57 = vld [vmem:[%s2497_s20 + $0x8] sm:$0xff] }
  0x1e   : > { %v210_v56 = vld [vmem:[%s2497_s20] sm:$0xff]  ;;  %v429_v60 = vld [vmem:[%s2497_s20 + $0xa] sm:$0xff]  ;;  %v213_v1 = vld [vmem:[%s2497_s20 + $0x18] sm:$0xff]  ;;  %v2563_v3 = vpack.c.bf16 %v431_v54, %v430_v53 }
  0x1f   : > { %v214_v58 = vld [vmem:[%s2497_s20 + $0x20] sm:$0xff]  ;;  %v246_v61 = vpack.c.bf16 %v211_v57, %v210_v56  ;;  %v215_v62 = vld [vmem:[%s2497_s20 + $0x28] sm:$0xff]  ;;  %v212_v0 = vld [vmem:[%s2497_s20 + $0x10] sm:$0xff] }
  0x20   : > { %369 = vrot.lane.b32.xlu1 %v326_v22, %s2449_s21  ;;  %v428_v59 = vld [vmem:[%s2497_s20 + $0x2] sm:$0xff]  ;;  %v248_v63 = vpack.c.bf16 %v215_v62, %v214_v58  ;;  %v216_v2 = vld [vmem:[%s2497_s20 + $0x30] sm:$0xff]  ;;  %v435_v5 = vld [vmem:[%s2497_s20 + $0x3a] sm:$0xff]  ;;  %v247_v6 = vpack.c.bf16 %v213_v1, %v212_v0 }
  0x21   : > { %367 = vrot.lane.b32.xlu0 %v325_v23, %s2449_s21  ;;  %v434_v4 = vld [vmem:[%s2497_s20 + $0x32] sm:$0xff]  ;;  %265 = vst.msk [vmem:[#allocation2] sm:$0xff] %vm264_vm0, %v246_v61  ;;  %v464_v8 = vpack.c.bf16 %v429_v60, %v428_v59  ;;  %v432_v9 = vld [vmem:[%s2497_s20 + $0x22] sm:$0xff]  ;;  %v433_v10 = vld [vmem:[%s2497_s20 + $0x2a] sm:$0xff] }
  0x22   : > { %v217_v7 = vld [vmem:[%s2497_s20 + $0x38] sm:$0xff]  ;;  %267 = vst.msk [vmem:[#allocation2 + $0x10] sm:$0xff] %vm264_vm0, %v248_v63  ;;  %v218_v12 = vld [vmem:[%s2497_s20 + $0x40] sm:$0xff]  ;;  %266 = vst.msk [vmem:[#allocation2 + $0x8] sm:$0xff] %vm264_vm0, %v247_v6  ;;  %v2582_v19 = vpack.c.bf16 %v435_v5, %v434_v4  ;;  %v2588_v23 = vpack.c.bf16 %v433_v10, %v432_v9 }
  0x23   : > { %v249_v11 = vpack.c.bf16 %v217_v7, %v216_v2  ;;  %v219_v13 = vld [vmem:[%s2497_s20 + $0x48] sm:$0xff]  ;;  %v220_v14 = vld [vmem:[%s2497_s20 + $0x50] sm:$0xff]  ;;  %v221_v15 = vld [vmem:[%s2497_s20 + $0x58] sm:$0xff] }
  0x24   : > { %373 = vrot.lane.b32.xlu1 %v328_v28, %s2449_s21  ;;  %v438_v16 = vld [vmem:[%s2497_s20 + $0x52] sm:$0xff]  ;;  %v250_v17 = vpack.c.bf16 %v219_v13, %v218_v12  ;;  %v251_v18 = vpack.c.bf16 %v221_v15, %v220_v14  ;;  %v439_v20 = vld [vmem:[%s2497_s20 + $0x5a] sm:$0xff]  ;;  %v223_v22 = vld [vmem:[%s2497_s20 + $0x68] sm:$0xff] }
  0x25   : > { %371 = vrot.lane.b32.xlu0 %v327_v29, %s2449_s21  ;;  %268 = vst.msk [vmem:[#allocation2 + $0x18] sm:$0xff] %vm264_vm0, %v249_v11  ;;  %v222_v21 = vld [vmem:[%s2497_s20 + $0x60] sm:$0xff]  ;;  %v224_v26 = vld [vmem:[%s2497_s20 + $0x70] sm:$0xff]  ;;  %v225_v27 = vld [vmem:[%s2497_s20 + $0x78] sm:$0xff]  ;;  %v2604_v36 = vpack.c.bf16 %v439_v20, %v438_v16 }
  0x26   : > { %v436_v24 = vld [vmem:[%s2497_s20 + $0x42] sm:$0xff]  ;;  %269 = vst.msk [vmem:[#allocation2 + $0x20] sm:$0xff] %vm264_vm0, %v250_v17  ;;  %270 = vst.msk [vmem:[#allocation2 + $0x28] sm:$0xff] %vm264_vm0, %v251_v18  ;;  %v252_v25 = vpack.c.bf16 %v223_v22, %v222_v21  ;;  %v437_v28 = vld [vmem:[%s2497_s20 + $0x4a] sm:$0xff]  ;;  %v253_v29 = vpack.c.bf16 %v225_v27, %v224_v26 }
  0x27   : > { %v226_v30 = vld [vmem:[%s2497_s20 + $0x80] sm:$0xff]  ;;  %v227_v31 = vld [vmem:[%s2497_s20 + $0x88] sm:$0xff]  ;;  %v442_v32 = vld [vmem:[%s2497_s20 + $0x72] sm:$0xff] }
  0x28   : > { %377 = vrot.lane.b32.xlu1 %v330_v34, %s2449_s21  ;;  %271 = vst.msk [vmem:[#allocation2 + $0x30] sm:$0xff] %vm264_vm0, %v252_v25  ;;  %v254_v33 = vpack.c.bf16 %v227_v31, %v226_v30  ;;  %v228_v34 = vld [vmem:[%s2497_s20 + $0x90] sm:$0xff]  ;;  %v443_v37 = vld [vmem:[%s2497_s20 + $0x7a] sm:$0xff]  ;;  %272 = vst.msk [vmem:[#allocation2 + $0x38] sm:$0xff] %vm264_vm0, %v253_v29 }
  0x29   : > { %375 = vrot.lane.b32.xlu0 %v329_v35, %s2449_s21  ;;  %v229_v35 = vld [vmem:[%s2497_s20 + $0x98] sm:$0xff]  ;;  %v230_v39 = vld [vmem:[%s2497_s20 + $0xa0] sm:$0xff]  ;;  %v232_v44 = vld [vmem:[%s2497_s20 + $0xb0] sm:$0xff]  ;;  %v2627_v53 = vpack.c.bf16 %v443_v37, %v442_v32 }
  0x2a   : > { %v255_v38 = vpack.c.bf16 %v229_v35, %v228_v34  ;;  %v440_v42 = vld [vmem:[%s2497_s20 + $0x62] sm:$0xff]  ;;  %273 = vst.msk [vmem:[#allocation2 + $0x40] sm:$0xff] %vm264_vm0, %v254_v33  ;;  %v233_v45 = vld [vmem:[%s2497_s20 + $0xb8] sm:$0xff]  ;;  %v236_v51 = vld [vmem:[%s2497_s20 + $0xd0] sm:$0xff] }
  0x2b   : > { %v234_v48 = vld [vmem:[%s2497_s20 + $0xc0] sm:$0xff]  ;;  %v235_v49 = vld [vmem:[%s2497_s20 + $0xc8] sm:$0xff]  ;;  %v446_v54 = vld [vmem:[%s2497_s20 + $0x92] sm:$0xff] }
  0x2c   : > { %381 = vrot.lane.b32.xlu1 %v332_v40, %s2449_s21  ;;  %v231_v40 = vld [vmem:[%s2497_s20 + $0xa8] sm:$0xff]  ;;  %274 = vst.msk [vmem:[#allocation2 + $0x48] sm:$0xff] %vm264_vm0, %v255_v38  ;;  %v258_v50 = vpack.c.bf16 %v235_v49, %v234_v48  ;;  %v238_v56 = vld [vmem:[%s2497_s20 + $0xe0] sm:$0xff]  ;;  %v240_v61 = vld [vmem:[%s2497_s20 + $0xf0] sm:$0xff] }
  0x2d   : > { %379 = vrot.lane.b32.xlu0 %v331_v41, %s2449_s21  ;;  %v2612_v41 = vpack.c.bf16 %v437_v28, %v436_v24  ;;  %v256_v43 = vpack.c.bf16 %v231_v40, %v230_v39  ;;  %v239_v57 = vld [vmem:[%s2497_s20 + $0xe8] sm:$0xff]  ;;  %v447_v59 = vld [vmem:[%s2497_s20 + $0x9a] sm:$0xff]  ;;  %v244_v5 = vld [vmem:[%s2497_s20 + $0x110] sm:$0xff] }
  0x2e   : > { %277 = vst.msk [vmem:[#allocation2 + $0x60] sm:$0xff] %vm264_vm0, %v258_v50  ;;  %v260_v60 = vpack.c.bf16 %v239_v57, %v238_v56  ;;  %v241_v62 = vld [vmem:[%s2497_s20 + $0xf8] sm:$0xff]  ;;  %v444_v63 = vld [vmem:[%s2497_s20 + $0x82] sm:$0xff]  ;;  %v445_v0 = vld [vmem:[%s2497_s20 + $0x8a] sm:$0xff]  ;;  %v2650_v6 = vpack.c.bf16 %v447_v59, %v446_v54 }
  0x2f   : > { %275 = vst.msk [vmem:[#allocation2 + $0x50] sm:$0xff] %vm264_vm0, %v256_v43  ;;  %v261_v1 = vpack.c.bf16 %v241_v62, %v240_v61  ;;  %v242_v2 = vld [vmem:[%s2497_s20 + $0x100] sm:$0xff]  ;;  %v243_v4 = vld [vmem:[%s2497_s20 + $0x108] sm:$0xff]  ;;  %v2656_v9 = vpack.c.bf16 %v445_v0, %v444_v63  ;;  %v718_v14 = vld [vmem:[%s2497_s20 + $0x13] sm:$0xff] }
  0x30   : > { %385 = vrot.lane.b32.xlu1 %v334_v46, %s2449_s21  ;;  %v441_v46 = vld [vmem:[%s2497_s20 + $0x6a] sm:$0xff]  ;;  %279 = vst.msk [vmem:[#allocation2 + $0x70] sm:$0xff] %vm264_vm0, %v260_v60  ;;  %v262_v7 = vpack.c.bf16 %v243_v4, %v242_v2  ;;  %v448_v11 = vld [vmem:[%s2497_s20 + $0xa2] sm:$0xff]  ;;  %v863_v17 = vld [vmem:[%s2497_s20 + $0x14] sm:$0xff] }
  0x31   : > { %383 = vrot.lane.b32.xlu0 %v333_v47, %s2449_s21  ;;  %v257_v47 = vpack.c.bf16 %v233_v45, %v232_v44  ;;  %v2635_v58 = vpack.c.bf16 %v441_v46, %v440_v42  ;;  %280 = vst.msk [vmem:[#allocation2 + $0x78] sm:$0xff] %vm264_vm0, %v261_v1  ;;  %v449_v12 = vld [vmem:[%s2497_s20 + $0xaa] sm:$0xff]  ;;  %v719_v15 = vld [vmem:[%s2497_s20 + $0x1b] sm:$0xff]  ;;  %v722_v49 = vld [vmem:[%s2497_s20 + $0x33] sm:$0xff] }
  0x32   : > { %281 = vst.msk [vmem:[#allocation2 + $0x80] sm:$0xff] %vm264_vm0, %v262_v7  ;;  %v2666_v13 = vpack.c.bf16 %v449_v12, %v448_v11  ;;  %v754_v16 = vpack.c.bf16 %v719_v15, %v718_v14  ;;  %v864_v18 = vld [vmem:[%s2497_s20 + $0x1c] sm:$0xff]  ;;  %v721_v22 = vld [vmem:[%s2497_s20 + $0x2b] sm:$0xff]  ;;  %v1010_v31 = vld [vmem:[%s2497_s20 + $0x34] sm:$0xff] }
  0x33   : > { %276 = vst.msk [vmem:[#allocation2 + $0x58] sm:$0xff] %vm264_vm0, %v257_v47  ;;  %v2436_v20 = vld [vmem:[%s3428_s1] sm:$0xff]   ;;  %v2437_v24 = vld [vmem:[%s3428_s1 + $0x8] sm:$0xff]   ;;  %v2438_v28 = vld [vmem:[%s3428_s1 + $0x10] sm:$0xff]  }
  0x34   : > { %389 = vrot.lane.b32.xlu1 %v336_v52, %s2449_s21  ;;  %v237_v52 = vld [vmem:[%s2497_s20 + $0xd8] sm:$0xff]  ;;  %v720_v21 = vld [vmem:[%s2497_s20 + $0x23] sm:$0xff]  ;;  %2357 = vmatprep.subr.bf16.mxu0 %v2436_v20  ;;  %v1009_v27 = vld [vmem:[%s2497_s20 + $0x2c] sm:$0xff] }
  0x35   : > { %387 = vrot.lane.b32.xlu0 %v335_v55, %s2449_s21  ;;  %v259_v55 = vpack.c.bf16 %v237_v52, %v236_v51  ;;  %2403 = vmatprep.subr.bf16.mxu1 %v2436_v20  ;;  %v755_v25 = vpack.c.bf16 %v721_v22, %v720_v21  ;;  %v1008_v26 = vld [vmem:[%s2497_s20 + $0x24] sm:$0xff]  ;;  %v1154_v30 = vld [vmem:[%s2497_s20 + $0x2d] sm:$0xff]  ;;  %v1011_v32 = vld [vmem:[%s2497_s20 + $0x3c] sm:$0xff] }
  0x36   : > { %2358 = vmatpush3.bf16.msra.mxu0 %v2436_v20  ;;  %2408 = vmatpush3.bf16.msra.mxu1 %v2436_v20  ;;  %v1044_v29 = vpack.c.bf16 %v1009_v27, %v1008_v26  ;;  %v2439_v33 = vld [vmem:[%s3428_s1 + $0x18] sm:$0xff]   ;;  %v1045_v35 = vpack.c.bf16 %v1011_v32, %v1010_v31  ;;  %v1298_v37 = vld [vmem:[%s2497_s20 + $0x26] sm:$0xff]  ;;  %v1299_v38 = vld [vmem:[%s2497_s20 + $0x2e] sm:$0xff] }
  0x37   : > { %278 = vst.msk [vmem:[#allocation2 + $0x68] sm:$0xff] %vm264_vm0, %v259_v55  ;;  %2359 = vmatprep.subr.bf16.mxu0 %v2437_v24  ;;  %2404 = vmatprep.subr.bf16.mxu1 %v2437_v24  ;;  %v1155_v39 = vld [vmem:[%s2497_s20 + $0x35] sm:$0xff]  ;;  %v1156_v40 = vld [vmem:[%s2497_s20 + $0x3d] sm:$0xff]  ;;  %v1334_v43 = vpack.c.bf16 %v1299_v38, %v1298_v37  ;;  %v725_v54 = vld [vmem:[%s2497_s20 + $0x4b] sm:$0xff] }
  0x38   : > { %502 = vrot.lane.b32.xlu1 %v2563_v3, %s2450_s22  ;;  %v2440_v42 = vld [vmem:[%s3428_s1 + $0x20] ss:$0 sps:$4 sm:$0xff]   ;;  %v1190_v44 = vpack.c.bf16 %v1156_v40, %v1155_v39  ;;  %v1300_v46 = vld [vmem:[%s2497_s20 + $0x36] sm:$0xff]  ;;  %v724_v52 = vld [vmem:[%s2497_s20 + $0x43] sm:$0xff] }
  0x39   : > { %500 = vrot.lane.b32.xlu0 %v464_v8, %s2450_s22  ;;  %v245_v8 = vld [vmem:[%s2497_s20 + $0x118] sm:$0xff]  ;;  %v1554_v45 = vsel %vm1552_vm1, %v2440_v42, 0  ;;  %v757_v55 = vpack.c.bf16 %v725_v54, %v724_v52  ;;  %v1012_v56 = vld [vmem:[%s2497_s20 + $0x44] sm:$0xff]  ;;  %v1013_v57 = vld [vmem:[%s2497_s20 + $0x4c] sm:$0xff] }
  0x3a   : > { %v263_v10 = vpack.c.bf16 %v245_v8, %v244_v5  ;;  %2360 = vmatpush3.bf16.msra.mxu0 %v2437_v24  ;;  %2409 = vmatpush3.bf16.msra.mxu1 %v2437_v24  ;;  %v1301_v47 = vld [vmem:[%s2497_s20 + $0x3e] sm:$0xff]  ;;  %v1158_v60 = vld [vmem:[%s2497_s20 + $0x4d] sm:$0xff]  ;;  %v1159_v2 = vld [vmem:[%s2497_s20 + $0x55] sm:$0xff] }
  0x3b   : > { %2361 = vmatprep.subr.bf16.mxu0 %v2438_v28  ;;  %2405 = vmatprep.subr.bf16.mxu1 %v2438_v28  ;;  %v1335_v48 = vpack.c.bf16 %v1301_v47, %v1300_v46  ;;  %v723_v50 = vld [vmem:[%s2497_s20 + $0x3b] sm:$0xff]  ;;  %v1157_v59 = vld [vmem:[%s2497_s20 + $0x45] sm:$0xff]  ;;  %v1303_v1 = vld [vmem:[%s2497_s20 + $0x4e] sm:$0xff] }
  0x3c   : > { %506 = vrot.lane.b32.xlu1 %v2582_v19, %s2450_s22  ;;  %282 = vst.msk [vmem:[#allocation2 + $0x88] sm:$0xff] %vm264_vm0, %v263_v10  ;;  %v756_v51 = vpack.c.bf16 %v723_v50, %v722_v49  ;;  %v1014_v61 = vld [vmem:[%s2497_s20 + $0x54] sm:$0xff]  ;;  %v1015_v62 = vld [vmem:[%s2497_s20 + $0x5c] sm:$0xff]  ;;  %v1302_v0 = vld [vmem:[%s2497_s20 + $0x46] sm:$0xff] }
  0x3d   : > { %504 = vrot.lane.b32.xlu0 %v2588_v23, %s2450_s22  ;;  %v1047_v63 = vpack.c.bf16 %v1015_v62, %v1014_v61  ;;  %v1160_v4 = vld [vmem:[%s2497_s20 + $0x5d] sm:$0xff]  ;;  %v1336_v5 = vpack.c.bf16 %v1303_v1, %v1302_v0  ;;  %v726_v12 = vld [vmem:[%s2497_s20 + $0x53] sm:$0xff]  ;;  %v1161_v22 = vld [vmem:[%s2497_s20 + $0x65] sm:$0xff] }
  0x3e   : > { %2362 = vmatpush3.bf16.msra.mxu0 %v2438_v28  ;;  %2410 = vmatpush3.bf16.msra.mxu1 %v2438_v28  ;;  %v1192_v7 = vpack.c.bf16 %v1160_v4, %v1159_v2  ;;  %v1304_v8 = vld [vmem:[%s2497_s20 + $0x56] sm:$0xff]  ;;  %v1305_v10 = vld [vmem:[%s2497_s20 + $0x5e] sm:$0xff]  ;;  %v1017_v21 = vld [vmem:[%s2497_s20 + $0x6c] sm:$0xff] }
  0x3f   : > { %2363 = vmatprep.subr.bf16.mxu0 %v2439_v33  ;;  %2406 = vmatprep.subr.bf16.mxu1 %v2439_v33  ;;  %v1337_v11 = vpack.c.bf16 %v1305_v10, %v1304_v8  ;;  %v727_v14 = vld [vmem:[%s2497_s20 + $0x5b] sm:$0xff]  ;;  %v1016_v20 = vld [vmem:[%s2497_s20 + $0x64] sm:$0xff]  ;;  %v1162_v24 = vld [vmem:[%s2497_s20 + $0x6d] sm:$0xff] }
  0x40   : > { %510 = vrot.lane.b32.xlu1 %v2604_v36, %s2450_s22  ;;  %v758_v15 = vpack.c.bf16 %v727_v14, %v726_v12  ;;  %v1019_v26 = vld [vmem:[%s2497_s20 + $0x7c] sm:$0xff]  ;;  %v733_v50 = vld [vmem:[%s2497_s20 + $0x8b] sm:$0xff] }
  0x41   : > { %508 = vrot.lane.b32.xlu0 %v2612_v41, %s2450_s22  ;;  %v1163_v31 = vld [vmem:[%s2497_s20 + $0x75] sm:$0xff]  ;;  %v1164_v32 = vld [vmem:[%s2497_s20 + $0x7d] sm:$0xff]  ;;  %v1021_v54 = vld [vmem:[%s2497_s20 + $0x8c] sm:$0xff] }
  0x42   : > { %2364 = vmatpush3.bf16.msra.mxu0 %v2439_v33  ;;  %2411 = vmatpush3.bf16.msra.mxu1 %v2439_v33  ;;  %v1308_v38 = vld [vmem:[%s2497_s20 + $0x76] sm:$0xff]  ;;  %v1309_v39 = vld [vmem:[%s2497_s20 + $0x7e] sm:$0xff]  ;;  %v1310_v0 = vld [vmem:[%s2497_s20 + $0x86] sm:$0xff] }
  0x43   : > { %2413 = vmatprep.subr.msk.bf16.mxu0 %vm1552_vm1, %v2440_v42  ;;  %2414 = vmatprep.subr.msk.bf16.mxu1 %vm1552_vm1, %v2440_v42  ;;  %v1339_v42 = vpack.c.bf16 %v1309_v39, %v1308_v38  ;;  %v732_v49 = vld [vmem:[%s2497_s20 + $0x83] sm:$0xff]  ;;  %v1311_v1 = vld [vmem:[%s2497_s20 + $0x8e] sm:$0xff]  ;;  %v1312_v12 = vld [vmem:[%s2497_s20 + $0x96] sm:$0xff] }
  0x44   : > { %514 = vrot.lane.b32.xlu1 %v2627_v53, %s2450_s22  ;;  %v1020_v52 = vld [vmem:[%s2497_s20 + $0x84] sm:$0xff]  ;;  %v1023_v61 = vld [vmem:[%s2497_s20 + $0x9c] sm:$0xff]  ;;  %v1340_v8 = vpack.c.bf16 %v1311_v1, %v1310_v0  ;;  %v1315_v39 = vld [vmem:[%s2497_s20 + $0xae] sm:$0xff] }
  0x45   : > { %512 = vrot.lane.b32.xlu0 %v2635_v58, %s2450_s22  ;;  %v1167_v4 = vld [vmem:[%s2497_s20 + $0x95] sm:$0xff]  ;;  %v1313_v14 = vld [vmem:[%s2497_s20 + $0x9e] sm:$0xff]  ;;  %v1314_v38 = vld [vmem:[%s2497_s20 + $0xa6] sm:$0xff] }
  0x46   : > { %2366 = vmatpush3.bf16.msra.mxu0 %v1554_v45  ;;  %2412 = vmatpush3.bf16.msra.mxu1 %v1554_v45 }
  0x48   : > { %518 = vrot.lane.b32.xlu1 %v2650_v6, %s2450_s22 }
  0x49   : > { %516 = vrot.lane.b32.xlu0 %v2656_v9, %s2450_s22 }
  0x4c   : > { %645 = vrot.lane.b32.xlu1 %v2563_v3, %s2451_s23  ;;  %v899_v3 = vpack.c.bf16 %v864_v18, %v863_v17  ;;  %v729_v17 = vld [vmem:[%s2497_s20 + $0x6b] sm:$0xff] }
  0x4d   : > { %520 = vrot.lane.b32.xlu0 %v2666_v13, %s2450_s22 }
  0x50   : > { %790 = vrot.lane.b32.xlu1 %v754_v16, %s2452_s28  ;;  %v728_v16 = vld [vmem:[%s2497_s20 + $0x63] sm:$0xff] }
  0x51   : > { %647 = vrot.lane.b32.xlu0 %v2588_v23, %s2451_s23  ;;  %v1153_v23 = vld [vmem:[%s2497_s20 + $0x25] sm:$0xff]  ;;  %v759_v18 = vpack.c.bf16 %v729_v17, %v728_v16  ;;  %v1341_v16 = vpack.c.bf16 %v1313_v14, %v1312_v12  ;;  %v734_v17 = vld [vmem:[%s2497_s20 + $0x93] sm:$0xff] }
  0x52   : > { %v1189_v34 = vpack.c.bf16 %v1154_v30, %v1153_v23  ;;  %v1307_v23 = vld [vmem:[%s2497_s20 + $0x6e] sm:$0xff] }
  0x54   : > { %935 = vrot.lane.b32.xlu1 %v899_v3, %s2453_s5 }
  0x55   : > { %792 = vrot.lane.b32.xlu0 %v755_v25, %s2452_s28  ;;  %v1018_v25 = vld [vmem:[%s2497_s20 + $0x74] sm:$0xff] }
  0x56   : > { %v1049_v28 = vpack.c.bf16 %v1019_v26, %v1018_v25 }
  0x58   : > { %1080 = vrot.lane.b32.xlu1 %v1044_v29, %s2454_s8 }
  0x59   : > { %937 = vrot.lane.b32.xlu0 %v1044_v29, %s2453_s5  ;;  %v1306_v29 = vld [vmem:[%s2497_s20 + $0x66] sm:$0xff] }
  0x5c   : > { %1225 = vrot.lane.b32.xlu1 %v1189_v34, %s2455_s11  ;;  %v1338_v34 = vpack.c.bf16 %v1307_v23, %v1306_v29  ;;  %v2457_v23 = vmov 0  }
  0x5d   : > { %1082 = vrot.lane.b32.xlu0 %v1045_v35, %s2454_s8  ;;  %2435 = vset.pattern.permute.xlu1 %v2457_v23 }
  0x5e   : > { %2434 = vset.pattern.permute.xlu0 %v2457_v23  ;;  %v454_v23 = vld [vmem:[%s2497_s20 + $0xd2] sm:$0xff] }
  0x60   : > { %1370 = vrot.lane.b32.xlu1 %v1334_v43, %s2456_s12  ;;  %v730_v43 = vld [vmem:[%s2497_s20 + $0x73] sm:$0xff] }
  0x61   : > { %1227 = vrot.lane.b32.xlu0 %v1190_v44, %s2455_s11  ;;  %v731_v44 = vld [vmem:[%s2497_s20 + $0x7b] sm:$0xff] }
  0x62   : > { %v760_v47 = vpack.c.bf16 %v731_v44, %v730_v43  ;;  %v1172_v43 = vld [vmem:[%s2497_s20 + $0xbd] sm:$0xff] }
  0x64   : > { %649 = vrot.lane.b32.xlu1 %v2582_v19, %s2451_s23  ;;  %v1046_v19 = vpack.c.bf16 %v1013_v57, %v1012_v56  ;;  %v1050_v57 = vpack.c.bf16 %v1021_v54, %v1020_v52 }
  0x65   : > { %1372 = vrot.lane.b32.xlu0 %v1335_v48, %s2456_s12 }
  0x68   : > { %794 = vrot.lane.b32.xlu1 %v756_v51, %s2452_s28 }
  0x69   : > { %651 = vrot.lane.b32.xlu0 %v2612_v41, %s2451_s23  ;;  %v1191_v41 = vpack.c.bf16 %v1158_v60, %v1157_v59  ;;  %v1022_v60 = vld [vmem:[%s2497_s20 + $0x94] sm:$0xff] }
  0x6c   : > { %939 = vrot.lane.b32.xlu1 %v1045_v35, %s2453_s5  ;;  %v1194_v35 = vpack.c.bf16 %v1164_v32, %v1163_v31  ;;  %v1026_v32 = vld [vmem:[%s2497_s20 + $0xb4] sm:$0xff] }
  0x6d   : > { %796 = vrot.lane.b32.xlu0 %v757_v55, %s2452_s28 }
  0x70   : > { %1084 = vrot.lane.b32.xlu1 %v1046_v19, %s2454_s8 }
  0x71   : > { %941 = vrot.lane.b32.xlu0 %v1046_v19, %s2453_s5  ;;  %v1165_v19 = vld [vmem:[%s2497_s20 + $0x85] sm:$0xff] }
  0x74   : > { %1229 = vrot.lane.b32.xlu1 %v1191_v41, %s2455_s11 }
  0x75   : > { %1086 = vrot.lane.b32.xlu0 %v1047_v63, %s2454_s8 }
  0x78   : > { %1374 = vrot.lane.b32.xlu1 %v1336_v5, %s2456_s12  ;;  %v1168_v5 = vld [vmem:[%s2497_s20 + $0x9d] sm:$0xff] }
  0x79   : > { %1231 = vrot.lane.b32.xlu0 %v1192_v7, %s2455_s11  ;;  %v1196_v10 = vpack.c.bf16 %v1168_v5, %v1167_v4  ;;  %v886_v4 = vld [vmem:[%s2497_s20 + $0xcc] sm:$0xff] }
  0x7c   : > { %653 = vrot.lane.b32.xlu1 %v2604_v36, %s2451_s23  ;;  %v1048_v36 = vpack.c.bf16 %v1017_v21, %v1016_v20 }
  0x7d   : > { %1376 = vrot.lane.b32.xlu0 %v1337_v11, %s2456_s12 }
  0x80   : > { %798 = vrot.lane.b32.xlu1 %v758_v15, %s2452_s28 }
  0x81   : > { %655 = vrot.lane.b32.xlu0 %v2635_v58, %s2451_s23  ;;  %v1193_v58 = vpack.c.bf16 %v1162_v24, %v1161_v22  ;;  %v736_v24 = vld [vmem:[%s2497_s20 + $0xa3] sm:$0xff] }
  0x84   : > { %943 = vrot.lane.b32.xlu1 %v1047_v63, %s2453_s5  ;;  %v1051_v63 = vpack.c.bf16 %v1023_v61, %v1022_v60  ;;  %v741_v60 = vld [vmem:[%s2497_s20 + $0xcb] sm:$0xff] }
  0x85   : > { %800 = vrot.lane.b32.xlu0 %v759_v18, %s2452_s28  ;;  %v735_v18 = vld [vmem:[%s2497_s20 + $0x9b] sm:$0xff] }
  0x86   : > { %v360_v3 = vpop.permute.xlu1 %359 }
  0x87   : > { %v356_v27 = vpop.permute.xlu0 %355  ;;  %412 = vst.msk [vmem:[#allocation2 + $0x10] sm:$0xff] %vm409_vm2, %v360_v3  ;;  %v737_v3 = vld [vmem:[%s2497_s20 + $0xab] sm:$0xff] }
  0x88   : > { %410 = vst.msk [vmem:[#allocation2] sm:$0xff] %vm409_vm2, %v356_v27  ;;  %1088 = vrot.lane.b32.xlu1 %v1048_v36, %s2454_s8  ;;  %v763_v26 = vpack.c.bf16 %v737_v3, %v736_v24  ;;  %v1025_v27 = vld [vmem:[%s2497_s20 + $0xac] sm:$0xff]  ;;  %v1320_v3 = vld [vmem:[%s2497_s20 + $0xd6] sm:$0xff] }
  0x89   : > { %945 = vrot.lane.b32.xlu0 %v1048_v36, %s2453_s5  ;;  %v762_v36 = vpack.c.bf16 %v735_v18, %v734_v17  ;;  %v1176_v17 = vld [vmem:[%s2497_s20 + $0xdd] sm:$0xff] }
  0x8a   : > { %v362_v30 = vpop.permute.xlu1 %361 }
  0x8b   : > { %v358_v33 = vpop.permute.xlu0 %357  ;;  %413 = vst.msk [vmem:[#allocation2 + $0x18] sm:$0xff] %vm409_vm2, %v362_v30  ;;  %v1170_v30 = vld [vmem:[%s2497_s20 + $0xad] sm:$0xff] }
  0x8c   : > { %411 = vst.msk [vmem:[#allocation2 + $0x8] sm:$0xff] %vm409_vm2, %v358_v33  ;;  %1233 = vrot.lane.b32.xlu1 %v1193_v58, %s2455_s11  ;;  %v1027_v33 = vld [vmem:[%s2497_s20 + $0xbc] sm:$0xff] }
  0x8d   : > { %1090 = vrot.lane.b32.xlu0 %v1049_v28, %s2454_s8 }
  0x8e   : > { %v366_v37 = vpop.permute.xlu1 %365 }
  0x8f   : > { %v364_v40 = vpop.permute.xlu0 %363  ;;  %415 = vst.msk [vmem:[#allocation2 + $0x28] sm:$0xff] %vm409_vm2, %v366_v37  ;;  %v2852_v37 = vpack.c.bf16 %v1027_v33, %v1026_v32 }
  0x90   : > { %414 = vst.msk [vmem:[#allocation2 + $0x20] sm:$0xff] %vm409_vm2, %v364_v40  ;;  %1378 = vrot.lane.b32.xlu1 %v1338_v34, %s2456_s12 }
  0x91   : > { %1235 = vrot.lane.b32.xlu0 %v1194_v35, %s2455_s11 }
  0x92   : > { %v370_v45 = vpop.permute.xlu1 %369 }
  0x93   : > { %v368_v46 = vpop.permute.xlu0 %367  ;;  %417 = vst.msk [vmem:[#allocation2 + $0x38] sm:$0xff] %vm409_vm2, %v370_v45  ;;  %v1342_v45 = vpack.c.bf16 %v1315_v39, %v1314_v38 }
  0x94   : > { %416 = vst.msk [vmem:[#allocation2 + $0x30] sm:$0xff] %vm409_vm2, %v368_v46  ;;  %657 = vrot.lane.b32.xlu1 %v2627_v53, %s2451_s23  ;;  %v761_v53 = vpack.c.bf16 %v733_v50, %v732_v49  ;;  %v1316_v50 = vld [vmem:[%s2497_s20 + $0xb6] sm:$0xff] }
  0x95   : > { %1380 = vrot.lane.b32.xlu0 %v1339_v42, %s2456_s12  ;;  %v1171_v42 = vld [vmem:[%s2497_s20 + $0xb5] sm:$0xff] }
  0x96   : > { %v374_v48 = vpop.permute.xlu1 %373  ;;  %v1198_v46 = vpack.c.bf16 %v1172_v43, %v1171_v42  ;;  %v744_v42 = vld [vmem:[%s2497_s20 + $0xe3] sm:$0xff]  ;;  %v745_v43 = vld [vmem:[%s2497_s20 + $0xeb] sm:$0xff] }
  0x97   : > { %v372_v51 = vpop.permute.xlu0 %371  ;;  %419 = vst.msk [vmem:[#allocation2 + $0x48] sm:$0xff] %vm409_vm2, %v374_v48  ;;  %v451_v48 = vld [vmem:[%s2497_s20 + $0xba] sm:$0xff] }
  0x98   : > { %418 = vst.msk [vmem:[#allocation2 + $0x40] sm:$0xff] %vm409_vm2, %v372_v51  ;;  %802 = vrot.lane.b32.xlu1 %v760_v47, %s2452_s28  ;;  %v450_v47 = vld [vmem:[%s2497_s20 + $0xb2] sm:$0xff]  ;;  %v1317_v51 = vld [vmem:[%s2497_s20 + $0xbe] sm:$0xff] }
  0x99   : > { %659 = vrot.lane.b32.xlu0 %v2656_v9, %s2451_s23  ;;  %v1166_v9 = vld [vmem:[%s2497_s20 + $0x8d] sm:$0xff]  ;;  %v475_v52 = vpack.c.bf16 %v451_v48, %v450_v47  ;;  %v1343_v54 = vpack.c.bf16 %v1317_v51, %v1316_v50  ;;  %v767_v48 = vpack.c.bf16 %v745_v43, %v744_v42  ;;  %v889_v50 = vld [vmem:[%s2497_s20 + $0xe4] sm:$0xff]  ;;  %v1183_v42 = vld [vmem:[%s2497_s20 + $0x115] sm:$0xff] }
  0x9a   : > { %v378_v55 = vpop.permute.xlu1 %377  ;;  %v1195_v41 = vpack.c.bf16 %v1166_v9, %v1165_v19  ;;  %v890_v51 = vld [vmem:[%s2497_s20 + $0xec] sm:$0xff]  ;;  %v1184_v43 = vld [vmem:[%s2497_s20 + $0x11d] sm:$0xff] }
  0x9b   : > { %v376_v56 = vpop.permute.xlu0 %375  ;;  %421 = vst.msk [vmem:[#allocation2 + $0x58] sm:$0xff] %vm409_vm2, %v378_v55  ;;  %v595_v55 = vld [vmem:[%s2497_s20 + $0xc2] sm:$0xff] }
  0x9c   : > { %420 = vst.msk [vmem:[#allocation2 + $0x50] sm:$0xff] %vm409_vm2, %v376_v56  ;;  %947 = vrot.lane.b32.xlu1 %v1049_v28, %s2453_s5  ;;  %v596_v56 = vld [vmem:[%s2497_s20 + $0xca] sm:$0xff] }
  0x9d   : > { %804 = vrot.lane.b32.xlu0 %v761_v53, %s2452_s28  ;;  %v2876_v9 = vpack.c.bf16 %v596_v56, %v595_v55  ;;  %v1034_v55 = vld [vmem:[%s2497_s20 + $0xf4] sm:$0xff]  ;;  %v1035_v56 = vld [vmem:[%s2497_s20 + $0xfc] sm:$0xff] }
  0x9e   : > { %v382_v59 = vpop.permute.xlu1 %381 }
  0x9f   : > { %v380_v62 = vpop.permute.xlu0 %379  ;;  %423 = vst.msk [vmem:[#allocation2 + $0x68] sm:$0xff] %vm409_vm2, %v382_v59  ;;  %v740_v59 = vld [vmem:[%s2497_s20 + $0xc3] sm:$0xff] }
  0xa0   : > { %422 = vst.msk [vmem:[#allocation2 + $0x60] sm:$0xff] %vm409_vm2, %v380_v62  ;;  %1092 = vrot.lane.b32.xlu1 %v1050_v57, %s2454_s8  ;;  %v738_v62 = vld [vmem:[%s2497_s20 + $0xb3] sm:$0xff]  ;;  %v765_v0 = vpack.c.bf16 %v741_v60, %v740_v59  ;;  %v1180_v60 = vld [vmem:[%s2497_s20 + $0xfd] sm:$0xff] }
  0xa1   : > { %949 = vrot.lane.b32.xlu0 %v1050_v57, %s2453_s5  ;;  %v1179_v59 = vld [vmem:[%s2497_s20 + $0xf5] sm:$0xff] }
  0xa2   : > { %v386_v2 = vpop.permute.xlu1 %385 }
  0xa3   : > { %v384_v7 = vpop.permute.xlu0 %383  ;;  %425 = vst.msk [vmem:[#allocation2 + $0x78] sm:$0xff] %vm409_vm2, %v386_v2  ;;  %v885_v2 = vld [vmem:[%s2497_s20 + $0xc4] sm:$0xff] }
  0xa4   : > { %424 = vst.msk [vmem:[#allocation2 + $0x70] sm:$0xff] %vm409_vm2, %v384_v7  ;;  %1237 = vrot.lane.b32.xlu1 %v1195_v41, %s2455_s11  ;;  %v739_v41 = vld [vmem:[%s2497_s20 + $0xbb] sm:$0xff] }
  0xa5   : > { %1094 = vrot.lane.b32.xlu0 %v1051_v63, %s2454_s8  ;;  %v764_v1 = vpack.c.bf16 %v739_v41, %v738_v62  ;;  %v1177_v62 = vld [vmem:[%s2497_s20 + $0xe5] sm:$0xff]  ;;  %v1178_v41 = vld [vmem:[%s2497_s20 + $0xed] sm:$0xff] }
  0xa6   : > { %v390_v11 = vpop.permute.xlu1 %389 }
  0xa7   : > { %v388_v15 = vpop.permute.xlu0 %387  ;;  %427 = vst.msk [vmem:[#allocation2 + $0x88] sm:$0xff] %vm409_vm2, %v390_v11  ;;  %v1031_v11 = vld [vmem:[%s2497_s20 + $0xdc] sm:$0xff] }
  0xa8   : > { %426 = vst.msk [vmem:[#allocation2 + $0x80] sm:$0xff] %vm409_vm2, %v388_v15  ;;  %1382 = vrot.lane.b32.xlu1 %v1340_v8, %s2456_s12  ;;  %v910_v8 = vpack.c.bf16 %v886_v4, %v885_v2  ;;  %v1324_v2 = vld [vmem:[%s2497_s20 + $0xf6] sm:$0xff]  ;;  %v1325_v4 = vld [vmem:[%s2497_s20 + $0xfe] sm:$0xff] }
  0xa9   : > { %1239 = vrot.lane.b32.xlu0 %v1196_v10, %s2455_s11  ;;  %v1030_v10 = vld [vmem:[%s2497_s20 + $0xd4] sm:$0xff] }
  0xaa   : > { %v503_v20 = vpop.permute.xlu1 %502  ;;  %v2899_v15 = vpack.c.bf16 %v1031_v11, %v1030_v10  ;;  %v1323_v10 = vld [vmem:[%s2497_s20 + $0xee] sm:$0xff] }
  0xab   : > { %v501_v21 = vpop.permute.xlu0 %500  ;;  %556 = vst.msk [vmem:[#allocation2 + $0x8] sm:$0xff] %vm554_vm3, %v503_v20  ;;  %v1173_v20 = vld [vmem:[%s2497_s20 + $0xc5] sm:$0xff] }
  0xac   : > { %555 = vst.msk [vmem:[#allocation2] sm:$0xff] %vm554_vm3, %v501_v21  ;;  %661 = vrot.lane.b32.xlu1 %v2650_v6, %s2451_s23  ;;  %v1024_v6 = vld [vmem:[%s2497_s20 + $0xa4] sm:$0xff]  ;;  %v1174_v21 = vld [vmem:[%s2497_s20 + $0xcd] sm:$0xff] }
  0xad   : > { %1384 = vrot.lane.b32.xlu0 %v1341_v16, %s2456_s12  ;;  %v1052_v29 = vpack.c.bf16 %v1025_v27, %v1024_v6  ;;  %v1175_v16 = vld [vmem:[%s2497_s20 + $0xd5] sm:$0xff]  ;;  %v1199_v24 = vpack.c.bf16 %v1174_v21, %v1173_v20  ;;  %v1318_v6 = vld [vmem:[%s2497_s20 + $0xc6] sm:$0xff] }
  0xae   : > { %v507_v22 = vpop.permute.xlu1 %506  ;;  %v1319_v27 = vld [vmem:[%s2497_s20 + $0xce] sm:$0xff] }
  0xaf   : > { %v505_v25 = vpop.permute.xlu0 %504  ;;  %558 = vst.msk [vmem:[#allocation2 + $0x18] sm:$0xff] %vm554_vm3, %v507_v22  ;;  %v1200_v22 = vpack.c.bf16 %v1176_v17, %v1175_v16  ;;  %v459_v16 = vld [vmem:[%s2497_s20 + $0xfa] sm:$0xff] }
  0xb0   : > { %557 = vst.msk [vmem:[#allocation2 + $0x10] sm:$0xff] %vm554_vm3, %v505_v25  ;;  %806 = vrot.lane.b32.xlu1 %v762_v36, %s2452_s28  ;;  %v1321_v25 = vld [vmem:[%s2497_s20 + $0xde] sm:$0xff] }
  0xb1   : > { %663 = vrot.lane.b32.xlu0 %v2666_v13, %s2451_s23  ;;  %v1169_v13 = vld [vmem:[%s2497_s20 + $0xa5] sm:$0xff] }
  0xb2   : > { %v511_v58 = vpop.permute.xlu1 %510  ;;  %v1197_v35 = vpack.c.bf16 %v1170_v30, %v1169_v13  ;;  %v455_v13 = vld [vmem:[%s2497_s20 + $0xda] sm:$0xff] }
  0xb3   : > { %v509_v28 = vpop.permute.xlu0 %508  ;;  %560 = vst.msk [vmem:[#allocation2 + $0x28] sm:$0xff] %vm554_vm3, %v511_v58  ;;  %v477_v33 = vpack.c.bf16 %v455_v13, %v454_v23 }
  0xb4   : > { %559 = vst.msk [vmem:[#allocation2 + $0x20] sm:$0xff] %vm554_vm3, %v509_v28  ;;  %951 = vrot.lane.b32.xlu1 %v1051_v63, %s2453_s5  ;;  %v1345_v28 = vpack.c.bf16 %v1321_v25, %v1320_v3 }
  0xb5   : > { %808 = vrot.lane.b32.xlu0 %v763_v26, %s2452_s28 }
  0xb6   : > { %v515_v31 = vpop.permute.xlu1 %514 }
  0xb7   : > { %v513_v34 = vpop.permute.xlu0 %512  ;;  %562 = vst.msk [vmem:[#allocation2 + $0x38] sm:$0xff] %vm554_vm3, %v515_v31 }
  0xb8   : > { %561 = vst.msk [vmem:[#allocation2 + $0x30] sm:$0xff] %vm554_vm3, %v513_v34  ;;  %1096 = vrot.lane.b32.xlu1 %v1052_v29, %s2454_s8  ;;  %v599_v34 = vld [vmem:[%s2497_s20 + $0xe2] sm:$0xff] }
  0xb9   : > { %953 = vrot.lane.b32.xlu0 %v1052_v29, %s2453_s5  ;;  %v1344_v29 = vpack.c.bf16 %v1319_v27, %v1318_v6  ;;  %v749_v6 = vld [vmem:[%s2497_s20 + $0x10b] sm:$0xff] }
  0xba   : > { %v519_v40 = vpop.permute.xlu1 %518 }
  0xbb   : > { %v517_v44 = vpop.permute.xlu0 %516  ;;  %564 = vst.msk [vmem:[#allocation2 + $0x48] sm:$0xff] %vm554_vm3, %v519_v40 }
  0xbc   : > { %563 = vst.msk [vmem:[#allocation2 + $0x40] sm:$0xff] %vm554_vm3, %v517_v44  ;;  %1241 = vrot.lane.b32.xlu1 %v1197_v35, %s2455_s11  ;;  %v600_v35 = vld [vmem:[%s2497_s20 + $0xea] sm:$0xff] }
  0xbd   : > { %1098 = vrot.lane.b32.xlu0 %v2852_v37, %s2454_s8  ;;  %v2933_v40 = vpack.c.bf16 %v600_v35, %v599_v34  ;;  %v1038_v35 = vld [vmem:[%s2497_s20 + $0x114] sm:$0xff] }
  0xbe   : > { %v646_v49 = vpop.permute.xlu1 %645 }
  0xbf   : > { %v521_v53 = vpop.permute.xlu0 %520  ;;  %700 = vst.msk [vmem:[#allocation2] sm:$0xff] %vm699_vm4, %v646_v49 }
  0xc0   : > { %565 = vst.msk [vmem:[#allocation2 + $0x50] sm:$0xff] %vm554_vm3, %v521_v53  ;;  %1386 = vrot.lane.b32.xlu1 %v1342_v45, %s2456_s12  ;;  %v742_v45 = vld [vmem:[%s2497_s20 + $0xd3] sm:$0xff] }
  0xc1   : > { %1243 = vrot.lane.b32.xlu0 %v1198_v46, %s2455_s11  ;;  %v743_v46 = vld [vmem:[%s2497_s20 + $0xdb] sm:$0xff] }
  0xc2   : > { %v791_v57 = vpop.permute.xlu1 %790  ;;  %v766_v49 = vpack.c.bf16 %v743_v46, %v742_v45  ;;  %v1181_v46 = vld [vmem:[%s2497_s20 + $0x105] sm:$0xff] }
  0xc3   : > { %v648_v19 = vpop.permute.xlu0 %647  ;;  %845 = vst.msk [vmem:[#allocation2] sm:$0xff] %vm844_vm5, %v791_v57 }
  0xc4   : > { %701 = vst.msk [vmem:[#allocation2 + $0x8] sm:$0xff] %vm699_vm4, %v648_v19  ;;  %522 = vrot.lane.b32.xlu1 %v475_v52, %s2450_s22 }
  0xc5   : > { %1388 = vrot.lane.b32.xlu0 %v1343_v54, %s2456_s12  ;;  %v912_v54 = vpack.c.bf16 %v890_v51, %v889_v50  ;;  %v1328_v51 = vld [vmem:[%s2497_s20 + $0x116] sm:$0xff] }
  0xc6   : > { %v936_v61 = vpop.permute.xlu1 %935 }
  0xc7   : > { %v793_v63 = vpop.permute.xlu0 %792  ;;  %990 = vst.msk [vmem:[#allocation2] sm:$0xff] %vm989_vm6, %v936_v61 }
  0xc8   : > { %846 = vst.msk [vmem:[#allocation2 + $0x8] sm:$0xff] %vm844_vm5, %v793_v63  ;;  %667 = vrot.lane.b32.xlu1 %v2876_v9, %s2451_s23 }
  0xc9   : > { %665 = vrot.lane.b32.xlu0 %v475_v52, %s2451_s23 }
  0xca   : > { %v1081_v5 = vpop.permute.xlu1 %1080 }
  0xcb   : > { %v938_v7 = vpop.permute.xlu0 %937  ;;  %1135 = vst.msk [vmem:[#allocation2] sm:$0xff] %vm1134_vm7, %v1081_v5 }
  0xcc   : > { %991 = vst.msk [vmem:[#allocation2 + $0x8] sm:$0xff] %vm989_vm6, %v938_v7  ;;  %812 = vrot.lane.b32.xlu1 %v765_v0, %s2452_s28  ;;  %v1202_v0 = vpack.c.bf16 %v1180_v60, %v1179_v59  ;;  %v462_v59 = vld [vmem:[%s2497_s20 + $0x112] sm:$0xff]  ;;  %v463_v60 = vld [vmem:[%s2497_s20 + $0x11a] sm:$0xff] }
  0xcd   : > { %810 = vrot.lane.b32.xlu0 %v764_v1, %s2452_s28  ;;  %v1201_v1 = vpack.c.bf16 %v1178_v41, %v1177_v62  ;;  %v481_v41 = vpack.c.bf16 %v463_v60, %v462_v59 }
  0xce   : > { %v1226_v12 = vpop.permute.xlu1 %1225 }
  0xcf   : > { %v1083_v14 = vpop.permute.xlu0 %1082  ;;  %1280 = vst.msk [vmem:[#allocation2] sm:$0xff] %vm1279_vm8, %v1226_v12  ;;  %v1347_v12 = vpack.c.bf16 %v1325_v4, %v1324_v2 }
  0xd0   : > { %1136 = vst.msk [vmem:[#allocation2 + $0x8] sm:$0xff] %vm1134_vm7, %v1083_v14  ;;  %957 = vrot.lane.b32.xlu1 %v910_v8, %s2453_s5 }
  0xd1   : > { %955 = vrot.lane.b32.xlu0 %v2852_v37, %s2453_s5 }
  0xd2   : > { %v1371_v18 = vpop.permute.xlu1 %1370 }
  0xd3   : > { %v1228_v36 = vpop.permute.xlu0 %1227  ;;  %1425 = vst.msk [vmem:[#allocation2] sm:$0xff] %vm1424_vm9, %v1371_v18 }
  0xd4   : > { %1281 = vst.msk [vmem:[#allocation2 + $0x8] sm:$0xff] %vm1279_vm8, %v1228_v36  ;;  %1102 = vrot.lane.b32.xlu1 %v2899_v15, %s2454_s8  ;;  %v603_v36 = vld [vmem:[%s2497_s20 + $0x102] sm:$0xff] }
  0xd5   : > { %1100 = vrot.lane.b32.xlu0 %v910_v8, %s2454_s8  ;;  %v1322_v8 = vld [vmem:[%s2497_s20 + $0xe6] sm:$0xff] }
  0xd6   : > { %v650_v26 = vpop.permute.xlu1 %649  ;;  %v1346_v14 = vpack.c.bf16 %v1323_v10, %v1322_v8  ;;  %v750_v10 = vld [vmem:[%s2497_s20 + $0x113] sm:$0xff] }
  0xd7   : > { %v1373_v58 = vpop.permute.xlu0 %1372  ;;  %702 = vst.msk [vmem:[#allocation2 + $0x10] sm:$0xff] %vm699_vm4, %v650_v26  ;;  %v748_v26 = vld [vmem:[%s2497_s20 + $0x103] sm:$0xff] }
  0xd8   : > { %1426 = vst.msk [vmem:[#allocation2 + $0x8] sm:$0xff] %vm1424_vm9, %v1373_v58  ;;  %1247 = vrot.lane.b32.xlu1 %v1200_v22, %s2455_s11  ;;  %v604_v22 = vld [vmem:[%s2497_s20 + $0x10a] sm:$0xff]  ;;  %v746_v58 = vld [vmem:[%s2497_s20 + $0xf3] sm:$0xff]  ;;  %v769_v23 = vpack.c.bf16 %v749_v6, %v748_v26 }
  0xd9   : > { %1245 = vrot.lane.b32.xlu0 %v1199_v24, %s2455_s11  ;;  %v2991_v25 = vpack.c.bf16 %v604_v22, %v603_v36  ;;  %v1042_v36 = vld [vmem:[%s2497_s20 + $0x134] sm:$0xff]  ;;  %v1043_v22 = vld [vmem:[%s2497_s20 + $0x13c] sm:$0xff] }
  0xda   : > { %v795_v30 = vpop.permute.xlu1 %794  ;;  %v1443_v31 = vld [vmem:[#allocation2] sm:$0xff]  ;;  %v1061_v26 = vpack.c.bf16 %v1043_v22, %v1042_v36  ;;  %v1187_v6 = vld [vmem:[%s2497_s20 + $0x135] sm:$0xff] }
  0xdb   : > { %v652_v32 = vpop.permute.xlu0 %651  ;;  %847 = vst.msk [vmem:[#allocation2 + $0x10] sm:$0xff] %vm844_vm5, %v795_v30  ;;  %2367 = vmatprep.mubr.msk.bf16.mxu0 %vm1497_vm10, %v1443_v31  ;;  %v893_v30 = vld [vmem:[%s2497_s20 + $0x104] sm:$0xff]  ;;  %v894_v31 = vld [vmem:[%s2497_s20 + $0x10c] sm:$0xff] }
  0xdc   : > { %703 = vst.msk [vmem:[#allocation2 + $0x18] sm:$0xff] %vm699_vm4, %v652_v32  ;;  %1392 = vrot.lane.b32.xlu1 %v1345_v28, %s2456_s12  ;;  %v747_v28 = vld [vmem:[%s2497_s20 + $0xfb] sm:$0xff]  ;;  %v914_v34 = vpack.c.bf16 %v894_v31, %v893_v30 }
  0xdd   : > { %1390 = vrot.lane.b32.xlu0 %v1344_v29, %s2456_s12  ;;  %v768_v13 = vpack.c.bf16 %v747_v28, %v746_v58  ;;  %v1185_v28 = vld [vmem:[%s2497_s20 + $0x125] sm:$0xff] }
  0xde   : > { %v940_v37 = vpop.permute.xlu1 %939 }
  0xdf   : > { %v797_v38 = vpop.permute.xlu0 %796  ;;  %992 = vst.msk [vmem:[#allocation2 + $0x10] sm:$0xff] %vm989_vm6, %v940_v37  ;;  %v1444_v39 = vld [vmem:[#allocation2 + $0x8] sm:$0xff]  ;;  %v1039_v37 = vld [vmem:[%s2497_s20 + $0x11c] sm:$0xff] }
  0xe0   : > { %848 = vst.msk [vmem:[#allocation2 + $0x18] sm:$0xff] %vm844_vm5, %v797_v38  ;;  %2368 = vmatmul.mubr.msk.bf16.vlgmr.msra.gmra.mrb[0].mxu0 %vm1497_vm10, %v1444_v39  ;;  %526 = vrot.lane.b32.xlu1 %v477_v33, %s2450_s22 }
  0xe1   : > { %524 = vrot.lane.b32.xlu0 %v2876_v9, %s2450_s22  ;;  %v2957_v9 = vpack.c.bf16 %v1035_v56, %v1034_v55  ;;  %v1327_v55 = vld [vmem:[%s2497_s20 + $0x10e] sm:$0xff] }
  0xe2   : > { %v1085_v44 = vpop.permute.xlu1 %1084 }
  0xe3   : > { %v942_v47 = vpop.permute.xlu0 %941  ;;  %1137 = vst.msk [vmem:[#allocation2 + $0x10] sm:$0xff] %vm1134_vm7, %v1085_v44 }
  0xe4   : > { %993 = vst.msk [vmem:[#allocation2 + $0x18] sm:$0xff] %vm989_vm6, %v942_v47  ;;  %671 = vrot.lane.b32.xlu1 %v2933_v40, %s2451_s23  ;;  %v1182_v47 = vld [vmem:[%s2497_s20 + $0x10d] sm:$0xff] }
  0xe5   : > { %669 = vrot.lane.b32.xlu0 %v477_v33, %s2451_s23  ;;  %v1203_v50 = vpack.c.bf16 %v1182_v47, %v1181_v46  ;;  %v1770_v46 = vld [vmem:[%s3429_s2] sm:$0xff] }
  0xe6   : > { %v1230_v53 = vpop.permute.xlu1 %1229 }
  0xe7   : > { %v1087_v52 = vpop.permute.xlu0 %1086  ;;  %1282 = vst.msk [vmem:[#allocation2 + $0x10] sm:$0xff] %vm1279_vm8, %v1230_v53  ;;  %v1329_v53 = vld [vmem:[%s2497_s20 + $0x11e] sm:$0xff] }
  0xe8   : > { %1138 = vst.msk [vmem:[#allocation2 + $0x18] sm:$0xff] %vm1134_vm7, %v1087_v52  ;;  %816 = vrot.lane.b32.xlu1 %v767_v48, %s2452_s28 }
  0xe9   : > { %814 = vrot.lane.b32.xlu0 %v766_v49, %s2452_s28  ;;  %v1204_v49 = vpack.c.bf16 %v1184_v43, %v1183_v42 }
  0xea   : > { %v1375_v57 = vpop.permute.xlu1 %1374 }
  0xeb   : > { %v1232_v19 = vpop.permute.xlu0 %1231  ;;  %1427 = vst.msk [vmem:[#allocation2 + $0x10] sm:$0xff] %vm1424_vm9, %v1375_v57 }
  0xec   : > { %1283 = vst.msk [vmem:[#allocation2 + $0x18] sm:$0xff] %vm1279_vm8, %v1232_v19  ;;  %961 = vrot.lane.b32.xlu1 %v912_v54, %s2453_s5  ;;  %v1349_v19 = vpack.c.bf16 %v1329_v53, %v1328_v51  ;;  %v1774_v53 = vld [vmem:[%s3429_s2 + $0x20] sm:$0xff] }
  0xed   : > { %959 = vrot.lane.b32.xlu0 %v2899_v15, %s2453_s5  ;;  %v458_v15 = vld [vmem:[%s2497_s20 + $0xf2] sm:$0xff] }
  0xee   : > { %v654_v61 = vpop.permute.xlu1 %653  ;;  %v479_v21 = vpack.c.bf16 %v459_v16, %v458_v15  ;;  %v897_v16 = vld [vmem:[%s2497_s20 + $0x124] sm:$0xff] }
  0xef   : > { %v1377_v63 = vpop.permute.xlu0 %1376  ;;  %704 = vst.msk [vmem:[#allocation2 + $0x20] sm:$0xff] %vm699_vm4, %v654_v61 }
  0xf0   : > { %1428 = vst.msk [vmem:[#allocation2 + $0x18] sm:$0xff] %vm1424_vm9, %v1377_v63  ;;  %1106 = vrot.lane.b32.xlu1 %v2957_v9, %s2454_s8  ;;  %v607_v63 = vld [vmem:[%s2497_s20 + $0x122] sm:$0xff] }
  0xf1   : > { %1104 = vrot.lane.b32.xlu0 %v912_v54, %s2454_s8  ;;  %v1326_v54 = vld [vmem:[%s2497_s20 + $0x106] sm:$0xff] }
  0xf2   : > { %v799_v5 = vpop.permute.xlu1 %798  ;;  %v1445_v7 = vld [vmem:[#allocation2 + $0x10] sm:$0xff] }
  0xf3   : > { %v656_v11 = vpop.permute.xlu0 %655  ;;  %849 = vst.msk [vmem:[#allocation2 + $0x20] sm:$0xff] %vm844_vm5, %v799_v5  ;;  %2371 = vmatprep.mubr.msk.bf16.mxu0 %vm1497_vm10, %v1445_v7  ;;  %v752_v5 = vld [vmem:[%s2497_s20 + $0x123] sm:$0xff]  ;;  %v753_v7 = vld [vmem:[%s2497_s20 + $0x12b] sm:$0xff] }
  0xf4   : > { %705 = vst.msk [vmem:[#allocation2 + $0x28] sm:$0xff] %vm699_vm4, %v656_v11  ;;  %1251 = vrot.lane.b32.xlu1 %v1202_v0, %s2455_s11  ;;  %v608_v0 = vld [vmem:[%s2497_s20 + $0x12a] sm:$0xff]  ;;  %v751_v11 = vld [vmem:[%s2497_s20 + $0x11b] sm:$0xff] }
  0xf5   : > { %1249 = vrot.lane.b32.xlu0 %v1201_v1, %s2455_s11  ;;  %v626_v4 = vpack.c.bf16 %v608_v0, %v607_v63  ;;  %v770_v15 = vpack.c.bf16 %v751_v11, %v750_v10  ;;  %v1780_v0 = vld [vmem:[%s3429_s2 + $0x50] sm:$0xff] }
  0xf6   : > { %v944_v17 = vpop.permute.xlu1 %943  ;;  %v1784_v11 = vld [vmem:[%s3429_s2 + $0x70] sm:$0xff] }
  0xf7   : > { %v801_v18 = vpop.permute.xlu0 %800  ;;  %994 = vst.msk [vmem:[#allocation2 + $0x20] sm:$0xff] %vm989_vm6, %v944_v17  ;;  %v1446_v20 = vld [vmem:[#allocation2 + $0x18] sm:$0xff]  ;;  %v898_v17 = vld [vmem:[%s2497_s20 + $0x12c] sm:$0xff] }
  0xf8   : > { %850 = vst.msk [vmem:[#allocation2 + $0x28] sm:$0xff] %vm844_vm5, %v801_v18  ;;  %2372 = vmatmul.mubr.msk.bf16.gmra.mrb[4].mxu0 %vm1497_vm10, %v1446_v20  ;;  %1396 = vrot.lane.b32.xlu1 %v1347_v12, %s2456_s12 }
  0xf9   : > { %1394 = vrot.lane.b32.xlu0 %v1346_v14, %s2456_s12  ;;  %v771_v14 = vpack.c.bf16 %v753_v7, %v752_v5  ;;  %v1782_v5 = vld [vmem:[%s3429_s2 + $0x60] sm:$0xff] }
  0xfa   : > { %v1089_v24 = vpop.permute.xlu1 %1088 }
  0xfb   : > { %v946_v3 = vpop.permute.xlu0 %945  ;;  %1139 = vst.msk [vmem:[#allocation2 + $0x20] sm:$0xff] %vm1134_vm7, %v1089_v24 }
  0xfc   : > { %995 = vst.msk [vmem:[#allocation2 + $0x28] sm:$0xff] %vm989_vm6, %v946_v3  ;;  %530 = vrot.lane.b32.xlu1 %v479_v21, %s2450_s22 }
  0xfd   : > { %528 = vrot.lane.b32.xlu0 %v2933_v40, %s2450_s22  ;;  %v3015_v40 = vpack.c.bf16 %v1039_v37, %v1038_v35  ;;  %v1330_v35 = vld [vmem:[%s2497_s20 + $0x126] sm:$0xff]  ;;  %v1331_v37 = vld [vmem:[%s2497_s20 + $0x12e] sm:$0xff] }
  0xfe   : > { %v1234_v27 = vpop.permute.xlu1 %1233 }
  0xff   : > { %v1091_v29 = vpop.permute.xlu0 %1090  ;;  %1284 = vst.msk [vmem:[#allocation2 + $0x20] sm:$0xff] %vm1279_vm8, %v1234_v27  ;;  %v1188_v27 = vld [vmem:[%s2497_s20 + $0x13d] sm:$0xff] }
 0x100   : > { %1140 = vst.msk [vmem:[#allocation2 + $0x28] sm:$0xff] %vm1134_vm7, %v1091_v29  ;;  %675 = vrot.lane.b32.xlu1 %v2991_v25, %s2451_s23  ;;  %v1186_v29 = vld [vmem:[%s2497_s20 + $0x12d] sm:$0xff]  ;;  %v1206_v30 = vpack.c.bf16 %v1188_v27, %v1187_v6 }
 0x101   : > { %673 = vrot.lane.b32.xlu0 %v479_v21, %s2451_s23  ;;  %v916_v21 = vpack.c.bf16 %v898_v17, %v897_v16  ;;  %v1205_v31 = vpack.c.bf16 %v1186_v29, %v1185_v28  ;;  %v1786_v16 = vld [vmem:[%s3429_s2 + $0x80] sm:$0xff]  ;;  %v1791_v27 = vld [vmem:[%s3429_s2 + $0xa8] sm:$0xff]  ;;  %v1792_v28 = vld [vmem:[%s3429_s2 + $0xb0] sm:$0xff] }
 0x102   : > { %v1379_v32 = vpop.permute.xlu1 %1378 }
 0x103   : > { %v1236_v33 = vpop.permute.xlu0 %1235  ;;  %1429 = vst.msk [vmem:[#allocation2 + $0x20] sm:$0xff] %vm1424_vm9, %v1379_v32  ;;  %v1332_v32 = vld [vmem:[%s2497_s20 + $0x136] sm:$0xff] }
 0x104   : > { %1285 = vst.msk [vmem:[#allocation2 + $0x28] sm:$0xff] %vm1279_vm8, %v1236_v33  ;;  %820 = vrot.lane.b32.xlu1 %v769_v23, %s2452_s28  ;;  %v1333_v33 = vld [vmem:[%s2497_s20 + $0x13e] sm:$0xff] }
 0x105   : > { %818 = vrot.lane.b32.xlu0 %v768_v13, %s2452_s28 }
 0x106   : > { %v658_v38 = vpop.permute.xlu1 %657 }
 0x107   : > { %v1381_v39 = vpop.permute.xlu0 %1380  ;;  %706 = vst.msk [vmem:[#allocation2 + $0x30] sm:$0xff] %vm699_vm4, %v658_v38 }
 0x108   : > { %1430 = vst.msk [vmem:[#allocation2 + $0x28] sm:$0xff] %vm1424_vm9, %v1381_v39  ;;  %965 = vrot.lane.b32.xlu1 %v914_v34, %s2453_s5  ;;  %v1351_v39 = vpack.c.bf16 %v1333_v33, %v1332_v32  ;;  %v1795_v32 = vld [vmem:[%s3429_s2 + $0xc8] sm:$0xff] }
 0x109   : > { %963 = vrot.lane.b32.xlu0 %v2957_v9, %s2453_s5  ;;  %v1348_v9 = vpack.c.bf16 %v1327_v55, %v1326_v54  ;;  %v1775_v55 = vld [vmem:[%s3429_s2 + $0x28] sm:$0xff] }
 0x10a   : > { %v803_v44 = vpop.permute.xlu1 %802  ;;  %v1447_v45 = vld [vmem:[#allocation2 + $0x20] sm:$0xff] }
 0x10b   : > { %v660_v48 = vpop.permute.xlu0 %659  ;;  %851 = vst.msk [vmem:[#allocation2 + $0x30] sm:$0xff] %vm844_vm5, %v803_v44  ;;  %2375 = vmatprep.mubr.msk.bf16.mxu0 %vm1497_vm10, %v1447_v45  ;;  %v1771_v44 = vld [vmem:[%s3429_s2 + $0x8] sm:$0xff] }
 0x10c   : > { %707 = vst.msk [vmem:[#allocation2 + $0x38] sm:$0xff] %vm699_vm4, %v660_v48  ;;  %1110 = vrot.lane.b32.xlu1 %v3015_v40, %s2454_s8  ;;  %v1772_v48 = vld [vmem:[%s3429_s2 + $0x10] sm:$0xff] }
 0x10d   : > { %1108 = vrot.lane.b32.xlu0 %v914_v34, %s2454_s8 }
 0x10e   : > { %v948_v52 = vpop.permute.xlu1 %947 }
 0x10f   : > { %v805_v56 = vpop.permute.xlu0 %804  ;;  %996 = vst.msk [vmem:[#allocation2 + $0x30] sm:$0xff] %vm989_vm6, %v948_v52  ;;  %v1448_v57 = vld [vmem:[#allocation2 + $0x28] sm:$0xff] }
 0x110   : > { %852 = vst.msk [vmem:[#allocation2 + $0x38] sm:$0xff] %vm844_vm5, %v805_v56  ;;  %2376 = vmatmul.mubr.msk.bf16.gmra.mrb[8].mxu0 %vm1497_vm10, %v1448_v57  ;;  %1255 = vrot.lane.b32.xlu1 %v1204_v49, %s2455_s11  ;;  %v1776_v57 = vld [vmem:[%s3429_s2 + $0x30] sm:$0xff] }
 0x111   : > { %1253 = vrot.lane.b32.xlu0 %v1203_v50, %s2455_s11  ;;  %v1773_v50 = vld [vmem:[%s3429_s2 + $0x18] sm:$0xff] }
 0x112   : > { %v1093_v61 = vpop.permute.xlu1 %1092 }
 0x113   : > { %v950_v62 = vpop.permute.xlu0 %949  ;;  %1141 = vst.msk [vmem:[#allocation2 + $0x30] sm:$0xff] %vm1134_vm7, %v1093_v61  ;;  %v1778_v61 = vld [vmem:[%s3429_s2 + $0x40] sm:$0xff] }
 0x114   : > { %997 = vst.msk [vmem:[#allocation2 + $0x38] sm:$0xff] %vm989_vm6, %v950_v62  ;;  %1400 = vrot.lane.b32.xlu1 %v1349_v19, %s2456_s12 }
 0x115   : > { %1398 = vrot.lane.b32.xlu0 %v1348_v9, %s2456_s12  ;;  %v1777_v9 = vld [vmem:[%s3429_s2 + $0x38] sm:$0xff] }
 0x116   : > { %v1238_v1 = vpop.permute.xlu1 %1237 }
 0x117   : > { %v1095_v2 = vpop.permute.xlu0 %1094  ;;  %1286 = vst.msk [vmem:[#allocation2 + $0x30] sm:$0xff] %vm1279_vm8, %v1238_v1 }
 0x118   : > { %1142 = vst.msk [vmem:[#allocation2 + $0x38] sm:$0xff] %vm1134_vm7, %v1095_v2  ;;  %534 = vrot.lane.b32.xlu1 %v481_v41, %s2450_s22  ;;  %v1781_v2 = vld [vmem:[%s3429_s2 + $0x58] sm:$0xff] }
 0x119   : > { %532 = vrot.lane.b32.xlu0 %v2991_v25, %s2450_s22  ;;  %s208_s22 = scalar_lea.vmem %s3431_s4, %s2308_s19 }
 0x11a   : > { %v1383_v8 = vpop.permute.xlu1 %1382 }
 0x11b   : > { %v1240_v12 = vpop.permute.xlu0 %1239  ;;  %1431 = vst.msk [vmem:[#allocation2 + $0x30] sm:$0xff] %vm1424_vm9, %v1383_v8  ;;  %v1783_v8 = vld [vmem:[%s3429_s2 + $0x68] sm:$0xff] }
 0x11c   : > { %1287 = vst.msk [vmem:[#allocation2 + $0x38] sm:$0xff] %vm1279_vm8, %v1240_v12  ;;  %679 = vrot.lane.b32.xlu1 %v626_v4, %s2451_s23 }
 0x11d   : > { %677 = vrot.lane.b32.xlu0 %v481_v41, %s2451_s23  ;;  %v1779_v41 = vld [vmem:[%s3429_s2 + $0x48] sm:$0xff] }
 0x11e   : > { %v662_v18 = vpop.permute.xlu1 %661 }
 0x11f   : > { %v1385_v20 = vpop.permute.xlu0 %1384  ;;  %708 = vst.msk [vmem:[#allocation2 + $0x40] sm:$0xff] %vm699_vm4, %v662_v18  ;;  %v1787_v18 = vld [vmem:[%s3429_s2 + $0x88] sm:$0xff] }
 0x120   : > { %1432 = vst.msk [vmem:[#allocation2 + $0x38] sm:$0xff] %vm1424_vm9, %v1385_v20  ;;  %824 = vrot.lane.b32.xlu1 %v771_v14, %s2452_s28  ;;  %v1785_v14 = vld [vmem:[%s3429_s2 + $0x78] sm:$0xff] }
 0x121   : > { %822 = vrot.lane.b32.xlu0 %v770_v15, %s2452_s28 }
 0x122   : > { %v807_v24 = vpop.permute.xlu1 %806  ;;  %v1449_v3 = vld [vmem:[#allocation2 + $0x30] sm:$0xff] }
 0x123   : > { %v664_v25 = vpop.permute.xlu0 %663  ;;  %853 = vst.msk [vmem:[#allocation2 + $0x40] sm:$0xff] %vm844_vm5, %v807_v24  ;;  %2379 = vmatprep.mubr.msk.bf16.mxu0 %vm1497_vm10, %v1449_v3  ;;  %v1789_v24 = vld [vmem:[%s3429_s2 + $0x98] sm:$0xff] }
 0x124   : > { %709 = vst.msk [vmem:[#allocation2 + $0x48] sm:$0xff] %vm699_vm4, %v664_v25  ;;  %969 = vrot.lane.b32.xlu1 %v916_v21, %s2453_s5 }
 0x125   : > { %967 = vrot.lane.b32.xlu0 %v3015_v40, %s2453_s5  ;;  %v1350_v40 = vpack.c.bf16 %v1331_v37, %v1330_v35  ;;  %v1797_v37 = vld [vmem:[%s3429_s2 + $0xd8] sm:$0xff] }
 0x126   : > { %v952_v58 = vpop.permute.xlu1 %951 }
 0x127   : > { %v809_v23 = vpop.permute.xlu0 %808  ;;  %998 = vst.msk [vmem:[#allocation2 + $0x40] sm:$0xff] %vm989_vm6, %v952_v58  ;;  %v1450_v13 = vld [vmem:[#allocation2 + $0x38] sm:$0xff] }
 0x128   : > { %854 = vst.msk [vmem:[#allocation2 + $0x48] sm:$0xff] %vm844_vm5, %v809_v23  ;;  %2380 = vmatmul.mubr.msk.bf16.gmra.mrb[12].mxu0 %vm1497_vm10, %v1450_v13  ;;  %1114 = vrot.lane.b32.xlu1 %v1061_v26, %s2454_s8  ;;  %v1790_v26 = vld [vmem:[%s3429_s2 + $0xa0] sm:$0xff]  ;;  %v1793_v23 = vld [vmem:[%s3429_s2 + $0xb8] sm:$0xff] }
 0x129   : > { %1112 = vrot.lane.b32.xlu0 %v916_v21, %s2454_s8  ;;  %v1788_v21 = vld [vmem:[%s3429_s2 + $0x90] sm:$0xff] }
 0x12a   : > { %v1097_v34 = vpop.permute.xlu1 %1096 }
 0x12b   : > { %v954_v38 = vpop.permute.xlu0 %953  ;;  %1143 = vst.msk [vmem:[#allocation2 + $0x40] sm:$0xff] %vm1134_vm7, %v1097_v34  ;;  %v1796_v34 = vld [vmem:[%s3429_s2 + $0xd0] sm:$0xff] }
 0x12c   : > { %999 = vst.msk [vmem:[#allocation2 + $0x48] sm:$0xff] %vm989_vm6, %v954_v38  ;;  %1259 = vrot.lane.b32.xlu1 %v1206_v30, %s2455_s11  ;;  %v1794_v30 = vld [vmem:[%s3429_s2 + $0xc0] sm:$0xff] }
 0x12d   : > { %1257 = vrot.lane.b32.xlu0 %v1205_v31, %s2455_s11 }
 0x12e   : > { %v1242_v42 = vpop.permute.xlu1 %1241 }
 0x12f   : > { %v1099_v43 = vpop.permute.xlu0 %1098  ;;  %1288 = vst.msk [vmem:[#allocation2 + $0x40] sm:$0xff] %vm1279_vm8, %v1242_v42  ;;  %v1799_v42 = vld [vmem:[%s3429_s2 + $0xe8] sm:$0xff] }
 0x130   : > { %1144 = vst.msk [vmem:[#allocation2 + $0x48] sm:$0xff] %vm1134_vm7, %v1099_v43  ;;  %1404 = vrot.lane.b32.xlu1 %v1351_v39, %s2456_s12  ;;  %v1798_v39 = vld [vmem:[%s3429_s2 + $0xe0] sm:$0xff] }
 0x131   : > { %1402 = vrot.lane.b32.xlu0 %v1350_v40, %s2456_s12 }
 0x132   : > { %v1387_v45 = vpop.permute.xlu1 %1386 }
 0x133   : > { %v1244_v47 = vpop.permute.xlu0 %1243  ;;  %1433 = vst.msk [vmem:[#allocation2 + $0x40] sm:$0xff] %vm1424_vm9, %v1387_v45 }
 0x134   : > { %1289 = vst.msk [vmem:[#allocation2 + $0x48] sm:$0xff] %vm1279_vm8, %v1244_v47  ;;  %1813 = vperm.xlu1 %2435, %v1771_v44   ;;  %v1800_v44 = vld [vmem:[%s3429_s2 + $0xf0] sm:$0xff] }
 0x135   : > { %1808 = vperm.xlu0 %2434, %v1770_v46   ;;  %v1801_v46 = vld [vmem:[%s3429_s2 + $0xf8] sm:$0xff] }
 0x136   : > { %v523_v49 = vpop.permute.xlu1 %522 }
 0x137   : > { %v1389_v51 = vpop.permute.xlu0 %1388  ;;  %566 = vst.msk [vmem:[#allocation2 + $0x58] sm:$0xff] %vm554_vm3, %v523_v49 }
 0x138   : > { %1434 = vst.msk [vmem:[#allocation2 + $0x48] sm:$0xff] %vm1424_vm9, %v1389_v51  ;;  %1818 = vperm.xlu1 %2435, %v1772_v48   ;;  %v1802_v48 = vld [vmem:[%s3429_s2 + $0x100] sm:$0xff]  ;;  %v1803_v51 = vld [vmem:[%s3429_s2 + $0x108] sm:$0xff] }
 0x139   : > { %1823 = vperm.xlu0 %2434, %v1773_v50  }
 0x13a   : > { %v668_v52 = vpop.permute.xlu1 %667  ;;  %v1451_v54 = vld [vmem:[#allocation2 + $0x40] sm:$0xff] }
 0x13b   : > { %v666_v56 = vpop.permute.xlu0 %665  ;;  %711 = vst.msk [vmem:[#allocation2 + $0x58] sm:$0xff] %vm699_vm4, %v668_v52  ;;  %2383 = vmatprep.mubr.msk.bf16.mxu0 %vm1497_vm10, %v1451_v54  ;;  %v1804_v54 = vld [vmem:[%s3429_s2 + $0x110] sm:$0xff] }
 0x13c   : > { %710 = vst.msk [vmem:[#allocation2 + $0x50] sm:$0xff] %vm699_vm4, %v666_v56  ;;  %1828 = vperm.xlu1 %2435, %v1774_v53   ;;  %v1805_v56 = vld [vmem:[%s3429_s2 + $0x118] sm:$0xff] }
 0x13d   : > { %1833 = vperm.xlu0 %2434, %v1775_v55  }
 0x13e   : > { %v813_v19 = vpop.permute.xlu1 %812 }
 0x13f   : > { %v811_v59 = vpop.permute.xlu0 %810  ;;  %856 = vst.msk [vmem:[#allocation2 + $0x58] sm:$0xff] %vm844_vm5, %v813_v19  ;;  %v1452_v60 = vld [vmem:[#allocation2 + $0x48] sm:$0xff] }
 0x140   : > { %855 = vst.msk [vmem:[#allocation2 + $0x50] sm:$0xff] %vm844_vm5, %v811_v59  ;;  %2384 = vmatmul.mubr.msk.bf16.gmra.mrb[16].mxu0 %vm1497_vm10, %v1452_v60  ;;  %1838 = vperm.xlu1 %2435, %v1776_v57  }
 0x141   : > { %1843 = vperm.xlu0 %2434, %v1777_v9  }
 0x142   : > { %v958_v62 = vpop.permute.xlu1 %957 }
 0x143   : > { %v956_v63 = vpop.permute.xlu0 %955  ;;  %1001 = vst.msk [vmem:[#allocation2 + $0x58] sm:$0xff] %vm989_vm6, %v958_v62 }
 0x144   : > { %1000 = vst.msk [vmem:[#allocation2 + $0x50] sm:$0xff] %vm989_vm6, %v956_v63  ;;  %1848 = vperm.xlu1 %2435, %v1778_v61  }
 0x145   : > { %1853 = vperm.xlu0 %2434, %v1779_v41  }
 0x146   : > { %v1103_v1 = vpop.permute.xlu1 %1102 }
 0x147   : > { %v1101_v4 = vpop.permute.xlu0 %1100  ;;  %1146 = vst.msk [vmem:[#allocation2 + $0x58] sm:$0xff] %vm1134_vm7, %v1103_v1 }
 0x148   : > { %1145 = vst.msk [vmem:[#allocation2 + $0x50] sm:$0xff] %vm1134_vm7, %v1101_v4  ;;  %1858 = vperm.xlu1 %2435, %v1780_v0  }
 0x149   : > { %1863 = vperm.xlu0 %2434, %v1781_v2  }
 0x14a   : > { %v1248_v7 = vpop.permute.xlu1 %1247 }
 0x14b   : > { %v1246_v10 = vpop.permute.xlu0 %1245  ;;  %1291 = vst.msk [vmem:[#allocation2 + $0x58] sm:$0xff] %vm1279_vm8, %v1248_v7 }
 0x14c   : > { %1290 = vst.msk [vmem:[#allocation2 + $0x50] sm:$0xff] %vm1279_vm8, %v1246_v10  ;;  %1868 = vperm.xlu1 %2435, %v1782_v5  }
 0x14d   : > { %1873 = vperm.xlu0 %2434, %v1783_v8  }
 0x14e   : > { %v1393_v12 = vpop.permute.xlu1 %1392 }
 0x14f   : > { %v1391_v15 = vpop.permute.xlu0 %1390  ;;  %1436 = vst.msk [vmem:[#allocation2 + $0x58] sm:$0xff] %vm1424_vm9, %v1393_v12 }
 0x150   : > { %1435 = vst.msk [vmem:[#allocation2 + $0x50] sm:$0xff] %vm1424_vm9, %v1391_v15  ;;  %1878 = vperm.xlu1 %2435, %v1784_v11  }
 0x151   : > { %1883 = vperm.xlu0 %2434, %v1785_v14  }
 0x152   : > { %v527_v17 = vpop.permute.xlu1 %526 }
 0x153   : > { %v525_v20 = vpop.permute.xlu0 %524  ;;  %568 = vst.msk [vmem:[#allocation2 + $0x68] sm:$0xff] %vm554_vm3, %v527_v17 }
 0x154   : > { %567 = vst.msk [vmem:[#allocation2 + $0x60] sm:$0xff] %vm554_vm3, %v525_v20  ;;  %1888 = vperm.xlu1 %2435, %v1786_v16  }
 0x155   : > { %1893 = vperm.xlu0 %2434, %v1787_v18  }
 0x156   : > { %v672_v36 = vpop.permute.xlu1 %671  ;;  %v1454_v22 = vld [vmem:[#allocation2 + $0x58] sm:$0xff] }
 0x157   : > { %v670_v3 = vpop.permute.xlu0 %669  ;;  %713 = vst.msk [vmem:[#allocation2 + $0x68] sm:$0xff] %vm699_vm4, %v672_v36  ;;  %v1453_v25 = vld [vmem:[#allocation2 + $0x50] sm:$0xff] }
 0x158   : > { %712 = vst.msk [vmem:[#allocation2 + $0x60] sm:$0xff] %vm699_vm4, %v670_v3  ;;  %2387 = vmatprep.mubr.msk.bf16.mxu1 %vm1497_vm10, %v1453_v25  ;;  %1898 = vperm.xlu1 %2435, %v1788_v21  }
 0x159   : > { %2388 = vmatmul.mubr.msk.bf16.vlgmr.msra.gmra.mrb[0].mxu1 %vm1497_vm10, %v1454_v22  ;;  %1903 = vperm.xlu0 %2434, %v1789_v24  }
 0x15a   : > { %v817_v6 = vpop.permute.xlu1 %816 }
 0x15b   : > { %v815_v58 = vpop.permute.xlu0 %814  ;;  %858 = vst.msk [vmem:[#allocation2 + $0x68] sm:$0xff] %vm844_vm5, %v817_v6 }
 0x15c   : > { %857 = vst.msk [vmem:[#allocation2 + $0x60] sm:$0xff] %vm844_vm5, %v815_v58  ;;  %1908 = vperm.xlu1 %2435, %v1790_v26  }
 0x15d   : > { %1913 = vperm.xlu0 %2434, %v1791_v27  }
 0x15e   : > { %v962_v29 = vpop.permute.xlu1 %961 }
 0x15f   : > { %v960_v13 = vpop.permute.xlu0 %959  ;;  %1003 = vst.msk [vmem:[#allocation2 + $0x68] sm:$0xff] %vm989_vm6, %v962_v29 }
 0x160   : > { %1002 = vst.msk [vmem:[#allocation2 + $0x60] sm:$0xff] %vm989_vm6, %v960_v13  ;;  %1918 = vperm.xlu1 %2435, %v1792_v28  }
 0x161   : > { %1923 = vperm.xlu0 %2434, %v1793_v23  }
 0x162   : > { %v1107_v31 = vpop.permute.xlu1 %1106 }
 0x163   : > { %v1105_v33 = vpop.permute.xlu0 %1104  ;;  %1148 = vst.msk [vmem:[#allocation2 + $0x68] sm:$0xff] %vm1134_vm7, %v1107_v31 }
 0x164   : > { %1147 = vst.msk [vmem:[#allocation2 + $0x60] sm:$0xff] %vm1134_vm7, %v1105_v33  ;;  %1928 = vperm.xlu1 %2435, %v1794_v30  }
 0x165   : > { %1933 = vperm.xlu0 %2434, %v1795_v32  }
 0x166   : > { %v1252_v35 = vpop.permute.xlu1 %1251 }
 0x167   : > { %v1250_v38 = vpop.permute.xlu0 %1249  ;;  %1293 = vst.msk [vmem:[#allocation2 + $0x68] sm:$0xff] %vm1279_vm8, %v1252_v35 }
 0x168   : > { %1292 = vst.msk [vmem:[#allocation2 + $0x60] sm:$0xff] %vm1279_vm8, %v1250_v38  ;;  %1938 = vperm.xlu1 %2435, %v1796_v34  }
 0x169   : > { %1943 = vperm.xlu0 %2434, %v1797_v37  }
 0x16a   : > { %v1397_v40 = vpop.permute.xlu1 %1396 }
 0x16b   : > { %v1395_v43 = vpop.permute.xlu0 %1394  ;;  %1438 = vst.msk [vmem:[#allocation2 + $0x68] sm:$0xff] %vm1424_vm9, %v1397_v40 }
 0x16c   : > { %1437 = vst.msk [vmem:[#allocation2 + $0x60] sm:$0xff] %vm1424_vm9, %v1395_v43  ;;  %1948 = vperm.xlu1 %2435, %v1798_v39  }
 0x16d   : > { %1953 = vperm.xlu0 %2434, %v1799_v42  }
 0x16e   : > { %v531_v45 = vpop.permute.xlu1 %530 }
 0x16f   : > { %v529_v47 = vpop.permute.xlu0 %528  ;;  %570 = vst.msk [vmem:[#allocation2 + $0x78] sm:$0xff] %vm554_vm3, %v531_v45 }
 0x170   : > { %569 = vst.msk [vmem:[#allocation2 + $0x70] sm:$0xff] %vm554_vm3, %v529_v47  ;;  %1958 = vperm.xlu1 %2435, %v1800_v44  }
 0x171   : > { %1963 = vperm.xlu0 %2434, %v1801_v46  }
 0x172   : > { %v676_v49 = vpop.permute.xlu1 %675  ;;  %v1456_v50 = vld [vmem:[#allocation2 + $0x68] sm:$0xff] }
 0x173   : > { %v674_v53 = vpop.permute.xlu0 %673  ;;  %715 = vst.msk [vmem:[#allocation2 + $0x78] sm:$0xff] %vm699_vm4, %v676_v49  ;;  %v1455_v52 = vld [vmem:[#allocation2 + $0x60] sm:$0xff] }
 0x174   : > { %714 = vst.msk [vmem:[#allocation2 + $0x70] sm:$0xff] %vm699_vm4, %v674_v53  ;;  %2391 = vmatprep.mubr.msk.bf16.mxu1 %vm1497_vm10, %v1455_v52  ;;  %1968 = vperm.xlu1 %2435, %v1802_v48  }
 0x175   : > { %2392 = vmatmul.mubr.msk.bf16.gmra.mrb[4].mxu1 %vm1497_vm10, %v1456_v50  ;;  %1973 = vperm.xlu0 %2434, %v1803_v51  }
 0x176   : > { %v821_v55 = vpop.permute.xlu1 %820 }
 0x177   : > { %v819_v57 = vpop.permute.xlu0 %818  ;;  %860 = vst.msk [vmem:[#allocation2 + $0x78] sm:$0xff] %vm844_vm5, %v821_v55 }
 0x178   : > { %859 = vst.msk [vmem:[#allocation2 + $0x70] sm:$0xff] %vm844_vm5, %v819_v57  ;;  %1978 = vperm.xlu1 %2435, %v1804_v54  }
 0x179   : > { %1983 = vperm.xlu0 %2434, %v1805_v56  }
 0x17a   : > { %v966_v19 = vpop.permute.xlu1 %965 }
 0x17b   : > { %v964_v9 = vpop.permute.xlu0 %963  ;;  %1005 = vst.msk [vmem:[#allocation2 + $0x78] sm:$0xff] %vm989_vm6, %v966_v19 }
 0x17c   : > { %1004 = vst.msk [vmem:[#allocation2 + $0x70] sm:$0xff] %vm989_vm6, %v964_v9 }
 0x17e   : > { %v1111_v59 = vpop.permute.xlu1 %1110 }
 0x17f   : > { %v1109_v60 = vpop.permute.xlu0 %1108  ;;  %1150 = vst.msk [vmem:[#allocation2 + $0x78] sm:$0xff] %vm1134_vm7, %v1111_v59 }
 0x180   : > { %1149 = vst.msk [vmem:[#allocation2 + $0x70] sm:$0xff] %vm1134_vm7, %v1109_v60 }
 0x182   : > { %v1256_v61 = vpop.permute.xlu1 %1255 }
 0x183   : > { %v1254_v62 = vpop.permute.xlu0 %1253  ;;  %1295 = vst.msk [vmem:[#allocation2 + $0x78] sm:$0xff] %vm1279_vm8, %v1256_v61 }
 0x184   : > { %1294 = vst.msk [vmem:[#allocation2 + $0x70] sm:$0xff] %vm1279_vm8, %v1254_v62 }
 0x186   : > { %v1401_v41 = vpop.permute.xlu1 %1400 }
 0x187   : > { %v1399_v63 = vpop.permute.xlu0 %1398  ;;  %1440 = vst.msk [vmem:[#allocation2 + $0x78] sm:$0xff] %vm1424_vm9, %v1401_v41 }
 0x188   : > { %1439 = vst.msk [vmem:[#allocation2 + $0x70] sm:$0xff] %vm1424_vm9, %v1399_v63 }
 0x18a   : > { %v535_v0 = vpop.permute.xlu1 %534 }
 0x18b   : > { %v533_v1 = vpop.permute.xlu0 %532  ;;  %572 = vst.msk [vmem:[#allocation2 + $0x88] sm:$0xff] %vm554_vm3, %v535_v0 }
 0x18c   : > { %571 = vst.msk [vmem:[#allocation2 + $0x80] sm:$0xff] %vm554_vm3, %v533_v1 }
 0x18e   : > { %v680_v2 = vpop.permute.xlu1 %679  ;;  %v1458_v4 = vld [vmem:[#allocation2 + $0x78] sm:$0xff] }
 0x18f   : > { %v678_v5 = vpop.permute.xlu0 %677  ;;  %717 = vst.msk [vmem:[#allocation2 + $0x88] sm:$0xff] %vm699_vm4, %v680_v2  ;;  %v1457_v7 = vld [vmem:[#allocation2 + $0x70] sm:$0xff] }
 0x190   : > { %716 = vst.msk [vmem:[#allocation2 + $0x80] sm:$0xff] %vm699_vm4, %v678_v5  ;;  %2395 = vmatprep.mubr.msk.bf16.mxu1 %vm1497_vm10, %v1457_v7 }
 0x191   : > { %2396 = vmatmul.mubr.msk.bf16.gmra.mrb[8].mxu1 %vm1497_vm10, %v1458_v4 }
 0x192   : > { %v825_v8 = vpop.permute.xlu1 %824 }
 0x193   : > { %v823_v10 = vpop.permute.xlu0 %822  ;;  %862 = vst.msk [vmem:[#allocation2 + $0x88] sm:$0xff] %vm844_vm5, %v825_v8 }
 0x194   : > { %861 = vst.msk [vmem:[#allocation2 + $0x80] sm:$0xff] %vm844_vm5, %v823_v10 }
 0x196   : > { %v970_v11 = vpop.permute.xlu1 %969 }
 0x197   : > { %v968_v12 = vpop.permute.xlu0 %967  ;;  %1007 = vst.msk [vmem:[#allocation2 + $0x88] sm:$0xff] %vm989_vm6, %v970_v11 }
 0x198   : > { %1006 = vst.msk [vmem:[#allocation2 + $0x80] sm:$0xff] %vm989_vm6, %v968_v12 }
 0x19a   : > { %v1115_v14 = vpop.permute.xlu1 %1114 }
 0x19b   : > { %v1113_v15 = vpop.permute.xlu0 %1112  ;;  %1152 = vst.msk [vmem:[#allocation2 + $0x88] sm:$0xff] %vm1134_vm7, %v1115_v14 }
 0x19c   : > { %1151 = vst.msk [vmem:[#allocation2 + $0x80] sm:$0xff] %vm1134_vm7, %v1113_v15 }
 0x19e   : > { %v1260_v16 = vpop.permute.xlu1 %1259 }
 0x19f   : > { %v1258_v17 = vpop.permute.xlu0 %1257  ;;  %1297 = vst.msk [vmem:[#allocation2 + $0x88] sm:$0xff] %vm1279_vm8, %v1260_v16 }
 0x1a0   : > { %1296 = vst.msk [vmem:[#allocation2 + $0x80] sm:$0xff] %vm1279_vm8, %v1258_v17 }
 0x1a2   : > { %v1405_v18 = vpop.permute.xlu1 %1404 }
 0x1a3   : > { %v1403_v20 = vpop.permute.xlu0 %1402  ;;  %1442 = vst.msk [vmem:[#allocation2 + $0x88] sm:$0xff] %vm1424_vm9, %v1405_v18 }
 0x1a4   : > { %1441 = vst.msk [vmem:[#allocation2 + $0x80] sm:$0xff] %vm1424_vm9, %v1403_v20 }
 0x1aa   : > { %v1460_v21 = vld [vmem:[#allocation2 + $0x88] sm:$0xff] }
 0x1ab   : > { %v1459_v36 = vld [vmem:[#allocation2 + $0x80] sm:$0xff] }
 0x1ac   : > { %2399 = vmatprep.mubr.msk.bf16.mxu1 %vm1497_vm10, %v1459_v36 }
 0x1ad   : > { %2400 = vmatmul.mubr.msk.bf16.gmra.mrb[12].mxu1 %vm1497_vm10, %v1460_v21 }
 0x1b3   : > { %v2369_v22 = vpop.f32.mrb[0].mxu0  ;;  %v1814_v24 = vpop.permute.xlu1 %1813 }
 0x1b4   : > { %1736 = vst.msk [vmem:[%s3274_s18 + $0x10] sm:$0xff] %vm1733_vm11, %v2369_v22  ;;  %v1809_v3 = vpop.permute.xlu0 %1808  ;;  %v1590_v25 = vpop.f32.mrb[1].mxu0 }
 0x1b5   : > { %1734 = vst.msk [vmem:[%s3274_s18] sm:$0xff] %vm1733_vm11, %v1590_v25  ;;  %v1986_v26 = vmul.f32 %v1809_v3, %v1590_v25  ;;  %v2370_v6 = vpop.f32.mrb[2].mxu0 }
 0x1b6   : > { %1737 = vst.msk [vmem:[%s3274_s18 + $0x18] sm:$0xff] %vm1733_vm11, %v2370_v6  ;;  %v1593_v27 = vpop.f32.mrb[3].mxu0 }
 0x1b7   : > { %v2101_v58 = vmul.f32 %v1986_v26, %v1590_v25  ;;  %1735 = vst.msk [vmem:[%s3274_s18 + $0x8] sm:$0xff] %vm1733_vm11, %v1593_v27  ;;  %v1987_v28 = vmul.f32 %v1814_v24, %v1593_v27  ;;  %v1819_v29 = vpop.permute.xlu1 %1818  ;;  %v2022_v30 = vsel %vm1733_vm11, %v1986_v26, 0.0 }
 0x1b8   : > { %v1988_v23 = vmul.f32 %v2369_v22, %v1819_v29  ;;  %v1824_v13 = vpop.permute.xlu0 %1823 }
 0x1b9   : > { %v2023_v31 = vsel %vm1733_vm11, %v1987_v28, 0.0  ;;  %v2102_v32 = vmul.f32 %v1987_v28, %v1593_v27  ;;  %v1989_v33 = vmul.f32 %v2370_v6, %v1824_v13  ;;  %v2137_v38 = vsel %vm1733_vm11, %v2101_v58, 0.0 }
 0x1ba   : > { %v2024_v34 = vadd.f32 %v2023_v31, %v2022_v30  ;;  %v2025_v35 = vsel %vm1733_vm11, %v1988_v23, 0.0  ;;  %v2103_v37 = vmul.f32 %v2369_v22, %v1988_v23 }
 0x1bb   : > { %v2138_v39 = vsel %vm1733_vm11, %v2102_v32, 0.0  ;;  %v2104_v40 = vmul.f32 %v2370_v6, %v1989_v33  ;;  %v2027_v45 = vsel %vm1733_vm11, %v1989_v33, 0.0  ;;  %v1829_v50 = vpop.permute.xlu1 %1828 }
 0x1bc   : > { %v2139_v42 = vadd.f32 %v2138_v39, %v2137_v38  ;;  %v2026_v43 = vadd.f32 %v2025_v35, %v2024_v34  ;;  %v2140_v44 = vsel %vm1733_vm11, %v2103_v37, 0.0  ;;  %v1834_v51 = vpop.permute.xlu0 %1833 }
 0x1bd   : > { %v2142_v48 = vsel %vm1733_vm11, %v2104_v40, 0.0 }
 0x1be   : > { %v2141_v46 = vadd.f32 %v2140_v44, %v2139_v42  ;;  %v2028_v47 = vadd.f32 %v2027_v45, %v2026_v43 }
 0x1bf   : > { %v1839_v53 = vpop.permute.xlu1 %1838 }
 0x1c0   : > { %v2143_v49 = vadd.f32 %v2142_v48, %v2141_v46  ;;  %v1844_v55 = vpop.permute.xlu0 %1843 }
 0x1c3   : > { %v1849_v21 = vpop.permute.xlu1 %1848 }
 0x1c4   : > { %v1854_v36 = vpop.permute.xlu0 %1853 }
 0x1c7   : > { %v1859_v22 = vpop.permute.xlu1 %1858 }
 0x1c8   : > { %v1864_v25 = vpop.permute.xlu0 %1863 }
 0x1cb   : > { %v2373_v52 = vpop.f32.mrb[4].mxu0 }
 0x1cc   : > { %1740 = vst.msk [vmem:[%s3274_s18 + $0x30] sm:$0xff] %vm1733_vm11, %v2373_v52  ;;  %v1606_v54 = vpop.f32.mrb[5].mxu0  ;;  %v1992_v56 = vmul.f32 %v2373_v52, %v1839_v53 }
 0x1cd   : > { %1738 = vst.msk [vmem:[%s3274_s18 + $0x20] sm:$0xff] %vm1733_vm11, %v1606_v54  ;;  %v1990_v57 = vmul.f32 %v1829_v50, %v1606_v54  ;;  %v2374_v19 = vpop.f32.mrb[6].mxu0  ;;  %v1869_v50 = vpop.permute.xlu1 %1868 }
 0x1ce   : > { %1741 = vst.msk [vmem:[%s3274_s18 + $0x38] sm:$0xff] %vm1733_vm11, %v2374_v19  ;;  %v1609_v9 = vpop.f32.mrb[7].mxu0  ;;  %v1993_v61 = vmul.f32 %v2374_v19, %v1844_v55  ;;  %v2107_v63 = vmul.f32 %v2373_v52, %v1992_v56  ;;  %v2033_v7 = vsel %vm1733_vm11, %v1992_v56, 0.0 }
 0x1cf   : > { %v2029_v59 = vsel %vm1733_vm11, %v1990_v57, 0.0  ;;  %v2105_v60 = vmul.f32 %v1990_v57, %v1606_v54  ;;  %1739 = vst.msk [vmem:[%s3274_s18 + $0x28] sm:$0xff] %vm1733_vm11, %v1609_v9  ;;  %v1991_v62 = vmul.f32 %v1834_v51, %v1609_v9  ;;  %v1874_v51 = vpop.permute.xlu0 %1873 }
 0x1d0   : > { %v2030_v41 = vadd.f32 %v2029_v59, %v2028_v47  ;;  %v2108_v8 = vmul.f32 %v2374_v19, %v1993_v61  ;;  %v2148_v14 = vsel %vm1733_vm11, %v2107_v63, 0.0  ;;  %v2035_v15 = vsel %vm1733_vm11, %v1993_v61, 0.0 }
 0x1d1   : > { %v2144_v0 = vsel %vm1733_vm11, %v2105_v60, 0.0  ;;  %v2031_v1 = vsel %vm1733_vm11, %v1991_v62, 0.0  ;;  %v2106_v2 = vmul.f32 %v1991_v62, %v1609_v9  ;;  %v1879_v53 = vpop.permute.xlu1 %1878 }
 0x1d2   : > { %v2145_v4 = vadd.f32 %v2144_v0, %v2143_v49  ;;  %v2032_v5 = vadd.f32 %v2031_v1, %v2030_v41  ;;  %v2150_v18 = vsel %vm1733_vm11, %v2108_v8, 0.0 }
 0x1d3   : > { %v2146_v10 = vsel %vm1733_vm11, %v2106_v2, 0.0  ;;  %v1884_v55 = vpop.permute.xlu0 %1883 }
 0x1d4   : > { %v2034_v11 = vadd.f32 %v2033_v7, %v2032_v5  ;;  %v2147_v12 = vadd.f32 %v2146_v10, %v2145_v4 }
 0x1d6   : > { %v2149_v16 = vadd.f32 %v2148_v14, %v2147_v12  ;;  %v2036_v17 = vadd.f32 %v2035_v15, %v2034_v11 }
 0x1d8   : > { %v2151_v20 = vadd.f32 %v2150_v18, %v2149_v16 }
 0x1e3   : > { %v2377_v24 = vpop.f32.mrb[8].mxu0 }
 0x1e4   : > { %1744 = vst.msk [vmem:[%s3274_s18 + $0x50] sm:$0xff] %vm1733_vm11, %v2377_v24  ;;  %v1622_v3 = vpop.f32.mrb[9].mxu0  ;;  %v1996_v26 = vmul.f32 %v2377_v24, %v1859_v22 }
 0x1e5   : > { %1742 = vst.msk [vmem:[%s3274_s18 + $0x40] sm:$0xff] %vm1733_vm11, %v1622_v3  ;;  %v1994_v6 = vmul.f32 %v1849_v21, %v1622_v3  ;;  %v2378_v27 = vpop.f32.mrb[10].mxu0  ;;  %v1889_v21 = vpop.permute.xlu1 %1888 }
 0x1e6   : > { %1745 = vst.msk [vmem:[%s3274_s18 + $0x58] sm:$0xff] %vm1733_vm11, %v2378_v27  ;;  %v1625_v58 = vpop.f32.mrb[11].mxu0  ;;  %v1997_v23 = vmul.f32 %v2378_v27, %v1864_v25  ;;  %v2111_v31 = vmul.f32 %v2377_v24, %v1996_v26  ;;  %v2041_v38 = vsel %vm1733_vm11, %v1996_v26, 0.0 }
 0x1e7   : > { %v2037_v28 = vsel %vm1733_vm11, %v1994_v6, 0.0  ;;  %v2109_v29 = vmul.f32 %v1994_v6, %v1622_v3  ;;  %1743 = vst.msk [vmem:[%s3274_s18 + $0x48] sm:$0xff] %vm1733_vm11, %v1625_v58  ;;  %v1995_v13 = vmul.f32 %v1854_v36, %v1625_v58  ;;  %v1894_v36 = vpop.permute.xlu0 %1893 }
 0x1e8   : > { %v2038_v30 = vadd.f32 %v2037_v28, %v2036_v17  ;;  %v2112_v39 = vmul.f32 %v2378_v27, %v1997_v23  ;;  %v2156_v44 = vsel %vm1733_vm11, %v2111_v31, 0.0  ;;  %v2043_v45 = vsel %vm1733_vm11, %v1997_v23, 0.0 }
 0x1e9   : > { %v2152_v32 = vsel %vm1733_vm11, %v2109_v29, 0.0  ;;  %v2039_v33 = vsel %vm1733_vm11, %v1995_v13, 0.0  ;;  %v2110_v34 = vmul.f32 %v1995_v13, %v1625_v58  ;;  %v1899_v22 = vpop.permute.xlu1 %1898 }
 0x1ea   : > { %v2153_v35 = vadd.f32 %v2152_v32, %v2151_v20  ;;  %v2040_v37 = vadd.f32 %v2039_v33, %v2038_v30  ;;  %v2158_v48 = vsel %vm1733_vm11, %v2112_v39, 0.0 }
 0x1eb   : > { %v2154_v40 = vsel %vm1733_vm11, %v2110_v34, 0.0  ;;  %v1904_v25 = vpop.permute.xlu0 %1903 }
 0x1ec   : > { %v2042_v42 = vadd.f32 %v2041_v38, %v2040_v37  ;;  %v2155_v43 = vadd.f32 %v2154_v40, %v2153_v35 }
 0x1ee   : > { %v2157_v46 = vadd.f32 %v2156_v44, %v2155_v43  ;;  %v2044_v47 = vadd.f32 %v2043_v45, %v2042_v42 }
 0x1f0   : > { %v2159_v49 = vadd.f32 %v2158_v48, %v2157_v46 }
 0x1fb   : > { %v2381_v52 = vpop.f32.mrb[12].mxu0 }
 0x1fc   : > { %1748 = vst.msk [vmem:[%s3274_s18 + $0x70] sm:$0xff] %vm1733_vm11, %v2381_v52  ;;  %v1638_v54 = vpop.f32.mrb[13].mxu0  ;;  %v2000_v56 = vmul.f32 %v2381_v52, %v1879_v53 }
 0x1fd   : > { %1746 = vst.msk [vmem:[%s3274_s18 + $0x60] sm:$0xff] %vm1733_vm11, %v1638_v54  ;;  %v1998_v57 = vmul.f32 %v1869_v50, %v1638_v54  ;;  %v2382_v19 = vpop.f32.mrb[14].mxu0  ;;  %v1909_v50 = vpop.permute.xlu1 %1908 }
 0x1fe   : > { %1749 = vst.msk [vmem:[%s3274_s18 + $0x78] sm:$0xff] %vm1733_vm11, %v2382_v19  ;;  %v1641_v9 = vpop.f32.mrb[15].mxu0  ;;  %v2001_v61 = vmul.f32 %v2382_v19, %v1884_v55  ;;  %v2115_v63 = vmul.f32 %v2381_v52, %v2000_v56  ;;  %v2049_v7 = vsel %vm1733_vm11, %v2000_v56, 0.0 }
 0x1ff   : > { %v2045_v59 = vsel %vm1733_vm11, %v1998_v57, 0.0  ;;  %v2113_v60 = vmul.f32 %v1998_v57, %v1638_v54  ;;  %1747 = vst.msk [vmem:[%s3274_s18 + $0x68] sm:$0xff] %vm1733_vm11, %v1641_v9  ;;  %v1999_v62 = vmul.f32 %v1874_v51, %v1641_v9  ;;  %v1914_v51 = vpop.permute.xlu0 %1913 }
 0x200   : > { %v2046_v41 = vadd.f32 %v2045_v59, %v2044_v47  ;;  %v2116_v8 = vmul.f32 %v2382_v19, %v2001_v61  ;;  %v2164_v14 = vsel %vm1733_vm11, %v2115_v63, 0.0  ;;  %v2051_v15 = vsel %vm1733_vm11, %v2001_v61, 0.0 }
 0x201   : > { %v2160_v0 = vsel %vm1733_vm11, %v2113_v60, 0.0  ;;  %v2047_v1 = vsel %vm1733_vm11, %v1999_v62, 0.0  ;;  %v2114_v2 = vmul.f32 %v1999_v62, %v1641_v9  ;;  %v1919_v52 = vpop.permute.xlu1 %1918 }
 0x202   : > { %v2161_v4 = vadd.f32 %v2160_v0, %v2159_v49  ;;  %v2048_v5 = vadd.f32 %v2047_v1, %v2046_v41  ;;  %v2166_v18 = vsel %vm1733_vm11, %v2116_v8, 0.0 }
 0x203   : > { %v2162_v10 = vsel %vm1733_vm11, %v2114_v2, 0.0  ;;  %v1924_v19 = vpop.permute.xlu0 %1923 }
 0x204   : > { %v2050_v11 = vadd.f32 %v2049_v7, %v2048_v5  ;;  %v2163_v12 = vadd.f32 %v2162_v10, %v2161_v4 }
 0x206   : > { %v2165_v16 = vadd.f32 %v2164_v14, %v2163_v12  ;;  %v2052_v17 = vadd.f32 %v2051_v15, %v2050_v11 }
 0x208   : > { %v2167_v20 = vadd.f32 %v2166_v18, %v2165_v16 }
 0x213   : > { %v2385_v24 = vpop.f32.mrb[16].mxu0 }
 0x214   : > { %1752 = vst.msk [vmem:[%s3274_s18 + $0x90] sm:$0xff] %vm1733_vm11, %v2385_v24  ;;  %v1654_v3 = vpop.f32.mrb[17].mxu0  ;;  %v2004_v26 = vmul.f32 %v2385_v24, %v1899_v22 }
 0x215   : > { %1750 = vst.msk [vmem:[%s3274_s18 + $0x80] sm:$0xff] %vm1733_vm11, %v1654_v3  ;;  %v2002_v6 = vmul.f32 %v1889_v21, %v1654_v3  ;;  %v2386_v27 = vpop.f32.mrb[18].mxu0  ;;  %v1929_v21 = vpop.permute.xlu1 %1928 }
 0x216   : > { %1753 = vst.msk [vmem:[%s3274_s18 + $0x98] sm:$0xff] %vm1733_vm11, %v2386_v27  ;;  %v1657_v58 = vpop.f32.mrb[19].mxu0  ;;  %v2005_v23 = vmul.f32 %v2386_v27, %v1904_v25  ;;  %v2119_v31 = vmul.f32 %v2385_v24, %v2004_v26  ;;  %v2057_v38 = vsel %vm1733_vm11, %v2004_v26, 0.0 }
 0x217   : > { %v2053_v28 = vsel %vm1733_vm11, %v2002_v6, 0.0  ;;  %v2117_v29 = vmul.f32 %v2002_v6, %v1654_v3  ;;  %1751 = vst.msk [vmem:[%s3274_s18 + $0x88] sm:$0xff] %vm1733_vm11, %v1657_v58  ;;  %v2003_v13 = vmul.f32 %v1894_v36, %v1657_v58  ;;  %v1934_v36 = vpop.permute.xlu0 %1933 }
 0x218   : > { %v2054_v30 = vadd.f32 %v2053_v28, %v2052_v17  ;;  %v2120_v39 = vmul.f32 %v2386_v27, %v2005_v23  ;;  %v2172_v44 = vsel %vm1733_vm11, %v2119_v31, 0.0  ;;  %v2059_v45 = vsel %vm1733_vm11, %v2005_v23, 0.0 }
 0x219   : > { %v2168_v32 = vsel %vm1733_vm11, %v2117_v29, 0.0  ;;  %v2055_v33 = vsel %vm1733_vm11, %v2003_v13, 0.0  ;;  %v2118_v34 = vmul.f32 %v2003_v13, %v1657_v58  ;;  %v1939_v24 = vpop.permute.xlu1 %1938 }
 0x21a   : > { %v2169_v35 = vadd.f32 %v2168_v32, %v2167_v20  ;;  %v2056_v37 = vadd.f32 %v2055_v33, %v2054_v30  ;;  %v2174_v48 = vsel %vm1733_vm11, %v2120_v39, 0.0 }
 0x21b   : > { %v2170_v40 = vsel %vm1733_vm11, %v2118_v34, 0.0  ;;  %v1944_v27 = vpop.permute.xlu0 %1943 }
 0x21c   : > { %v2058_v42 = vadd.f32 %v2057_v38, %v2056_v37  ;;  %v2171_v43 = vadd.f32 %v2170_v40, %v2169_v35 }
 0x21e   : > { %v2173_v46 = vadd.f32 %v2172_v44, %v2171_v43  ;;  %v2060_v47 = vadd.f32 %v2059_v45, %v2058_v42 }
 0x220   : > { %v2175_v49 = vadd.f32 %v2174_v48, %v2173_v46 }
 0x22c   : > { %v2389_v53 = vpop.f32.mrb[0].mxu1 }
 0x22d   : > { %1756 = vst.msk [vmem:[%s3274_s18 + $0xb0] sm:$0xff] %vm1733_vm11, %v2389_v53  ;;  %v1670_v54 = vpop.f32.mrb[1].mxu1  ;;  %v2008_v55 = vmul.f32 %v2389_v53, %v1919_v52 }
 0x22e   : > { %1754 = vst.msk [vmem:[%s3274_s18 + $0xa0] sm:$0xff] %vm1733_vm11, %v1670_v54  ;;  %v2006_v56 = vmul.f32 %v1909_v50, %v1670_v54  ;;  %v2390_v57 = vpop.f32.mrb[2].mxu1  ;;  %v1949_v50 = vpop.permute.xlu1 %1948 }
 0x22f   : > { %1757 = vst.msk [vmem:[%s3274_s18 + $0xb8] sm:$0xff] %vm1733_vm11, %v2390_v57  ;;  %v1673_v9 = vpop.f32.mrb[3].mxu1  ;;  %v2009_v61 = vmul.f32 %v2390_v57, %v1924_v19  ;;  %v2123_v63 = vmul.f32 %v2389_v53, %v2008_v55  ;;  %v2065_v7 = vsel %vm1733_vm11, %v2008_v55, 0.0 }
 0x230   : > { %v2061_v59 = vsel %vm1733_vm11, %v2006_v56, 0.0  ;;  %v2121_v60 = vmul.f32 %v2006_v56, %v1670_v54  ;;  %1755 = vst.msk [vmem:[%s3274_s18 + $0xa8] sm:$0xff] %vm1733_vm11, %v1673_v9  ;;  %v2007_v62 = vmul.f32 %v1914_v51, %v1673_v9  ;;  %v1954_v51 = vpop.permute.xlu0 %1953 }
 0x231   : > { %v2062_v41 = vadd.f32 %v2061_v59, %v2060_v47  ;;  %v2124_v8 = vmul.f32 %v2390_v57, %v2009_v61  ;;  %v2180_v14 = vsel %vm1733_vm11, %v2123_v63, 0.0  ;;  %v2067_v15 = vsel %vm1733_vm11, %v2009_v61, 0.0 }
 0x232   : > { %v2176_v0 = vsel %vm1733_vm11, %v2121_v60, 0.0  ;;  %v2063_v1 = vsel %vm1733_vm11, %v2007_v62, 0.0  ;;  %v2122_v2 = vmul.f32 %v2007_v62, %v1673_v9  ;;  %v1959_v52 = vpop.permute.xlu1 %1958 }
 0x233   : > { %v2177_v4 = vadd.f32 %v2176_v0, %v2175_v49  ;;  %v2064_v5 = vadd.f32 %v2063_v1, %v2062_v41  ;;  %v2182_v18 = vsel %vm1733_vm11, %v2124_v8, 0.0 }
 0x234   : > { %v2178_v10 = vsel %vm1733_vm11, %v2122_v2, 0.0  ;;  %v1964_v19 = vpop.permute.xlu0 %1963 }
 0x235   : > { %v2066_v11 = vadd.f32 %v2065_v7, %v2064_v5  ;;  %v2179_v12 = vadd.f32 %v2178_v10, %v2177_v4 }
 0x237   : > { %v2181_v16 = vadd.f32 %v2180_v14, %v2179_v12  ;;  %v2068_v17 = vadd.f32 %v2067_v15, %v2066_v11 }
 0x239   : > { %v2183_v20 = vadd.f32 %v2182_v18, %v2181_v16 }
 0x248   : > { %v2393_v22 = vpop.f32.mrb[4].mxu1 }
 0x249   : > { %1760 = vst.msk [vmem:[%s3274_s18 + $0xd0] sm:$0xff] %vm1733_vm11, %v2393_v22  ;;  %v1686_v3 = vpop.f32.mrb[5].mxu1  ;;  %v2012_v25 = vmul.f32 %v2393_v22, %v1939_v24 }
 0x24a   : > { %1758 = vst.msk [vmem:[%s3274_s18 + $0xc0] sm:$0xff] %vm1733_vm11, %v1686_v3  ;;  %v2010_v26 = vmul.f32 %v1929_v21, %v1686_v3  ;;  %v2394_v6 = vpop.f32.mrb[6].mxu1  ;;  %v1969_v21 = vpop.permute.xlu1 %1968 }
 0x24b   : > { %1761 = vst.msk [vmem:[%s3274_s18 + $0xd8] sm:$0xff] %vm1733_vm11, %v2394_v6  ;;  %v1689_v58 = vpop.f32.mrb[7].mxu1  ;;  %v2013_v23 = vmul.f32 %v2394_v6, %v1944_v27  ;;  %v2127_v31 = vmul.f32 %v2393_v22, %v2012_v25  ;;  %v2073_v38 = vsel %vm1733_vm11, %v2012_v25, 0.0 }
 0x24c   : > { %v2069_v28 = vsel %vm1733_vm11, %v2010_v26, 0.0  ;;  %v2125_v29 = vmul.f32 %v2010_v26, %v1686_v3  ;;  %1759 = vst.msk [vmem:[%s3274_s18 + $0xc8] sm:$0xff] %vm1733_vm11, %v1689_v58  ;;  %v2011_v13 = vmul.f32 %v1934_v36, %v1689_v58  ;;  %v1974_v36 = vpop.permute.xlu0 %1973 }
 0x24d   : > { %v2070_v30 = vadd.f32 %v2069_v28, %v2068_v17  ;;  %v2128_v39 = vmul.f32 %v2394_v6, %v2013_v23  ;;  %v2188_v44 = vsel %vm1733_vm11, %v2127_v31, 0.0  ;;  %v2075_v45 = vsel %vm1733_vm11, %v2013_v23, 0.0 }
 0x24e   : > { %v2184_v32 = vsel %vm1733_vm11, %v2125_v29, 0.0  ;;  %v2071_v33 = vsel %vm1733_vm11, %v2011_v13, 0.0  ;;  %v2126_v34 = vmul.f32 %v2011_v13, %v1689_v58  ;;  %v1979_v24 = vpop.permute.xlu1 %1978 }
 0x24f   : > { %v2185_v35 = vadd.f32 %v2184_v32, %v2183_v20  ;;  %v2072_v37 = vadd.f32 %v2071_v33, %v2070_v30  ;;  %v2190_v48 = vsel %vm1733_vm11, %v2128_v39, 0.0 }
 0x250   : > { %v2186_v40 = vsel %vm1733_vm11, %v2126_v34, 0.0  ;;  %v1984_v27 = vpop.permute.xlu0 %1983 }
 0x251   : > { %v2074_v42 = vadd.f32 %v2073_v38, %v2072_v37  ;;  %v2187_v43 = vadd.f32 %v2186_v40, %v2185_v35 }
 0x253   : > { %v2189_v46 = vadd.f32 %v2188_v44, %v2187_v43  ;;  %v2076_v47 = vadd.f32 %v2075_v45, %v2074_v42 }
 0x255   : > { %v2191_v49 = vadd.f32 %v2190_v48, %v2189_v46 }
 0x264   : > { %v2397_v53 = vpop.f32.mrb[8].mxu1 }
 0x265   : > { %1764 = vst.msk [vmem:[%s3274_s18 + $0xf0] sm:$0xff] %vm1733_vm11, %v2397_v53  ;;  %v1702_v54 = vpop.f32.mrb[9].mxu1  ;;  %v2016_v55 = vmul.f32 %v2397_v53, %v1959_v52 }
 0x266   : > { %1762 = vst.msk [vmem:[%s3274_s18 + $0xe0] sm:$0xff] %vm1733_vm11, %v1702_v54  ;;  %v2014_v56 = vmul.f32 %v1949_v50, %v1702_v54  ;;  %v2398_v57 = vpop.f32.mrb[10].mxu1 }
 0x267   : > { %1765 = vst.msk [vmem:[%s3274_s18 + $0xf8] sm:$0xff] %vm1733_vm11, %v2398_v57  ;;  %v1705_v9 = vpop.f32.mrb[11].mxu1  ;;  %v2017_v61 = vmul.f32 %v2398_v57, %v1964_v19  ;;  %v2131_v63 = vmul.f32 %v2397_v53, %v2016_v55  ;;  %v2081_v7 = vsel %vm1733_vm11, %v2016_v55, 0.0 }
 0x268   : > { %v2077_v59 = vsel %vm1733_vm11, %v2014_v56, 0.0  ;;  %v2129_v60 = vmul.f32 %v2014_v56, %v1702_v54  ;;  %1763 = vst.msk [vmem:[%s3274_s18 + $0xe8] sm:$0xff] %vm1733_vm11, %v1705_v9  ;;  %v2015_v62 = vmul.f32 %v1954_v51, %v1705_v9 }
 0x269   : > { %v2078_v41 = vadd.f32 %v2077_v59, %v2076_v47  ;;  %v2132_v8 = vmul.f32 %v2398_v57, %v2017_v61  ;;  %v2196_v14 = vsel %vm1733_vm11, %v2131_v63, 0.0  ;;  %v2083_v15 = vsel %vm1733_vm11, %v2017_v61, 0.0 }
 0x26a   : > { %v2192_v0 = vsel %vm1733_vm11, %v2129_v60, 0.0  ;;  %v2079_v1 = vsel %vm1733_vm11, %v2015_v62, 0.0  ;;  %v2130_v2 = vmul.f32 %v2015_v62, %v1705_v9 }
 0x26b   : > { %v2193_v4 = vadd.f32 %v2192_v0, %v2191_v49  ;;  %v2080_v5 = vadd.f32 %v2079_v1, %v2078_v41  ;;  %v2198_v18 = vsel %vm1733_vm11, %v2132_v8, 0.0 }
 0x26c   : > { %v2194_v10 = vsel %vm1733_vm11, %v2130_v2, 0.0 }
 0x26d   : > { %v2082_v11 = vadd.f32 %v2081_v7, %v2080_v5  ;;  %v2195_v12 = vadd.f32 %v2194_v10, %v2193_v4 }
 0x26f   : > { %v2197_v16 = vadd.f32 %v2196_v14, %v2195_v12  ;;  %v2084_v17 = vadd.f32 %v2083_v15, %v2082_v11 }
 0x271   : > { %v2199_v20 = vadd.f32 %v2198_v18, %v2197_v16 }
 0x280   : > { %v2401_v22 = vpop.f32.mrb[12].mxu1 }
 0x281   : > { %1768 = vst.msk [vmem:[%s3274_s18 + $0x110] sm:$0xff] %vm1733_vm11, %v2401_v22  ;;  %v1718_v3 = vpop.f32.mrb[13].mxu1  ;;  %v2020_v25 = vmul.f32 %v2401_v22, %v1979_v24 }
 0x282   : > { %1766 = vst.msk [vmem:[%s3274_s18 + $0x100] sm:$0xff] %vm1733_vm11, %v1718_v3  ;;  %v2018_v26 = vmul.f32 %v1969_v21, %v1718_v3  ;;  %v2402_v6 = vpop.f32.mrb[14].mxu1 }
 0x283   : > { %1769 = vst.msk [vmem:[%s3274_s18 + $0x118] sm:$0xff] %vm1733_vm11, %v2402_v6  ;;  %v1721_v58 = vpop.f32.mrb[15].mxu1  ;;  %v2021_v23 = vmul.f32 %v2402_v6, %v1984_v27  ;;  %v2135_v31 = vmul.f32 %v2401_v22, %v2020_v25  ;;  %v2089_v38 = vsel %vm1733_vm11, %v2020_v25, 0.0 }
 0x284   : > { %v2085_v28 = vsel %vm1733_vm11, %v2018_v26, 0.0  ;;  %v2133_v29 = vmul.f32 %v2018_v26, %v1718_v3  ;;  %1767 = vst.msk [vmem:[%s3274_s18 + $0x108] sm:$0xff] %vm1733_vm11, %v1721_v58  ;;  %v2019_v13 = vmul.f32 %v1974_v36, %v1721_v58 }
 0x285   : > { %v2086_v30 = vadd.f32 %v2085_v28, %v2084_v17  ;;  %v2136_v39 = vmul.f32 %v2402_v6, %v2021_v23  ;;  %v2204_v44 = vsel %vm1733_vm11, %v2135_v31, 0.0  ;;  %v2091_v45 = vsel %vm1733_vm11, %v2021_v23, 0.0 }
 0x286   : > { %v2200_v32 = vsel %vm1733_vm11, %v2133_v29, 0.0  ;;  %v2087_v33 = vsel %vm1733_vm11, %v2019_v13, 0.0  ;;  %v2134_v34 = vmul.f32 %v2019_v13, %v1721_v58 }
 0x287   : > { %v2201_v35 = vadd.f32 %v2200_v32, %v2199_v20  ;;  %v2088_v37 = vadd.f32 %v2087_v33, %v2086_v30  ;;  %v2206_v48 = vsel %vm1733_vm11, %v2136_v39, 0.0 }
 0x288   : > { %v2202_v40 = vsel %vm1733_vm11, %v2134_v34, 0.0 }
 0x289   : > { %v2090_v42 = vadd.f32 %v2089_v38, %v2088_v37  ;;  %v2203_v43 = vadd.f32 %v2202_v40, %v2201_v35 }
 0x28b   : > { %v2092_v46 = vadd.f32 %v2091_v45, %v2090_v42  ;;  %v2205_v47 = vadd.f32 %v2204_v44, %v2203_v43 }
 0x28d   : > { %v2093_v49 = vrot.slane %v2092_v46, 4  ;;  %v2207_v50 = vadd.f32 %v2206_v48, %v2205_v47 }
 0x28f   : > { %v2094_v51 = vadd.f32 %v2093_v49, %v2092_v46  ;;  %v2208_v53 = vrot.slane %v2207_v50, 4 }
 0x291   : > { %v2095_v52 = vrot.slane %v2094_v51, 2  ;;  %v2209_v54 = vadd.f32 %v2208_v53, %v2207_v50 }
 0x293   : > { %v2096_v55 = vadd.f32 %v2095_v52, %v2094_v51  ;;  %v2210_v56 = vrot.slane %v2209_v54, 2 }
 0x295   : > { %v2097_v57 = vrot.slane %v2096_v55, 1  ;;  %v2211_v19 = vadd.f32 %v2210_v56, %v2209_v54 }
 0x297   : > { %v2098_v9 = vadd.f32 %v2097_v57, %v2096_v55  ;;  %v2212_v59 = vrot.slane %v2211_v19, 1 }
 0x299   : > { %2100 = vst.msk [vmem:[%s208_s22] sm:$0x1] %vm2099_vm12, %v2098_v9  ;;  %v2213_v60 = vadd.f32 %v2212_v59, %v2211_v19 }
 0x29b   : > { %2214 = vst.msk [vmem:[%s208_s22 + $0x1] sm:$0x1] %vm2099_vm12, %v2213_v60 }
 0x29c PF: > { %s15_s15 = sadd.s32 1, %s2447_s15  }
 0x29d   : > { %p12_p4 = scmp.ge.s32.totalorder %s15_s15, 4  }
 0x29f   :  { %14 = sbr.rel (!%p12_p4) target bundleno = 1 (0x1), region = 74 }

// kernel: stack_decoder_2d.6
= control target key start
LH: loop header
LB: loop body
LE: loop exit
PB: predicated region body
PF: predicated region fallthrough
CT: control target
= control target key end

     0   :  { %s2452_s15 = smov 0   ;;  %s3390_s0 = inlined_call_operand.vmem [shape: f32[2,326,4], index: 0, kind: input, shape index: {}]   ;;  %s3391_s1 = inlined_call_operand.vmem [shape: bf16[36,4], index: 1, kind: input, shape index: {}]   ;;  %s3392_s2 = inlined_call_operand.vmem [shape: f32[288,1], index: 2, kind: input, shape index: {}]   ;;  %s3393_s3 = inlined_call_operand.vmem [shape: f32[2,288,4], index: 3, kind: output, shape index: {0}]   ;;  %s3394_s4 = inlined_call_operand.vmem [shape: f32[2,2,4], index: 4, kind: output, shape index: {1}]  }
   0x1 LB: > { %s2284_s16 = sadd.s32 4294967295, %s2416_s15   ;;  %p2288_p0 = scmp.ge.s32.totalorder %s2416_s15, 1  ;;  %s2416_s15 = sphi %s2452_s15, %s15_s15  }
   0x2   : > { %p165_p1 = scmp.lt.s32.totalorder %s2416_s15, 3 }
   0x4   : > { %p166_p2 = pnand %p2288_p0, %p165_p1 }
   0x5   : > { %p195_p3 = scmp.lt.s32.totalorder (!%p166_p2), %s2284_s16, 1  ;;  %s2418_s21 = smov (!%p166_p2), 4   ;;  %vm264_vm0 = vcmask (!%p166_p2), 31744   ;;  %vm1536_vm1 = vcmask (!%p166_p2), 1041408   ;;  %vm409_vm2 = vcmask (!%p166_p2), 64544   ;;  %vm554_vm3 = vcmask (!%p166_p2), 97344  }
   0x6   : > { %169 = sbr.rel (%p166_p2) target bundleno = 668 (0x29c), region = 32  ;;  %s2419_s22 = smov (!%p166_p2), 8   ;;  %vm699_vm4 = vcmask (!%p166_p2), 130144   ;;  %vm844_vm5 = vcmask (!%p166_p2), 162944   ;;  %vm989_vm6 = vcmask (!%p166_p2), 195744   ;;  %vm1134_vm7 = vcmask (!%p166_p2), 228544  }
   0x7   : > { %s2420_s23 = smov (!%p166_p2), 12   ;;  %s2421_s24 = smov (!%p166_p2), 16   ;;  %vm1279_vm8 = vcmask (!%p166_p2), 261344   ;;  %vm1424_vm9 = vcmask (!%p166_p2), 294144   ;;  %vm1481_vm10 = vcmask (!%p166_p2), 293888   ;;  %vm2082_vm11 = vcmask (!%p166_p2), 24576  }
   0x8   : > { %s2422_s27 = smov (!%p166_p2), 20   ;;  %s2423_s30 = smov (!%p166_p2), 24  }
   0x9   : > { %s2424_s7 = smov (!%p166_p2), 28   ;;  %s2425_s8 = smov (!%p166_p2), 32  }
   0xd   : > { %s3396_s16 = smov (!%p195_p3, %s2284_s16), 1 }
   0xe   : > { %s2386_s17 = smul.u32 328, %s3396_s16  ;;  %s2291_s13 = sshll.u32 %s3396_s16, 1 }
   0xf   : > { %s2387_s9 = smul.u32 288, %s3396_s16  ;;  %s208_s18 = scalar_lea.vmem %s3394_s4, %s2291_s13 }
  0x10   : > { %s2466_s20 = scalar_lea.vmem %s3390_s0, %s2386_s17 }
  0x11   : > { %v287_v0 = vld [vmem:[%s2466_s20 + $0x21] sm:$0xff]  ;;  %v288_v1 = vld [vmem:[%s2466_s20 + $0x29] sm:$0xff]  ;;  %v289_v5 = vld [vmem:[%s2466_s20 + $0x31] sm:$0xff]  ;;  %s3237_s12 = scalar_lea.vmem %s3393_s3, %s2387_s9 }
  0x12   : > { %v283_v2 = vld [vmem:[%s2466_s20 + $0x1] sm:$0xff]  ;;  %v321_v3 = vpack.c.bf16 %v288_v1, %v287_v0  ;;  %v284_v4 = vld [vmem:[%s2466_s20 + $0x9] sm:$0xff]  ;;  %v290_v6 = vld [vmem:[%s2466_s20 + $0x39] sm:$0xff] }
  0x13   : > { %v319_v7 = vpack.c.bf16 %v284_v4, %v283_v2  ;;  %v285_v8 = vld [vmem:[%s2466_s20 + $0x11] sm:$0xff]  ;;  %v286_v9 = vld [vmem:[%s2466_s20 + $0x19] sm:$0xff]  ;;  %v322_v10 = vpack.c.bf16 %v290_v6, %v289_v5  ;;  %v291_v14 = vld [vmem:[%s2466_s20 + $0x41] sm:$0xff] }
  0x14   : > { %359 = vrot.lane.b32.xlu1 %v321_v3, %s2418_s21  ;;  %v320_v11 = vpack.c.bf16 %v286_v9, %v285_v8  ;;  %v293_v12 = vld [vmem:[%s2466_s20 + $0x51] sm:$0xff]  ;;  %v294_v13 = vld [vmem:[%s2466_s20 + $0x59] sm:$0xff]  ;;  %v292_v15 = vld [vmem:[%s2466_s20 + $0x49] sm:$0xff] }
  0x15   : > { %355 = vrot.lane.b32.xlu0 %v319_v7, %s2418_s21  ;;  %v324_v16 = vpack.c.bf16 %v294_v13, %v293_v12  ;;  %v323_v17 = vpack.c.bf16 %v292_v15, %v291_v14  ;;  %v297_v18 = vld [vmem:[%s2466_s20 + $0x71] sm:$0xff]  ;;  %v298_v19 = vld [vmem:[%s2466_s20 + $0x79] sm:$0xff]  ;;  %v295_v20 = vld [vmem:[%s2466_s20 + $0x61] sm:$0xff] }
  0x16   : > { %v296_v21 = vld [vmem:[%s2466_s20 + $0x69] sm:$0xff]  ;;  %v326_v22 = vpack.c.bf16 %v298_v19, %v297_v18  ;;  %v301_v24 = vld [vmem:[%s2466_s20 + $0x91] sm:$0xff]  ;;  %v302_v25 = vld [vmem:[%s2466_s20 + $0x99] sm:$0xff] }
  0x17   : > { %v325_v23 = vpack.c.bf16 %v296_v21, %v295_v20  ;;  %v299_v26 = vld [vmem:[%s2466_s20 + $0x81] sm:$0xff]  ;;  %v300_v27 = vld [vmem:[%s2466_s20 + $0x89] sm:$0xff]  ;;  %v328_v28 = vpack.c.bf16 %v302_v25, %v301_v24  ;;  %v305_v30 = vld [vmem:[%s2466_s20 + $0xb1] sm:$0xff] }
  0x18   : > { %361 = vrot.lane.b32.xlu1 %v322_v10, %s2418_s21  ;;  %v327_v29 = vpack.c.bf16 %v300_v27, %v299_v26  ;;  %v306_v31 = vld [vmem:[%s2466_s20 + $0xb9] sm:$0xff]  ;;  %v303_v32 = vld [vmem:[%s2466_s20 + $0xa1] sm:$0xff]  ;;  %v304_v33 = vld [vmem:[%s2466_s20 + $0xa9] sm:$0xff] }
  0x19   : > { %357 = vrot.lane.b32.xlu0 %v320_v11, %s2418_s21  ;;  %v330_v34 = vpack.c.bf16 %v306_v31, %v305_v30  ;;  %v329_v35 = vpack.c.bf16 %v304_v33, %v303_v32  ;;  %v309_v36 = vld [vmem:[%s2466_s20 + $0xd1] sm:$0xff]  ;;  %v310_v37 = vld [vmem:[%s2466_s20 + $0xd9] sm:$0xff]  ;;  %v307_v38 = vld [vmem:[%s2466_s20 + $0xc1] sm:$0xff] }
  0x1a   : > { %v308_v39 = vld [vmem:[%s2466_s20 + $0xc9] sm:$0xff]  ;;  %v332_v40 = vpack.c.bf16 %v310_v37, %v309_v36  ;;  %v313_v42 = vld [vmem:[%s2466_s20 + $0xf1] sm:$0xff]  ;;  %v314_v43 = vld [vmem:[%s2466_s20 + $0xf9] sm:$0xff] }
  0x1b   : > { %v331_v41 = vpack.c.bf16 %v308_v39, %v307_v38  ;;  %v311_v44 = vld [vmem:[%s2466_s20 + $0xe1] sm:$0xff]  ;;  %v312_v45 = vld [vmem:[%s2466_s20 + $0xe9] sm:$0xff]  ;;  %v334_v46 = vpack.c.bf16 %v314_v43, %v313_v42  ;;  %v317_v48 = vld [vmem:[%s2466_s20 + $0x111] sm:$0xff] }
  0x1c   : > { %365 = vrot.lane.b32.xlu1 %v324_v16, %s2418_s21  ;;  %v333_v47 = vpack.c.bf16 %v312_v45, %v311_v44  ;;  %v318_v49 = vld [vmem:[%s2466_s20 + $0x119] sm:$0xff]  ;;  %v315_v50 = vld [vmem:[%s2466_s20 + $0x101] sm:$0xff]  ;;  %v316_v51 = vld [vmem:[%s2466_s20 + $0x109] sm:$0xff] }
  0x1d   : > { %363 = vrot.lane.b32.xlu0 %v323_v17, %s2418_s21  ;;  %v336_v52 = vpack.c.bf16 %v318_v49, %v317_v48  ;;  %v430_v53 = vld [vmem:[%s2466_s20 + $0x12] sm:$0xff]  ;;  %v431_v54 = vld [vmem:[%s2466_s20 + $0x1a] sm:$0xff]  ;;  %v335_v55 = vpack.c.bf16 %v316_v51, %v315_v50  ;;  %v211_v57 = vld [vmem:[%s2466_s20 + $0x8] sm:$0xff] }
  0x1e   : > { %v210_v56 = vld [vmem:[%s2466_s20] sm:$0xff]  ;;  %v429_v60 = vld [vmem:[%s2466_s20 + $0xa] sm:$0xff]  ;;  %v213_v1 = vld [vmem:[%s2466_s20 + $0x18] sm:$0xff]  ;;  %v2532_v3 = vpack.c.bf16 %v431_v54, %v430_v53 }
  0x1f   : > { %v214_v58 = vld [vmem:[%s2466_s20 + $0x20] sm:$0xff]  ;;  %v246_v61 = vpack.c.bf16 %v211_v57, %v210_v56  ;;  %v215_v62 = vld [vmem:[%s2466_s20 + $0x28] sm:$0xff]  ;;  %v212_v0 = vld [vmem:[%s2466_s20 + $0x10] sm:$0xff] }
  0x20   : > { %369 = vrot.lane.b32.xlu1 %v326_v22, %s2418_s21  ;;  %v428_v59 = vld [vmem:[%s2466_s20 + $0x2] sm:$0xff]  ;;  %v248_v63 = vpack.c.bf16 %v215_v62, %v214_v58  ;;  %v216_v2 = vld [vmem:[%s2466_s20 + $0x30] sm:$0xff]  ;;  %v435_v5 = vld [vmem:[%s2466_s20 + $0x3a] sm:$0xff]  ;;  %v247_v6 = vpack.c.bf16 %v213_v1, %v212_v0 }
  0x21   : > { %367 = vrot.lane.b32.xlu0 %v325_v23, %s2418_s21  ;;  %v434_v4 = vld [vmem:[%s2466_s20 + $0x32] sm:$0xff]  ;;  %265 = vst.msk [vmem:[#allocation2] sm:$0xff] %vm264_vm0, %v246_v61  ;;  %v464_v8 = vpack.c.bf16 %v429_v60, %v428_v59  ;;  %v432_v9 = vld [vmem:[%s2466_s20 + $0x22] sm:$0xff]  ;;  %v433_v10 = vld [vmem:[%s2466_s20 + $0x2a] sm:$0xff] }
  0x22   : > { %v217_v7 = vld [vmem:[%s2466_s20 + $0x38] sm:$0xff]  ;;  %267 = vst.msk [vmem:[#allocation2 + $0x10] sm:$0xff] %vm264_vm0, %v248_v63  ;;  %v218_v12 = vld [vmem:[%s2466_s20 + $0x40] sm:$0xff]  ;;  %266 = vst.msk [vmem:[#allocation2 + $0x8] sm:$0xff] %vm264_vm0, %v247_v6  ;;  %v2551_v19 = vpack.c.bf16 %v435_v5, %v434_v4  ;;  %v2557_v23 = vpack.c.bf16 %v433_v10, %v432_v9 }
  0x23   : > { %v249_v11 = vpack.c.bf16 %v217_v7, %v216_v2  ;;  %v219_v13 = vld [vmem:[%s2466_s20 + $0x48] sm:$0xff]  ;;  %v220_v14 = vld [vmem:[%s2466_s20 + $0x50] sm:$0xff]  ;;  %v221_v15 = vld [vmem:[%s2466_s20 + $0x58] sm:$0xff] }
  0x24   : > { %373 = vrot.lane.b32.xlu1 %v328_v28, %s2418_s21  ;;  %v438_v16 = vld [vmem:[%s2466_s20 + $0x52] sm:$0xff]  ;;  %v250_v17 = vpack.c.bf16 %v219_v13, %v218_v12  ;;  %v251_v18 = vpack.c.bf16 %v221_v15, %v220_v14  ;;  %v439_v20 = vld [vmem:[%s2466_s20 + $0x5a] sm:$0xff]  ;;  %v223_v22 = vld [vmem:[%s2466_s20 + $0x68] sm:$0xff] }
  0x25   : > { %371 = vrot.lane.b32.xlu0 %v327_v29, %s2418_s21  ;;  %268 = vst.msk [vmem:[#allocation2 + $0x18] sm:$0xff] %vm264_vm0, %v249_v11  ;;  %v222_v21 = vld [vmem:[%s2466_s20 + $0x60] sm:$0xff]  ;;  %v224_v26 = vld [vmem:[%s2466_s20 + $0x70] sm:$0xff]  ;;  %v225_v27 = vld [vmem:[%s2466_s20 + $0x78] sm:$0xff]  ;;  %v2573_v36 = vpack.c.bf16 %v439_v20, %v438_v16 }
  0x26   : > { %v436_v24 = vld [vmem:[%s2466_s20 + $0x42] sm:$0xff]  ;;  %269 = vst.msk [vmem:[#allocation2 + $0x20] sm:$0xff] %vm264_vm0, %v250_v17  ;;  %270 = vst.msk [vmem:[#allocation2 + $0x28] sm:$0xff] %vm264_vm0, %v251_v18  ;;  %v252_v25 = vpack.c.bf16 %v223_v22, %v222_v21  ;;  %v437_v28 = vld [vmem:[%s2466_s20 + $0x4a] sm:$0xff]  ;;  %v253_v29 = vpack.c.bf16 %v225_v27, %v224_v26 }
  0x27   : > { %v226_v30 = vld [vmem:[%s2466_s20 + $0x80] sm:$0xff]  ;;  %v227_v31 = vld [vmem:[%s2466_s20 + $0x88] sm:$0xff]  ;;  %v442_v32 = vld [vmem:[%s2466_s20 + $0x72] sm:$0xff] }
  0x28   : > { %377 = vrot.lane.b32.xlu1 %v330_v34, %s2418_s21  ;;  %271 = vst.msk [vmem:[#allocation2 + $0x30] sm:$0xff] %vm264_vm0, %v252_v25  ;;  %v254_v33 = vpack.c.bf16 %v227_v31, %v226_v30  ;;  %v228_v34 = vld [vmem:[%s2466_s20 + $0x90] sm:$0xff]  ;;  %v443_v37 = vld [vmem:[%s2466_s20 + $0x7a] sm:$0xff]  ;;  %272 = vst.msk [vmem:[#allocation2 + $0x38] sm:$0xff] %vm264_vm0, %v253_v29 }
  0x29   : > { %375 = vrot.lane.b32.xlu0 %v329_v35, %s2418_s21  ;;  %v229_v35 = vld [vmem:[%s2466_s20 + $0x98] sm:$0xff]  ;;  %v230_v39 = vld [vmem:[%s2466_s20 + $0xa0] sm:$0xff]  ;;  %v232_v44 = vld [vmem:[%s2466_s20 + $0xb0] sm:$0xff]  ;;  %v2596_v53 = vpack.c.bf16 %v443_v37, %v442_v32 }
  0x2a   : > { %v255_v38 = vpack.c.bf16 %v229_v35, %v228_v34  ;;  %v440_v42 = vld [vmem:[%s2466_s20 + $0x62] sm:$0xff]  ;;  %273 = vst.msk [vmem:[#allocation2 + $0x40] sm:$0xff] %vm264_vm0, %v254_v33  ;;  %v233_v45 = vld [vmem:[%s2466_s20 + $0xb8] sm:$0xff]  ;;  %v236_v51 = vld [vmem:[%s2466_s20 + $0xd0] sm:$0xff] }
  0x2b   : > { %v234_v48 = vld [vmem:[%s2466_s20 + $0xc0] sm:$0xff]  ;;  %v235_v49 = vld [vmem:[%s2466_s20 + $0xc8] sm:$0xff]  ;;  %v446_v54 = vld [vmem:[%s2466_s20 + $0x92] sm:$0xff] }
  0x2c   : > { %381 = vrot.lane.b32.xlu1 %v332_v40, %s2418_s21  ;;  %v231_v40 = vld [vmem:[%s2466_s20 + $0xa8] sm:$0xff]  ;;  %274 = vst.msk [vmem:[#allocation2 + $0x48] sm:$0xff] %vm264_vm0, %v255_v38  ;;  %v258_v50 = vpack.c.bf16 %v235_v49, %v234_v48  ;;  %v238_v56 = vld [vmem:[%s2466_s20 + $0xe0] sm:$0xff]  ;;  %v240_v61 = vld [vmem:[%s2466_s20 + $0xf0] sm:$0xff] }
  0x2d   : > { %379 = vrot.lane.b32.xlu0 %v331_v41, %s2418_s21  ;;  %v2581_v41 = vpack.c.bf16 %v437_v28, %v436_v24  ;;  %v256_v43 = vpack.c.bf16 %v231_v40, %v230_v39  ;;  %v239_v57 = vld [vmem:[%s2466_s20 + $0xe8] sm:$0xff]  ;;  %v447_v59 = vld [vmem:[%s2466_s20 + $0x9a] sm:$0xff]  ;;  %v244_v5 = vld [vmem:[%s2466_s20 + $0x110] sm:$0xff] }
  0x2e   : > { %277 = vst.msk [vmem:[#allocation2 + $0x60] sm:$0xff] %vm264_vm0, %v258_v50  ;;  %v260_v60 = vpack.c.bf16 %v239_v57, %v238_v56  ;;  %v241_v62 = vld [vmem:[%s2466_s20 + $0xf8] sm:$0xff]  ;;  %v444_v63 = vld [vmem:[%s2466_s20 + $0x82] sm:$0xff]  ;;  %v445_v0 = vld [vmem:[%s2466_s20 + $0x8a] sm:$0xff]  ;;  %v2619_v6 = vpack.c.bf16 %v447_v59, %v446_v54 }
  0x2f   : > { %275 = vst.msk [vmem:[#allocation2 + $0x50] sm:$0xff] %vm264_vm0, %v256_v43  ;;  %v261_v1 = vpack.c.bf16 %v241_v62, %v240_v61  ;;  %v242_v2 = vld [vmem:[%s2466_s20 + $0x100] sm:$0xff]  ;;  %v243_v4 = vld [vmem:[%s2466_s20 + $0x108] sm:$0xff]  ;;  %v2625_v9 = vpack.c.bf16 %v445_v0, %v444_v63  ;;  %v718_v14 = vld [vmem:[%s2466_s20 + $0x13] sm:$0xff] }
  0x30   : > { %385 = vrot.lane.b32.xlu1 %v334_v46, %s2418_s21  ;;  %v441_v46 = vld [vmem:[%s2466_s20 + $0x6a] sm:$0xff]  ;;  %279 = vst.msk [vmem:[#allocation2 + $0x70] sm:$0xff] %vm264_vm0, %v260_v60  ;;  %v262_v7 = vpack.c.bf16 %v243_v4, %v242_v2  ;;  %v448_v11 = vld [vmem:[%s2466_s20 + $0xa2] sm:$0xff]  ;;  %v863_v17 = vld [vmem:[%s2466_s20 + $0x14] sm:$0xff] }
  0x31   : > { %383 = vrot.lane.b32.xlu0 %v333_v47, %s2418_s21  ;;  %v257_v47 = vpack.c.bf16 %v233_v45, %v232_v44  ;;  %v2604_v58 = vpack.c.bf16 %v441_v46, %v440_v42  ;;  %280 = vst.msk [vmem:[#allocation2 + $0x78] sm:$0xff] %vm264_vm0, %v261_v1  ;;  %v449_v12 = vld [vmem:[%s2466_s20 + $0xaa] sm:$0xff]  ;;  %v719_v15 = vld [vmem:[%s2466_s20 + $0x1b] sm:$0xff] }
  0x32   : > { %281 = vst.msk [vmem:[#allocation2 + $0x80] sm:$0xff] %vm264_vm0, %v262_v7  ;;  %v2635_v13 = vpack.c.bf16 %v449_v12, %v448_v11  ;;  %v754_v16 = vpack.c.bf16 %v719_v15, %v718_v14  ;;  %v864_v18 = vld [vmem:[%s2466_s20 + $0x1c] sm:$0xff]  ;;  %v721_v21 = vld [vmem:[%s2466_s20 + $0x2b] sm:$0xff]  ;;  %v1014_v59 = vld [vmem:[%s2466_s20 + $0x54] sm:$0xff] }
  0x33   : > { %276 = vst.msk [vmem:[#allocation2 + $0x58] sm:$0xff] %vm264_vm0, %v257_v47  ;;  %v720_v20 = vld [vmem:[%s2466_s20 + $0x23] sm:$0xff]  ;;  %v899_v22 = vpack.c.bf16 %v864_v18, %v863_v17  ;;  %v1009_v25 = vld [vmem:[%s2466_s20 + $0x2c] sm:$0xff]  ;;  %v1155_v37 = vld [vmem:[%s2466_s20 + $0x35] sm:$0xff] }
  0x34   : > { %389 = vrot.lane.b32.xlu1 %v336_v52, %s2418_s21  ;;  %v237_v52 = vld [vmem:[%s2466_s20 + $0xd8] sm:$0xff]  ;;  %v1008_v24 = vld [vmem:[%s2466_s20 + $0x24] sm:$0xff]  ;;  %v1154_v29 = vld [vmem:[%s2466_s20 + $0x2d] sm:$0xff] }
  0x35   : > { %387 = vrot.lane.b32.xlu0 %v335_v55, %s2418_s21  ;;  %v259_v55 = vpack.c.bf16 %v237_v52, %v236_v51  ;;  %v2407_v26 = vld [vmem:[%s3391_s1] sm:$0xff]   ;;  %v1044_v27 = vpack.c.bf16 %v1009_v25, %v1008_v24  ;;  %v2408_v31 = vld [vmem:[%s3391_s1 + $0x8] sm:$0xff]   ;;  %v2409_v39 = vld [vmem:[%s3391_s1 + $0x10] ss:$0 sps:$4 sm:$0x33]  }
  0x36   : > { %2336 = vmatprep.subr.bf16.mxu0 %v2407_v26  ;;  %v1153_v28 = vld [vmem:[%s2466_s20 + $0x25] sm:$0xff]  ;;  %v1011_v30 = vld [vmem:[%s2466_s20 + $0x3c] sm:$0xff]  ;;  %2378 = vmatprep.subr.bf16.mxu1 %v2407_v26  ;;  %v1299_v35 = vld [vmem:[%s2466_s20 + $0x2e] sm:$0xff]  ;;  %v1538_v42 = vsel %vm1536_vm1, %v2409_v39, 0 }
  0x37   : > { %278 = vst.msk [vmem:[#allocation2 + $0x68] sm:$0xff] %vm264_vm0, %v259_v55  ;;  %2337 = vmatpush3.bf16.msra.mxu0 %v2407_v26  ;;  %2381 = vmatpush3.bf16.msra.mxu1 %v2407_v26  ;;  %v1189_v32 = vpack.c.bf16 %v1154_v29, %v1153_v28  ;;  %v1298_v34 = vld [vmem:[%s2466_s20 + $0x26] sm:$0xff]  ;;  %v1156_v38 = vld [vmem:[%s2466_s20 + $0x3d] sm:$0xff]  ;;  %v722_v47 = vld [vmem:[%s2466_s20 + $0x33] sm:$0xff] }
  0x38   : > { %502 = vrot.lane.b32.xlu1 %v2532_v3, %s2419_s22  ;;  %2338 = vmatprep.subr.bf16.mxu0 %v2408_v31  ;;  %v1334_v40 = vpack.c.bf16 %v1299_v35, %v1298_v34  ;;  %v1190_v43 = vpack.c.bf16 %v1156_v38, %v1155_v37  ;;  %v1300_v44 = vld [vmem:[%s2466_s20 + $0x36] sm:$0xff]  ;;  %v1301_v45 = vld [vmem:[%s2466_s20 + $0x3e] sm:$0xff]  ;;  %v725_v51 = vld [vmem:[%s2466_s20 + $0x4b] sm:$0xff] }
  0x39   : > { %500 = vrot.lane.b32.xlu0 %v464_v8, %s2419_s22  ;;  %v245_v8 = vld [vmem:[%s2466_s20 + $0x118] sm:$0xff]  ;;  %2379 = vmatprep.subr.bf16.mxu1 %v2408_v31  ;;  %v1335_v46 = vpack.c.bf16 %v1301_v45, %v1300_v44  ;;  %v724_v50 = vld [vmem:[%s2466_s20 + $0x43] sm:$0xff]  ;;  %v1013_v55 = vld [vmem:[%s2466_s20 + $0x4c] sm:$0xff] }
  0x3a   : > { %v263_v10 = vpack.c.bf16 %v245_v8, %v244_v5  ;;  %v723_v48 = vld [vmem:[%s2466_s20 + $0x3b] sm:$0xff]  ;;  %v757_v52 = vpack.c.bf16 %v725_v51, %v724_v50  ;;  %v1012_v54 = vld [vmem:[%s2466_s20 + $0x44] sm:$0xff]  ;;  %v1158_v57 = vld [vmem:[%s2466_s20 + $0x4d] sm:$0xff] }
  0x3b   : > { %2339 = vmatpush3.bf16.msra.mxu0 %v2408_v31  ;;  %2382 = vmatpush3.bf16.msra.mxu1 %v2408_v31  ;;  %v756_v49 = vpack.c.bf16 %v723_v48, %v722_v47  ;;  %v1157_v56 = vld [vmem:[%s2466_s20 + $0x45] sm:$0xff]  ;;  %v1015_v60 = vld [vmem:[%s2466_s20 + $0x5c] sm:$0xff]  ;;  %v1303_v63 = vld [vmem:[%s2466_s20 + $0x4e] sm:$0xff] }
  0x3c   : > { %506 = vrot.lane.b32.xlu1 %v2551_v19, %s2419_s22  ;;  %282 = vst.msk [vmem:[#allocation2 + $0x88] sm:$0xff] %vm264_vm0, %v263_v10  ;;  %2384 = vmatprep.subr.msk.bf16.mxu0 %vm1536_vm1, %v2409_v39  ;;  %v1047_v61 = vpack.c.bf16 %v1015_v60, %v1014_v59  ;;  %v1302_v62 = vld [vmem:[%s2466_s20 + $0x46] sm:$0xff]  ;;  %v1159_v0 = vld [vmem:[%s2466_s20 + $0x55] sm:$0xff]  ;;  %v1160_v1 = vld [vmem:[%s2466_s20 + $0x5d] sm:$0xff] }
  0x3d   : > { %504 = vrot.lane.b32.xlu0 %v2557_v23, %s2419_s22  ;;  %2385 = vmatprep.subr.msk.bf16.mxu1 %vm1536_vm1, %v2409_v39  ;;  %v1336_v2 = vpack.c.bf16 %v1303_v63, %v1302_v62  ;;  %v1192_v4 = vpack.c.bf16 %v1160_v1, %v1159_v0  ;;  %v1304_v5 = vld [vmem:[%s2466_s20 + $0x56] sm:$0xff]  ;;  %v1305_v7 = vld [vmem:[%s2466_s20 + $0x5e] sm:$0xff]  ;;  %v729_v15 = vld [vmem:[%s2466_s20 + $0x6b] sm:$0xff] }
  0x3e   : > { %v1337_v8 = vpack.c.bf16 %v1305_v7, %v1304_v5  ;;  %v726_v10 = vld [vmem:[%s2466_s20 + $0x53] sm:$0xff]  ;;  %v727_v11 = vld [vmem:[%s2466_s20 + $0x5b] sm:$0xff]  ;;  %v728_v14 = vld [vmem:[%s2466_s20 + $0x63] sm:$0xff] }
  0x3f   : > { %2341 = vmatpush3.bf16.msra.mxu0 %v1538_v42  ;;  %2383 = vmatpush3.bf16.msra.mxu1 %v1538_v42  ;;  %v758_v12 = vpack.c.bf16 %v727_v11, %v726_v10  ;;  %v1016_v17 = vld [vmem:[%s2466_s20 + $0x64] sm:$0xff]  ;;  %v1017_v18 = vld [vmem:[%s2466_s20 + $0x6c] sm:$0xff]  ;;  %v1019_v24 = vld [vmem:[%s2466_s20 + $0x7c] sm:$0xff] }
  0x40   : > { %510 = vrot.lane.b32.xlu1 %v2573_v36, %s2419_s22  ;;  %v1307_v28 = vld [vmem:[%s2466_s20 + $0x6e] sm:$0xff]  ;;  %v1308_v35 = vld [vmem:[%s2466_s20 + $0x76] sm:$0xff]  ;;  %v1309_v37 = vld [vmem:[%s2466_s20 + $0x7e] sm:$0xff] }
  0x41   : > { %508 = vrot.lane.b32.xlu0 %v2581_v41, %s2419_s22  ;;  %v1339_v39 = vpack.c.bf16 %v1309_v37, %v1308_v35  ;;  %v731_v42 = vld [vmem:[%s2466_s20 + $0x7b] sm:$0xff]  ;;  %v732_v47 = vld [vmem:[%s2466_s20 + $0x83] sm:$0xff]  ;;  %v733_v48 = vld [vmem:[%s2466_s20 + $0x8b] sm:$0xff] }
  0x42   : > { %v1020_v50 = vld [vmem:[%s2466_s20 + $0x84] sm:$0xff]  ;;  %v1021_v51 = vld [vmem:[%s2466_s20 + $0x8c] sm:$0xff]  ;;  %v1023_v59 = vld [vmem:[%s2466_s20 + $0x9c] sm:$0xff] }
  0x43   : > { %v1310_v62 = vld [vmem:[%s2466_s20 + $0x86] sm:$0xff]  ;;  %v1311_v63 = vld [vmem:[%s2466_s20 + $0x8e] sm:$0xff]  ;;  %v1312_v10 = vld [vmem:[%s2466_s20 + $0x96] sm:$0xff] }
  0x44   : > { %514 = vrot.lane.b32.xlu1 %v2596_v53, %s2419_s22  ;;  %v1167_v1 = vld [vmem:[%s2466_s20 + $0x95] sm:$0xff]  ;;  %v1340_v5 = vpack.c.bf16 %v1311_v63, %v1310_v62  ;;  %v1313_v11 = vld [vmem:[%s2466_s20 + $0x9e] sm:$0xff]  ;;  %v1314_v35 = vld [vmem:[%s2466_s20 + $0xa6] sm:$0xff] }
  0x45   : > { %512 = vrot.lane.b32.xlu0 %v2604_v58, %s2419_s22  ;;  %v1315_v37 = vld [vmem:[%s2466_s20 + $0xae] sm:$0xff] }
  0x48   : > { %518 = vrot.lane.b32.xlu1 %v2619_v6, %s2419_s22 }
  0x49   : > { %516 = vrot.lane.b32.xlu0 %v2625_v9, %s2419_s22 }
  0x4c   : > { %645 = vrot.lane.b32.xlu1 %v2532_v3, %s2420_s23  ;;  %v755_v3 = vpack.c.bf16 %v721_v21, %v720_v20  ;;  %v1161_v20 = vld [vmem:[%s2466_s20 + $0x65] sm:$0xff]  ;;  %v1162_v21 = vld [vmem:[%s2466_s20 + $0x6d] sm:$0xff] }
  0x4d   : > { %520 = vrot.lane.b32.xlu0 %v2635_v13, %s2419_s22 }
  0x50   : > { %790 = vrot.lane.b32.xlu1 %v754_v16, %s2421_s24  ;;  %v759_v16 = vpack.c.bf16 %v729_v15, %v728_v14  ;;  %v1341_v14 = vpack.c.bf16 %v1313_v11, %v1312_v10  ;;  %v734_v15 = vld [vmem:[%s2466_s20 + $0x93] sm:$0xff] }
  0x51   : > { %647 = vrot.lane.b32.xlu0 %v2557_v23, %s2420_s23  ;;  %v1010_v23 = vld [vmem:[%s2466_s20 + $0x34] sm:$0xff] }
  0x52   : > { %v1045_v33 = vpack.c.bf16 %v1011_v30, %v1010_v23  ;;  %v1163_v23 = vld [vmem:[%s2466_s20 + $0x75] sm:$0xff]  ;;  %v1164_v30 = vld [vmem:[%s2466_s20 + $0x7d] sm:$0xff] }
  0x54   : > { %935 = vrot.lane.b32.xlu1 %v899_v22, %s2422_s27 }
  0x55   : > { %792 = vrot.lane.b32.xlu0 %v755_v3, %s2421_s24  ;;  %v1018_v3 = vld [vmem:[%s2466_s20 + $0x74] sm:$0xff] }
  0x56   : > { %v1049_v26 = vpack.c.bf16 %v1019_v24, %v1018_v3 }
  0x58   : > { %1080 = vrot.lane.b32.xlu1 %v1044_v27, %s2423_s30 }
  0x59   : > { %937 = vrot.lane.b32.xlu0 %v1044_v27, %s2422_s27  ;;  %v1306_v27 = vld [vmem:[%s2466_s20 + $0x66] sm:$0xff] }
  0x5c   : > { %1225 = vrot.lane.b32.xlu1 %v1189_v32, %s2424_s7  ;;  %v1338_v32 = vpack.c.bf16 %v1307_v28, %v1306_v27  ;;  %v2426_v28 = vmov 0  }
  0x5d   : > { %1082 = vrot.lane.b32.xlu0 %v1045_v33, %s2423_s30  ;;  %2406 = vset.pattern.permute.xlu1 %v2426_v28 }
  0x5e   : > { %2405 = vset.pattern.permute.xlu0 %v2426_v28  ;;  %v454_v28 = vld [vmem:[%s2466_s20 + $0xd2] sm:$0xff] }
  0x60   : > { %1370 = vrot.lane.b32.xlu1 %v1334_v40, %s2425_s8  ;;  %v730_v40 = vld [vmem:[%s2466_s20 + $0x73] sm:$0xff] }
  0x61   : > { %1227 = vrot.lane.b32.xlu0 %v1190_v43, %s2424_s7  ;;  %v760_v45 = vpack.c.bf16 %v731_v42, %v730_v40  ;;  %v1172_v40 = vld [vmem:[%s2466_s20 + $0xbd] sm:$0xff] }
  0x64   : > { %649 = vrot.lane.b32.xlu1 %v2551_v19, %s2420_s23  ;;  %v1046_v19 = vpack.c.bf16 %v1013_v55, %v1012_v54  ;;  %v1050_v55 = vpack.c.bf16 %v1021_v51, %v1020_v50 }
  0x65   : > { %1372 = vrot.lane.b32.xlu0 %v1335_v46, %s2425_s8 }
  0x68   : > { %794 = vrot.lane.b32.xlu1 %v756_v49, %s2421_s24 }
  0x69   : > { %651 = vrot.lane.b32.xlu0 %v2581_v41, %s2420_s23  ;;  %v1191_v41 = vpack.c.bf16 %v1158_v57, %v1157_v56  ;;  %v1022_v57 = vld [vmem:[%s2466_s20 + $0x94] sm:$0xff] }
  0x6c   : > { %939 = vrot.lane.b32.xlu1 %v1045_v33, %s2422_s27  ;;  %v1194_v33 = vpack.c.bf16 %v1164_v30, %v1163_v23  ;;  %v1026_v30 = vld [vmem:[%s2466_s20 + $0xb4] sm:$0xff] }
  0x6d   : > { %796 = vrot.lane.b32.xlu0 %v757_v52, %s2421_s24 }
  0x70   : > { %1084 = vrot.lane.b32.xlu1 %v1046_v19, %s2423_s30 }
  0x71   : > { %941 = vrot.lane.b32.xlu0 %v1046_v19, %s2422_s27  ;;  %v1165_v19 = vld [vmem:[%s2466_s20 + $0x85] sm:$0xff] }
  0x74   : > { %1229 = vrot.lane.b32.xlu1 %v1191_v41, %s2424_s7 }
  0x75   : > { %1086 = vrot.lane.b32.xlu0 %v1047_v61, %s2423_s30 }
  0x78   : > { %1374 = vrot.lane.b32.xlu1 %v1336_v2, %s2425_s8  ;;  %v1168_v2 = vld [vmem:[%s2466_s20 + $0x9d] sm:$0xff] }
  0x79   : > { %1231 = vrot.lane.b32.xlu0 %v1192_v4, %s2424_s7  ;;  %v1196_v7 = vpack.c.bf16 %v1168_v2, %v1167_v1  ;;  %v886_v1 = vld [vmem:[%s2466_s20 + $0xcc] sm:$0xff] }
  0x7c   : > { %653 = vrot.lane.b32.xlu1 %v2573_v36, %s2420_s23  ;;  %v1048_v36 = vpack.c.bf16 %v1017_v18, %v1016_v17 }
  0x7d   : > { %1376 = vrot.lane.b32.xlu0 %v1337_v8, %s2425_s8 }
  0x80   : > { %798 = vrot.lane.b32.xlu1 %v758_v12, %s2421_s24 }
  0x81   : > { %655 = vrot.lane.b32.xlu0 %v2604_v58, %s2420_s23  ;;  %v1193_v58 = vpack.c.bf16 %v1162_v21, %v1161_v20  ;;  %v736_v21 = vld [vmem:[%s2466_s20 + $0xa3] sm:$0xff] }
  0x84   : > { %943 = vrot.lane.b32.xlu1 %v1047_v61, %s2422_s27  ;;  %v1051_v61 = vpack.c.bf16 %v1023_v59, %v1022_v57  ;;  %v741_v57 = vld [vmem:[%s2466_s20 + $0xcb] sm:$0xff] }
  0x85   : > { %800 = vrot.lane.b32.xlu0 %v759_v16, %s2421_s24  ;;  %v735_v16 = vld [vmem:[%s2466_s20 + $0x9b] sm:$0xff] }
  0x86   : > { %v360_v22 = vpop.permute.xlu1 %359 }
  0x87   : > { %v356_v25 = vpop.permute.xlu0 %355  ;;  %412 = vst.msk [vmem:[#allocation2 + $0x10] sm:$0xff] %vm409_vm2, %v360_v22  ;;  %v737_v22 = vld [vmem:[%s2466_s20 + $0xab] sm:$0xff] }
  0x88   : > { %410 = vst.msk [vmem:[#allocation2] sm:$0xff] %vm409_vm2, %v356_v25  ;;  %1088 = vrot.lane.b32.xlu1 %v1048_v36, %s2423_s30  ;;  %v763_v24 = vpack.c.bf16 %v737_v22, %v736_v21  ;;  %v1025_v25 = vld [vmem:[%s2466_s20 + $0xac] sm:$0xff]  ;;  %v1320_v22 = vld [vmem:[%s2466_s20 + $0xd6] sm:$0xff] }
  0x89   : > { %945 = vrot.lane.b32.xlu0 %v1048_v36, %s2422_s27  ;;  %v762_v36 = vpack.c.bf16 %v735_v16, %v734_v15  ;;  %v1176_v15 = vld [vmem:[%s2466_s20 + $0xdd] sm:$0xff] }
  0x8a   : > { %v362_v29 = vpop.permute.xlu1 %361 }
  0x8b   : > { %v358_v31 = vpop.permute.xlu0 %357  ;;  %413 = vst.msk [vmem:[#allocation2 + $0x18] sm:$0xff] %vm409_vm2, %v362_v29  ;;  %v1170_v29 = vld [vmem:[%s2466_s20 + $0xad] sm:$0xff] }
  0x8c   : > { %411 = vst.msk [vmem:[#allocation2 + $0x8] sm:$0xff] %vm409_vm2, %v358_v31  ;;  %1233 = vrot.lane.b32.xlu1 %v1193_v58, %s2424_s7  ;;  %v1027_v31 = vld [vmem:[%s2466_s20 + $0xbc] sm:$0xff] }
  0x8d   : > { %1090 = vrot.lane.b32.xlu0 %v1049_v26, %s2423_s30 }
  0x8e   : > { %v366_v34 = vpop.permute.xlu1 %365 }
  0x8f   : > { %v364_v38 = vpop.permute.xlu0 %363  ;;  %415 = vst.msk [vmem:[#allocation2 + $0x28] sm:$0xff] %vm409_vm2, %v366_v34  ;;  %v2815_v34 = vpack.c.bf16 %v1027_v31, %v1026_v30 }
  0x90   : > { %414 = vst.msk [vmem:[#allocation2 + $0x20] sm:$0xff] %vm409_vm2, %v364_v38  ;;  %1378 = vrot.lane.b32.xlu1 %v1338_v32, %s2425_s8 }
  0x91   : > { %1235 = vrot.lane.b32.xlu0 %v1194_v33, %s2424_s7 }
  0x92   : > { %v370_v43 = vpop.permute.xlu1 %369 }
  0x93   : > { %v368_v44 = vpop.permute.xlu0 %367  ;;  %417 = vst.msk [vmem:[#allocation2 + $0x38] sm:$0xff] %vm409_vm2, %v370_v43  ;;  %v1342_v43 = vpack.c.bf16 %v1315_v37, %v1314_v35 }
  0x94   : > { %416 = vst.msk [vmem:[#allocation2 + $0x30] sm:$0xff] %vm409_vm2, %v368_v44  ;;  %657 = vrot.lane.b32.xlu1 %v2596_v53, %s2420_s23  ;;  %v761_v53 = vpack.c.bf16 %v733_v48, %v732_v47  ;;  %v1316_v48 = vld [vmem:[%s2466_s20 + $0xb6] sm:$0xff] }
  0x95   : > { %1380 = vrot.lane.b32.xlu0 %v1339_v39, %s2425_s8  ;;  %v1171_v39 = vld [vmem:[%s2466_s20 + $0xb5] sm:$0xff] }
  0x96   : > { %v374_v46 = vpop.permute.xlu1 %373  ;;  %v1198_v44 = vpack.c.bf16 %v1172_v40, %v1171_v39  ;;  %v744_v39 = vld [vmem:[%s2466_s20 + $0xe3] sm:$0xff]  ;;  %v745_v40 = vld [vmem:[%s2466_s20 + $0xeb] sm:$0xff] }
  0x97   : > { %v372_v49 = vpop.permute.xlu0 %371  ;;  %419 = vst.msk [vmem:[#allocation2 + $0x48] sm:$0xff] %vm409_vm2, %v374_v46  ;;  %v451_v46 = vld [vmem:[%s2466_s20 + $0xba] sm:$0xff] }
  0x98   : > { %418 = vst.msk [vmem:[#allocation2 + $0x40] sm:$0xff] %vm409_vm2, %v372_v49  ;;  %802 = vrot.lane.b32.xlu1 %v760_v45, %s2421_s24  ;;  %v450_v45 = vld [vmem:[%s2466_s20 + $0xb2] sm:$0xff]  ;;  %v1317_v49 = vld [vmem:[%s2466_s20 + $0xbe] sm:$0xff] }
  0x99   : > { %659 = vrot.lane.b32.xlu0 %v2625_v9, %s2420_s23  ;;  %v1166_v9 = vld [vmem:[%s2466_s20 + $0x8d] sm:$0xff]  ;;  %v475_v50 = vpack.c.bf16 %v451_v46, %v450_v45  ;;  %v1343_v51 = vpack.c.bf16 %v1317_v49, %v1316_v48  ;;  %v767_v46 = vpack.c.bf16 %v745_v40, %v744_v39  ;;  %v889_v48 = vld [vmem:[%s2466_s20 + $0xe4] sm:$0xff]  ;;  %v1183_v39 = vld [vmem:[%s2466_s20 + $0x115] sm:$0xff] }
  0x9a   : > { %v378_v52 = vpop.permute.xlu1 %377  ;;  %v1195_v41 = vpack.c.bf16 %v1166_v9, %v1165_v19  ;;  %v890_v49 = vld [vmem:[%s2466_s20 + $0xec] sm:$0xff]  ;;  %v1184_v40 = vld [vmem:[%s2466_s20 + $0x11d] sm:$0xff] }
  0x9b   : > { %v376_v54 = vpop.permute.xlu0 %375  ;;  %421 = vst.msk [vmem:[#allocation2 + $0x58] sm:$0xff] %vm409_vm2, %v378_v52  ;;  %v595_v52 = vld [vmem:[%s2466_s20 + $0xc2] sm:$0xff] }
  0x9c   : > { %420 = vst.msk [vmem:[#allocation2 + $0x50] sm:$0xff] %vm409_vm2, %v376_v54  ;;  %947 = vrot.lane.b32.xlu1 %v1049_v26, %s2422_s27  ;;  %v596_v54 = vld [vmem:[%s2466_s20 + $0xca] sm:$0xff] }
  0x9d   : > { %804 = vrot.lane.b32.xlu0 %v761_v53, %s2421_s24  ;;  %v2839_v9 = vpack.c.bf16 %v596_v54, %v595_v52  ;;  %v1034_v52 = vld [vmem:[%s2466_s20 + $0xf4] sm:$0xff]  ;;  %v1035_v54 = vld [vmem:[%s2466_s20 + $0xfc] sm:$0xff] }
  0x9e   : > { %v382_v56 = vpop.permute.xlu1 %381 }
  0x9f   : > { %v380_v60 = vpop.permute.xlu0 %379  ;;  %423 = vst.msk [vmem:[#allocation2 + $0x68] sm:$0xff] %vm409_vm2, %v382_v56  ;;  %v740_v56 = vld [vmem:[%s2466_s20 + $0xc3] sm:$0xff] }
  0xa0   : > { %422 = vst.msk [vmem:[#allocation2 + $0x60] sm:$0xff] %vm409_vm2, %v380_v60  ;;  %1092 = vrot.lane.b32.xlu1 %v1050_v55, %s2423_s30  ;;  %v738_v60 = vld [vmem:[%s2466_s20 + $0xb3] sm:$0xff]  ;;  %v765_v62 = vpack.c.bf16 %v741_v57, %v740_v56  ;;  %v1180_v57 = vld [vmem:[%s2466_s20 + $0xfd] sm:$0xff] }
  0xa1   : > { %949 = vrot.lane.b32.xlu0 %v1050_v55, %s2422_s27  ;;  %v1179_v56 = vld [vmem:[%s2466_s20 + $0xf5] sm:$0xff] }
  0xa2   : > { %v386_v0 = vpop.permute.xlu1 %385 }
  0xa3   : > { %v384_v4 = vpop.permute.xlu0 %383  ;;  %425 = vst.msk [vmem:[#allocation2 + $0x78] sm:$0xff] %vm409_vm2, %v386_v0  ;;  %v885_v0 = vld [vmem:[%s2466_s20 + $0xc4] sm:$0xff] }
  0xa4   : > { %424 = vst.msk [vmem:[#allocation2 + $0x70] sm:$0xff] %vm409_vm2, %v384_v4  ;;  %1237 = vrot.lane.b32.xlu1 %v1195_v41, %s2424_s7  ;;  %v739_v41 = vld [vmem:[%s2466_s20 + $0xbb] sm:$0xff] }
  0xa5   : > { %1094 = vrot.lane.b32.xlu0 %v1051_v61, %s2423_s30  ;;  %v764_v63 = vpack.c.bf16 %v739_v41, %v738_v60  ;;  %v1177_v60 = vld [vmem:[%s2466_s20 + $0xe5] sm:$0xff]  ;;  %v1178_v41 = vld [vmem:[%s2466_s20 + $0xed] sm:$0xff] }
  0xa6   : > { %v390_v8 = vpop.permute.xlu1 %389 }
  0xa7   : > { %v388_v12 = vpop.permute.xlu0 %387  ;;  %427 = vst.msk [vmem:[#allocation2 + $0x88] sm:$0xff] %vm409_vm2, %v390_v8  ;;  %v1031_v8 = vld [vmem:[%s2466_s20 + $0xdc] sm:$0xff] }
  0xa8   : > { %426 = vst.msk [vmem:[#allocation2 + $0x80] sm:$0xff] %vm409_vm2, %v388_v12  ;;  %1382 = vrot.lane.b32.xlu1 %v1340_v5, %s2425_s8  ;;  %v910_v5 = vpack.c.bf16 %v886_v1, %v885_v0  ;;  %v1324_v0 = vld [vmem:[%s2466_s20 + $0xf6] sm:$0xff]  ;;  %v1325_v1 = vld [vmem:[%s2466_s20 + $0xfe] sm:$0xff] }
  0xa9   : > { %1239 = vrot.lane.b32.xlu0 %v1196_v7, %s2424_s7  ;;  %v1030_v7 = vld [vmem:[%s2466_s20 + $0xd4] sm:$0xff] }
  0xaa   : > { %v503_v17 = vpop.permute.xlu1 %502  ;;  %v2862_v12 = vpack.c.bf16 %v1031_v8, %v1030_v7  ;;  %v1323_v7 = vld [vmem:[%s2466_s20 + $0xee] sm:$0xff] }
  0xab   : > { %v501_v18 = vpop.permute.xlu0 %500  ;;  %556 = vst.msk [vmem:[#allocation2 + $0x8] sm:$0xff] %vm554_vm3, %v503_v17  ;;  %v1173_v17 = vld [vmem:[%s2466_s20 + $0xc5] sm:$0xff] }
  0xac   : > { %555 = vst.msk [vmem:[#allocation2] sm:$0xff] %vm554_vm3, %v501_v18  ;;  %661 = vrot.lane.b32.xlu1 %v2619_v6, %s2420_s23  ;;  %v1024_v6 = vld [vmem:[%s2466_s20 + $0xa4] sm:$0xff]  ;;  %v1174_v18 = vld [vmem:[%s2466_s20 + $0xcd] sm:$0xff] }
  0xad   : > { %1384 = vrot.lane.b32.xlu0 %v1341_v14, %s2425_s8  ;;  %v1052_v27 = vpack.c.bf16 %v1025_v25, %v1024_v6  ;;  %v1175_v14 = vld [vmem:[%s2466_s20 + $0xd5] sm:$0xff]  ;;  %v1199_v21 = vpack.c.bf16 %v1174_v18, %v1173_v17  ;;  %v1318_v6 = vld [vmem:[%s2466_s20 + $0xc6] sm:$0xff] }
  0xae   : > { %v507_v20 = vpop.permute.xlu1 %506  ;;  %v1319_v25 = vld [vmem:[%s2466_s20 + $0xce] sm:$0xff] }
  0xaf   : > { %v505_v3 = vpop.permute.xlu0 %504  ;;  %558 = vst.msk [vmem:[#allocation2 + $0x18] sm:$0xff] %vm554_vm3, %v507_v20  ;;  %v1200_v20 = vpack.c.bf16 %v1176_v15, %v1175_v14  ;;  %v459_v14 = vld [vmem:[%s2466_s20 + $0xfa] sm:$0xff] }
  0xb0   : > { %557 = vst.msk [vmem:[#allocation2 + $0x10] sm:$0xff] %vm554_vm3, %v505_v3  ;;  %806 = vrot.lane.b32.xlu1 %v762_v36, %s2421_s24  ;;  %v1321_v3 = vld [vmem:[%s2466_s20 + $0xde] sm:$0xff] }
  0xb1   : > { %663 = vrot.lane.b32.xlu0 %v2635_v13, %s2420_s23  ;;  %v1169_v13 = vld [vmem:[%s2466_s20 + $0xa5] sm:$0xff] }
  0xb2   : > { %v511_v58 = vpop.permute.xlu1 %510  ;;  %v1197_v33 = vpack.c.bf16 %v1170_v29, %v1169_v13  ;;  %v455_v13 = vld [vmem:[%s2466_s20 + $0xda] sm:$0xff] }
  0xb3   : > { %v509_v26 = vpop.permute.xlu0 %508  ;;  %560 = vst.msk [vmem:[#allocation2 + $0x28] sm:$0xff] %vm554_vm3, %v511_v58  ;;  %v477_v31 = vpack.c.bf16 %v455_v13, %v454_v28 }
  0xb4   : > { %559 = vst.msk [vmem:[#allocation2 + $0x20] sm:$0xff] %vm554_vm3, %v509_v26  ;;  %951 = vrot.lane.b32.xlu1 %v1051_v61, %s2422_s27  ;;  %v1345_v26 = vpack.c.bf16 %v1321_v3, %v1320_v22 }
  0xb5   : > { %808 = vrot.lane.b32.xlu0 %v763_v24, %s2421_s24 }
  0xb6   : > { %v515_v23 = vpop.permute.xlu1 %514 }
  0xb7   : > { %v513_v32 = vpop.permute.xlu0 %512  ;;  %562 = vst.msk [vmem:[#allocation2 + $0x38] sm:$0xff] %vm554_vm3, %v515_v23 }
  0xb8   : > { %561 = vst.msk [vmem:[#allocation2 + $0x30] sm:$0xff] %vm554_vm3, %v513_v32  ;;  %1096 = vrot.lane.b32.xlu1 %v1052_v27, %s2423_s30  ;;  %v599_v32 = vld [vmem:[%s2466_s20 + $0xe2] sm:$0xff] }
  0xb9   : > { %953 = vrot.lane.b32.xlu0 %v1052_v27, %s2422_s27  ;;  %v1344_v27 = vpack.c.bf16 %v1319_v25, %v1318_v6  ;;  %v749_v6 = vld [vmem:[%s2466_s20 + $0x10b] sm:$0xff] }
  0xba   : > { %v519_v38 = vpop.permute.xlu1 %518 }
  0xbb   : > { %v517_v42 = vpop.permute.xlu0 %516  ;;  %564 = vst.msk [vmem:[#allocation2 + $0x48] sm:$0xff] %vm554_vm3, %v519_v38 }
  0xbc   : > { %563 = vst.msk [vmem:[#allocation2 + $0x40] sm:$0xff] %vm554_vm3, %v517_v42  ;;  %1241 = vrot.lane.b32.xlu1 %v1197_v33, %s2424_s7  ;;  %v600_v33 = vld [vmem:[%s2466_s20 + $0xea] sm:$0xff] }
  0xbd   : > { %1098 = vrot.lane.b32.xlu0 %v2815_v34, %s2423_s30  ;;  %v2896_v38 = vpack.c.bf16 %v600_v33, %v599_v32  ;;  %v1038_v33 = vld [vmem:[%s2466_s20 + $0x114] sm:$0xff] }
  0xbe   : > { %v646_v47 = vpop.permute.xlu1 %645 }
  0xbf   : > { %v521_v53 = vpop.permute.xlu0 %520  ;;  %700 = vst.msk [vmem:[#allocation2] sm:$0xff] %vm699_vm4, %v646_v47 }
  0xc0   : > { %565 = vst.msk [vmem:[#allocation2 + $0x50] sm:$0xff] %vm554_vm3, %v521_v53  ;;  %1386 = vrot.lane.b32.xlu1 %v1342_v43, %s2425_s8  ;;  %v742_v43 = vld [vmem:[%s2466_s20 + $0xd3] sm:$0xff] }
  0xc1   : > { %1243 = vrot.lane.b32.xlu0 %v1198_v44, %s2424_s7  ;;  %v743_v44 = vld [vmem:[%s2466_s20 + $0xdb] sm:$0xff] }
  0xc2   : > { %v791_v55 = vpop.permute.xlu1 %790  ;;  %v766_v47 = vpack.c.bf16 %v743_v44, %v742_v43  ;;  %v1181_v44 = vld [vmem:[%s2466_s20 + $0x105] sm:$0xff] }
  0xc3   : > { %v648_v19 = vpop.permute.xlu0 %647  ;;  %845 = vst.msk [vmem:[#allocation2] sm:$0xff] %vm844_vm5, %v791_v55 }
  0xc4   : > { %701 = vst.msk [vmem:[#allocation2 + $0x8] sm:$0xff] %vm699_vm4, %v648_v19  ;;  %522 = vrot.lane.b32.xlu1 %v475_v50, %s2419_s22 }
  0xc5   : > { %1388 = vrot.lane.b32.xlu0 %v1343_v51, %s2425_s8  ;;  %v912_v51 = vpack.c.bf16 %v890_v49, %v889_v48  ;;  %v1328_v49 = vld [vmem:[%s2466_s20 + $0x116] sm:$0xff] }
  0xc6   : > { %v936_v59 = vpop.permute.xlu1 %935 }
  0xc7   : > { %v793_v61 = vpop.permute.xlu0 %792  ;;  %990 = vst.msk [vmem:[#allocation2] sm:$0xff] %vm989_vm6, %v936_v59 }
  0xc8   : > { %846 = vst.msk [vmem:[#allocation2 + $0x8] sm:$0xff] %vm844_vm5, %v793_v61  ;;  %667 = vrot.lane.b32.xlu1 %v2839_v9, %s2420_s23 }
  0xc9   : > { %665 = vrot.lane.b32.xlu0 %v475_v50, %s2420_s23 }
  0xca   : > { %v1081_v2 = vpop.permute.xlu1 %1080 }
  0xcb   : > { %v938_v4 = vpop.permute.xlu0 %937  ;;  %1135 = vst.msk [vmem:[#allocation2] sm:$0xff] %vm1134_vm7, %v1081_v2 }
  0xcc   : > { %991 = vst.msk [vmem:[#allocation2 + $0x8] sm:$0xff] %vm989_vm6, %v938_v4  ;;  %812 = vrot.lane.b32.xlu1 %v765_v62, %s2421_s24  ;;  %v1202_v62 = vpack.c.bf16 %v1180_v57, %v1179_v56  ;;  %v462_v56 = vld [vmem:[%s2466_s20 + $0x112] sm:$0xff]  ;;  %v463_v57 = vld [vmem:[%s2466_s20 + $0x11a] sm:$0xff] }
  0xcd   : > { %810 = vrot.lane.b32.xlu0 %v764_v63, %s2421_s24  ;;  %v1201_v63 = vpack.c.bf16 %v1178_v41, %v1177_v60  ;;  %v481_v41 = vpack.c.bf16 %v463_v57, %v462_v56 }
  0xce   : > { %v1226_v10 = vpop.permute.xlu1 %1225 }
  0xcf   : > { %v1083_v11 = vpop.permute.xlu0 %1082  ;;  %1280 = vst.msk [vmem:[#allocation2] sm:$0xff] %vm1279_vm8, %v1226_v10  ;;  %v1347_v10 = vpack.c.bf16 %v1325_v1, %v1324_v0 }
  0xd0   : > { %1136 = vst.msk [vmem:[#allocation2 + $0x8] sm:$0xff] %vm1134_vm7, %v1083_v11  ;;  %957 = vrot.lane.b32.xlu1 %v910_v5, %s2422_s27 }
  0xd1   : > { %955 = vrot.lane.b32.xlu0 %v2815_v34, %s2422_s27 }
  0xd2   : > { %v1371_v16 = vpop.permute.xlu1 %1370 }
  0xd3   : > { %v1228_v36 = vpop.permute.xlu0 %1227  ;;  %1425 = vst.msk [vmem:[#allocation2] sm:$0xff] %vm1424_vm9, %v1371_v16 }
  0xd4   : > { %1281 = vst.msk [vmem:[#allocation2 + $0x8] sm:$0xff] %vm1279_vm8, %v1228_v36  ;;  %1102 = vrot.lane.b32.xlu1 %v2862_v12, %s2423_s30  ;;  %v603_v36 = vld [vmem:[%s2466_s20 + $0x102] sm:$0xff] }
  0xd5   : > { %1100 = vrot.lane.b32.xlu0 %v910_v5, %s2423_s30  ;;  %v1322_v5 = vld [vmem:[%s2466_s20 + $0xe6] sm:$0xff] }
  0xd6   : > { %v650_v24 = vpop.permute.xlu1 %649  ;;  %v1346_v11 = vpack.c.bf16 %v1323_v7, %v1322_v5  ;;  %v750_v7 = vld [vmem:[%s2466_s20 + $0x113] sm:$0xff] }
  0xd7   : > { %v1373_v58 = vpop.permute.xlu0 %1372  ;;  %702 = vst.msk [vmem:[#allocation2 + $0x10] sm:$0xff] %vm699_vm4, %v650_v24  ;;  %v748_v24 = vld [vmem:[%s2466_s20 + $0x103] sm:$0xff] }
  0xd8   : > { %1426 = vst.msk [vmem:[#allocation2 + $0x8] sm:$0xff] %vm1424_vm9, %v1373_v58  ;;  %1247 = vrot.lane.b32.xlu1 %v1200_v20, %s2424_s7  ;;  %v604_v20 = vld [vmem:[%s2466_s20 + $0x10a] sm:$0xff]  ;;  %v746_v58 = vld [vmem:[%s2466_s20 + $0xf3] sm:$0xff]  ;;  %v769_v28 = vpack.c.bf16 %v749_v6, %v748_v24 }
  0xd9   : > { %1245 = vrot.lane.b32.xlu0 %v1199_v21, %s2424_s7  ;;  %v2954_v3 = vpack.c.bf16 %v604_v20, %v603_v36  ;;  %v1042_v36 = vld [vmem:[%s2466_s20 + $0x134] sm:$0xff]  ;;  %v1043_v20 = vld [vmem:[%s2466_s20 + $0x13c] sm:$0xff] }
  0xda   : > { %v795_v29 = vpop.permute.xlu1 %794  ;;  %v1443_v23 = vld [vmem:[#allocation2] sm:$0xff]  ;;  %v1061_v24 = vpack.c.bf16 %v1043_v20, %v1042_v36  ;;  %v1187_v6 = vld [vmem:[%s2466_s20 + $0x135] sm:$0xff] }
  0xdb   : > { %v652_v30 = vpop.permute.xlu0 %651  ;;  %847 = vst.msk [vmem:[#allocation2 + $0x10] sm:$0xff] %vm844_vm5, %v795_v29  ;;  %2342 = vmatprep.mubr.msk.bf16.mxu0 %vm1481_vm10, %v1443_v23  ;;  %v893_v29 = vld [vmem:[%s2466_s20 + $0x104] sm:$0xff]  ;;  %v894_v23 = vld [vmem:[%s2466_s20 + $0x10c] sm:$0xff] }
  0xdc   : > { %703 = vst.msk [vmem:[#allocation2 + $0x18] sm:$0xff] %vm699_vm4, %v652_v30  ;;  %1392 = vrot.lane.b32.xlu1 %v1345_v26, %s2425_s8  ;;  %v747_v26 = vld [vmem:[%s2466_s20 + $0xfb] sm:$0xff]  ;;  %v914_v32 = vpack.c.bf16 %v894_v23, %v893_v29 }
  0xdd   : > { %1390 = vrot.lane.b32.xlu0 %v1344_v27, %s2425_s8  ;;  %v768_v13 = vpack.c.bf16 %v747_v26, %v746_v58  ;;  %v1185_v26 = vld [vmem:[%s2466_s20 + $0x125] sm:$0xff] }
  0xde   : > { %v940_v34 = vpop.permute.xlu1 %939 }
  0xdf   : > { %v797_v35 = vpop.permute.xlu0 %796  ;;  %992 = vst.msk [vmem:[#allocation2 + $0x10] sm:$0xff] %vm989_vm6, %v940_v34  ;;  %v1444_v37 = vld [vmem:[#allocation2 + $0x8] sm:$0xff]  ;;  %v1039_v34 = vld [vmem:[%s2466_s20 + $0x11c] sm:$0xff] }
  0xe0   : > { %848 = vst.msk [vmem:[#allocation2 + $0x18] sm:$0xff] %vm844_vm5, %v797_v35  ;;  %2343 = vmatmul.mubr.msk.bf16.vlgmr.msra.gmra.mrb[0].mxu0 %vm1481_vm10, %v1444_v37  ;;  %526 = vrot.lane.b32.xlu1 %v477_v31, %s2419_s22 }
  0xe1   : > { %524 = vrot.lane.b32.xlu0 %v2839_v9, %s2419_s22  ;;  %v2920_v9 = vpack.c.bf16 %v1035_v54, %v1034_v52  ;;  %v1327_v52 = vld [vmem:[%s2466_s20 + $0x10e] sm:$0xff] }
  0xe2   : > { %v1085_v42 = vpop.permute.xlu1 %1084 }
  0xe3   : > { %v942_v45 = vpop.permute.xlu0 %941  ;;  %1137 = vst.msk [vmem:[#allocation2 + $0x10] sm:$0xff] %vm1134_vm7, %v1085_v42 }
  0xe4   : > { %993 = vst.msk [vmem:[#allocation2 + $0x18] sm:$0xff] %vm989_vm6, %v942_v45  ;;  %671 = vrot.lane.b32.xlu1 %v2896_v38, %s2420_s23  ;;  %v1182_v45 = vld [vmem:[%s2466_s20 + $0x10d] sm:$0xff] }
  0xe5   : > { %669 = vrot.lane.b32.xlu0 %v477_v31, %s2420_s23  ;;  %v1203_v48 = vpack.c.bf16 %v1182_v45, %v1181_v44  ;;  %v1753_v44 = vld [vmem:[%s3392_s2] sm:$0xff] }
  0xe6   : > { %v1230_v53 = vpop.permute.xlu1 %1229 }
  0xe7   : > { %v1087_v50 = vpop.permute.xlu0 %1086  ;;  %1282 = vst.msk [vmem:[#allocation2 + $0x10] sm:$0xff] %vm1279_vm8, %v1230_v53  ;;  %v1329_v53 = vld [vmem:[%s2466_s20 + $0x11e] sm:$0xff] }
  0xe8   : > { %1138 = vst.msk [vmem:[#allocation2 + $0x18] sm:$0xff] %vm1134_vm7, %v1087_v50  ;;  %816 = vrot.lane.b32.xlu1 %v767_v46, %s2421_s24 }
  0xe9   : > { %814 = vrot.lane.b32.xlu0 %v766_v47, %s2421_s24  ;;  %v1204_v47 = vpack.c.bf16 %v1184_v40, %v1183_v39 }
  0xea   : > { %v1375_v55 = vpop.permute.xlu1 %1374 }
  0xeb   : > { %v1232_v19 = vpop.permute.xlu0 %1231  ;;  %1427 = vst.msk [vmem:[#allocation2 + $0x10] sm:$0xff] %vm1424_vm9, %v1375_v55 }
  0xec   : > { %1283 = vst.msk [vmem:[#allocation2 + $0x18] sm:$0xff] %vm1279_vm8, %v1232_v19  ;;  %961 = vrot.lane.b32.xlu1 %v912_v51, %s2422_s27  ;;  %v1349_v19 = vpack.c.bf16 %v1329_v53, %v1328_v49  ;;  %v1757_v53 = vld [vmem:[%s3392_s2 + $0x20] sm:$0xff] }
  0xed   : > { %959 = vrot.lane.b32.xlu0 %v2862_v12, %s2422_s27  ;;  %v458_v12 = vld [vmem:[%s2466_s20 + $0xf2] sm:$0xff] }
  0xee   : > { %v654_v59 = vpop.permute.xlu1 %653  ;;  %v479_v18 = vpack.c.bf16 %v459_v14, %v458_v12  ;;  %v897_v14 = vld [vmem:[%s2466_s20 + $0x124] sm:$0xff] }
  0xef   : > { %v1377_v61 = vpop.permute.xlu0 %1376  ;;  %704 = vst.msk [vmem:[#allocation2 + $0x20] sm:$0xff] %vm699_vm4, %v654_v59 }
  0xf0   : > { %1428 = vst.msk [vmem:[#allocation2 + $0x18] sm:$0xff] %vm1424_vm9, %v1377_v61  ;;  %1106 = vrot.lane.b32.xlu1 %v2920_v9, %s2423_s30  ;;  %v607_v61 = vld [vmem:[%s2466_s20 + $0x122] sm:$0xff] }
  0xf1   : > { %1104 = vrot.lane.b32.xlu0 %v912_v51, %s2423_s30  ;;  %v1326_v51 = vld [vmem:[%s2466_s20 + $0x106] sm:$0xff] }
  0xf2   : > { %v799_v2 = vpop.permute.xlu1 %798  ;;  %v1445_v4 = vld [vmem:[#allocation2 + $0x10] sm:$0xff] }
  0xf3   : > { %v656_v8 = vpop.permute.xlu0 %655  ;;  %849 = vst.msk [vmem:[#allocation2 + $0x20] sm:$0xff] %vm844_vm5, %v799_v2  ;;  %2346 = vmatprep.mubr.msk.bf16.mxu0 %vm1481_vm10, %v1445_v4  ;;  %v752_v2 = vld [vmem:[%s2466_s20 + $0x123] sm:$0xff]  ;;  %v753_v4 = vld [vmem:[%s2466_s20 + $0x12b] sm:$0xff] }
  0xf4   : > { %705 = vst.msk [vmem:[#allocation2 + $0x28] sm:$0xff] %vm699_vm4, %v656_v8  ;;  %1251 = vrot.lane.b32.xlu1 %v1202_v62, %s2424_s7  ;;  %v608_v62 = vld [vmem:[%s2466_s20 + $0x12a] sm:$0xff]  ;;  %v751_v8 = vld [vmem:[%s2466_s20 + $0x11b] sm:$0xff] }
  0xf5   : > { %1249 = vrot.lane.b32.xlu0 %v1201_v63, %s2424_s7  ;;  %v626_v1 = vpack.c.bf16 %v608_v62, %v607_v61  ;;  %v770_v12 = vpack.c.bf16 %v751_v8, %v750_v7  ;;  %v1763_v62 = vld [vmem:[%s3392_s2 + $0x50] sm:$0xff] }
  0xf6   : > { %v944_v15 = vpop.permute.xlu1 %943  ;;  %v1767_v8 = vld [vmem:[%s3392_s2 + $0x70] sm:$0xff] }
  0xf7   : > { %v801_v16 = vpop.permute.xlu0 %800  ;;  %994 = vst.msk [vmem:[#allocation2 + $0x20] sm:$0xff] %vm989_vm6, %v944_v15  ;;  %v1446_v17 = vld [vmem:[#allocation2 + $0x18] sm:$0xff]  ;;  %v898_v15 = vld [vmem:[%s2466_s20 + $0x12c] sm:$0xff] }
  0xf8   : > { %850 = vst.msk [vmem:[#allocation2 + $0x28] sm:$0xff] %vm844_vm5, %v801_v16  ;;  %2347 = vmatmul.mubr.msk.bf16.gmra.mrb[4].mxu0 %vm1481_vm10, %v1446_v17  ;;  %1396 = vrot.lane.b32.xlu1 %v1347_v10, %s2425_s8 }
  0xf9   : > { %1394 = vrot.lane.b32.xlu0 %v1346_v11, %s2425_s8  ;;  %v771_v11 = vpack.c.bf16 %v753_v4, %v752_v2  ;;  %v1765_v2 = vld [vmem:[%s3392_s2 + $0x60] sm:$0xff] }
  0xfa   : > { %v1089_v21 = vpop.permute.xlu1 %1088 }
  0xfb   : > { %v946_v22 = vpop.permute.xlu0 %945  ;;  %1139 = vst.msk [vmem:[#allocation2 + $0x20] sm:$0xff] %vm1134_vm7, %v1089_v21 }
  0xfc   : > { %995 = vst.msk [vmem:[#allocation2 + $0x28] sm:$0xff] %vm989_vm6, %v946_v22  ;;  %530 = vrot.lane.b32.xlu1 %v479_v18, %s2419_s22 }
  0xfd   : > { %528 = vrot.lane.b32.xlu0 %v2896_v38, %s2419_s22  ;;  %v2978_v38 = vpack.c.bf16 %v1039_v34, %v1038_v33  ;;  %v1330_v33 = vld [vmem:[%s2466_s20 + $0x126] sm:$0xff]  ;;  %v1331_v34 = vld [vmem:[%s2466_s20 + $0x12e] sm:$0xff] }
  0xfe   : > { %v1234_v25 = vpop.permute.xlu1 %1233 }
  0xff   : > { %v1091_v27 = vpop.permute.xlu0 %1090  ;;  %1284 = vst.msk [vmem:[#allocation2 + $0x20] sm:$0xff] %vm1279_vm8, %v1234_v25  ;;  %v1188_v25 = vld [vmem:[%s2466_s20 + $0x13d] sm:$0xff] }
 0x100   : > { %1140 = vst.msk [vmem:[#allocation2 + $0x28] sm:$0xff] %vm1134_vm7, %v1091_v27  ;;  %675 = vrot.lane.b32.xlu1 %v2954_v3, %s2420_s23  ;;  %v1186_v27 = vld [vmem:[%s2466_s20 + $0x12d] sm:$0xff]  ;;  %v1206_v29 = vpack.c.bf16 %v1188_v25, %v1187_v6 }
 0x101   : > { %673 = vrot.lane.b32.xlu0 %v479_v18, %s2420_s23  ;;  %v916_v18 = vpack.c.bf16 %v898_v15, %v897_v14  ;;  %v1205_v23 = vpack.c.bf16 %v1186_v27, %v1185_v26  ;;  %v1769_v14 = vld [vmem:[%s3392_s2 + $0x80] sm:$0xff]  ;;  %v1774_v25 = vld [vmem:[%s3392_s2 + $0xa8] sm:$0xff]  ;;  %v1775_v26 = vld [vmem:[%s3392_s2 + $0xb0] sm:$0xff] }
 0x102   : > { %v1379_v30 = vpop.permute.xlu1 %1378 }
 0x103   : > { %v1236_v31 = vpop.permute.xlu0 %1235  ;;  %1429 = vst.msk [vmem:[#allocation2 + $0x20] sm:$0xff] %vm1424_vm9, %v1379_v30  ;;  %v1332_v30 = vld [vmem:[%s2466_s20 + $0x136] sm:$0xff] }
 0x104   : > { %1285 = vst.msk [vmem:[#allocation2 + $0x28] sm:$0xff] %vm1279_vm8, %v1236_v31  ;;  %820 = vrot.lane.b32.xlu1 %v769_v28, %s2421_s24  ;;  %v1333_v31 = vld [vmem:[%s2466_s20 + $0x13e] sm:$0xff] }
 0x105   : > { %818 = vrot.lane.b32.xlu0 %v768_v13, %s2421_s24 }
 0x106   : > { %v658_v35 = vpop.permute.xlu1 %657 }
 0x107   : > { %v1381_v37 = vpop.permute.xlu0 %1380  ;;  %706 = vst.msk [vmem:[#allocation2 + $0x30] sm:$0xff] %vm699_vm4, %v658_v35 }
 0x108   : > { %1430 = vst.msk [vmem:[#allocation2 + $0x28] sm:$0xff] %vm1424_vm9, %v1381_v37  ;;  %965 = vrot.lane.b32.xlu1 %v914_v32, %s2422_s27  ;;  %v1351_v37 = vpack.c.bf16 %v1333_v31, %v1332_v30  ;;  %v1778_v30 = vld [vmem:[%s3392_s2 + $0xc8] sm:$0xff] }
 0x109   : > { %963 = vrot.lane.b32.xlu0 %v2920_v9, %s2422_s27  ;;  %v1348_v9 = vpack.c.bf16 %v1327_v52, %v1326_v51  ;;  %v1758_v52 = vld [vmem:[%s3392_s2 + $0x28] sm:$0xff] }
 0x10a   : > { %v803_v42 = vpop.permute.xlu1 %802  ;;  %v1447_v43 = vld [vmem:[#allocation2 + $0x20] sm:$0xff] }
 0x10b   : > { %v660_v46 = vpop.permute.xlu0 %659  ;;  %851 = vst.msk [vmem:[#allocation2 + $0x30] sm:$0xff] %vm844_vm5, %v803_v42  ;;  %2350 = vmatprep.mubr.msk.bf16.mxu0 %vm1481_vm10, %v1447_v43  ;;  %v1754_v42 = vld [vmem:[%s3392_s2 + $0x8] sm:$0xff] }
 0x10c   : > { %707 = vst.msk [vmem:[#allocation2 + $0x38] sm:$0xff] %vm699_vm4, %v660_v46  ;;  %1110 = vrot.lane.b32.xlu1 %v2978_v38, %s2423_s30  ;;  %v1755_v46 = vld [vmem:[%s3392_s2 + $0x10] sm:$0xff] }
 0x10d   : > { %1108 = vrot.lane.b32.xlu0 %v914_v32, %s2423_s30 }
 0x10e   : > { %v948_v50 = vpop.permute.xlu1 %947 }
 0x10f   : > { %v805_v54 = vpop.permute.xlu0 %804  ;;  %996 = vst.msk [vmem:[#allocation2 + $0x30] sm:$0xff] %vm989_vm6, %v948_v50  ;;  %v1448_v55 = vld [vmem:[#allocation2 + $0x28] sm:$0xff] }
 0x110   : > { %852 = vst.msk [vmem:[#allocation2 + $0x38] sm:$0xff] %vm844_vm5, %v805_v54  ;;  %2351 = vmatmul.mubr.msk.bf16.gmra.mrb[8].mxu0 %vm1481_vm10, %v1448_v55  ;;  %1255 = vrot.lane.b32.xlu1 %v1204_v47, %s2424_s7  ;;  %v1759_v55 = vld [vmem:[%s3392_s2 + $0x30] sm:$0xff] }
 0x111   : > { %1253 = vrot.lane.b32.xlu0 %v1203_v48, %s2424_s7  ;;  %v1756_v48 = vld [vmem:[%s3392_s2 + $0x18] sm:$0xff] }
 0x112   : > { %v1093_v59 = vpop.permute.xlu1 %1092 }
 0x113   : > { %v950_v60 = vpop.permute.xlu0 %949  ;;  %1141 = vst.msk [vmem:[#allocation2 + $0x30] sm:$0xff] %vm1134_vm7, %v1093_v59  ;;  %v1761_v59 = vld [vmem:[%s3392_s2 + $0x40] sm:$0xff] }
 0x114   : > { %997 = vst.msk [vmem:[#allocation2 + $0x38] sm:$0xff] %vm989_vm6, %v950_v60  ;;  %1400 = vrot.lane.b32.xlu1 %v1349_v19, %s2425_s8 }
 0x115   : > { %1398 = vrot.lane.b32.xlu0 %v1348_v9, %s2425_s8  ;;  %v1760_v9 = vld [vmem:[%s3392_s2 + $0x38] sm:$0xff] }
 0x116   : > { %v1238_v63 = vpop.permute.xlu1 %1237 }
 0x117   : > { %v1095_v0 = vpop.permute.xlu0 %1094  ;;  %1286 = vst.msk [vmem:[#allocation2 + $0x30] sm:$0xff] %vm1279_vm8, %v1238_v63 }
 0x118   : > { %1142 = vst.msk [vmem:[#allocation2 + $0x38] sm:$0xff] %vm1134_vm7, %v1095_v0  ;;  %534 = vrot.lane.b32.xlu1 %v481_v41, %s2419_s22  ;;  %v1764_v0 = vld [vmem:[%s3392_s2 + $0x58] sm:$0xff] }
 0x119   : > { %532 = vrot.lane.b32.xlu0 %v2954_v3, %s2419_s22 }
 0x11a   : > { %v1383_v5 = vpop.permute.xlu1 %1382 }
 0x11b   : > { %v1240_v10 = vpop.permute.xlu0 %1239  ;;  %1431 = vst.msk [vmem:[#allocation2 + $0x30] sm:$0xff] %vm1424_vm9, %v1383_v5  ;;  %v1766_v5 = vld [vmem:[%s3392_s2 + $0x68] sm:$0xff] }
 0x11c   : > { %1287 = vst.msk [vmem:[#allocation2 + $0x38] sm:$0xff] %vm1279_vm8, %v1240_v10  ;;  %679 = vrot.lane.b32.xlu1 %v626_v1, %s2420_s23 }
 0x11d   : > { %677 = vrot.lane.b32.xlu0 %v481_v41, %s2420_s23  ;;  %v1762_v41 = vld [vmem:[%s3392_s2 + $0x48] sm:$0xff] }
 0x11e   : > { %v662_v16 = vpop.permute.xlu1 %661 }
 0x11f   : > { %v1385_v17 = vpop.permute.xlu0 %1384  ;;  %708 = vst.msk [vmem:[#allocation2 + $0x40] sm:$0xff] %vm699_vm4, %v662_v16  ;;  %v1770_v16 = vld [vmem:[%s3392_s2 + $0x88] sm:$0xff] }
 0x120   : > { %1432 = vst.msk [vmem:[#allocation2 + $0x38] sm:$0xff] %vm1424_vm9, %v1385_v17  ;;  %824 = vrot.lane.b32.xlu1 %v771_v11, %s2421_s24  ;;  %v1768_v11 = vld [vmem:[%s3392_s2 + $0x78] sm:$0xff] }
 0x121   : > { %822 = vrot.lane.b32.xlu0 %v770_v12, %s2421_s24 }
 0x122   : > { %v807_v21 = vpop.permute.xlu1 %806  ;;  %v1449_v22 = vld [vmem:[#allocation2 + $0x30] sm:$0xff] }
 0x123   : > { %v664_v3 = vpop.permute.xlu0 %663  ;;  %853 = vst.msk [vmem:[#allocation2 + $0x40] sm:$0xff] %vm844_vm5, %v807_v21  ;;  %2354 = vmatprep.mubr.msk.bf16.mxu0 %vm1481_vm10, %v1449_v22  ;;  %v1772_v21 = vld [vmem:[%s3392_s2 + $0x98] sm:$0xff] }
 0x124   : > { %709 = vst.msk [vmem:[#allocation2 + $0x48] sm:$0xff] %vm699_vm4, %v664_v3  ;;  %969 = vrot.lane.b32.xlu1 %v916_v18, %s2422_s27 }
 0x125   : > { %967 = vrot.lane.b32.xlu0 %v2978_v38, %s2422_s27  ;;  %v1350_v38 = vpack.c.bf16 %v1331_v34, %v1330_v33  ;;  %v1780_v34 = vld [vmem:[%s3392_s2 + $0xd8] sm:$0xff] }
 0x126   : > { %v952_v58 = vpop.permute.xlu1 %951 }
 0x127   : > { %v809_v28 = vpop.permute.xlu0 %808  ;;  %998 = vst.msk [vmem:[#allocation2 + $0x40] sm:$0xff] %vm989_vm6, %v952_v58  ;;  %v1450_v13 = vld [vmem:[#allocation2 + $0x38] sm:$0xff] }
 0x128   : > { %854 = vst.msk [vmem:[#allocation2 + $0x48] sm:$0xff] %vm844_vm5, %v809_v28  ;;  %2355 = vmatmul.mubr.msk.bf16.gmra.mrb[12].mxu0 %vm1481_vm10, %v1450_v13  ;;  %1114 = vrot.lane.b32.xlu1 %v1061_v24, %s2423_s30  ;;  %v1773_v24 = vld [vmem:[%s3392_s2 + $0xa0] sm:$0xff]  ;;  %v1776_v28 = vld [vmem:[%s3392_s2 + $0xb8] sm:$0xff] }
 0x129   : > { %1112 = vrot.lane.b32.xlu0 %v916_v18, %s2423_s30  ;;  %v1771_v18 = vld [vmem:[%s3392_s2 + $0x90] sm:$0xff] }
 0x12a   : > { %v1097_v32 = vpop.permute.xlu1 %1096 }
 0x12b   : > { %v954_v35 = vpop.permute.xlu0 %953  ;;  %1143 = vst.msk [vmem:[#allocation2 + $0x40] sm:$0xff] %vm1134_vm7, %v1097_v32  ;;  %v1779_v32 = vld [vmem:[%s3392_s2 + $0xd0] sm:$0xff] }
 0x12c   : > { %999 = vst.msk [vmem:[#allocation2 + $0x48] sm:$0xff] %vm989_vm6, %v954_v35  ;;  %1259 = vrot.lane.b32.xlu1 %v1206_v29, %s2424_s7  ;;  %v1777_v29 = vld [vmem:[%s3392_s2 + $0xc0] sm:$0xff] }
 0x12d   : > { %1257 = vrot.lane.b32.xlu0 %v1205_v23, %s2424_s7 }
 0x12e   : > { %v1242_v39 = vpop.permute.xlu1 %1241 }
 0x12f   : > { %v1099_v40 = vpop.permute.xlu0 %1098  ;;  %1288 = vst.msk [vmem:[#allocation2 + $0x40] sm:$0xff] %vm1279_vm8, %v1242_v39  ;;  %v1782_v39 = vld [vmem:[%s3392_s2 + $0xe8] sm:$0xff] }
 0x130   : > { %1144 = vst.msk [vmem:[#allocation2 + $0x48] sm:$0xff] %vm1134_vm7, %v1099_v40  ;;  %1404 = vrot.lane.b32.xlu1 %v1351_v37, %s2425_s8  ;;  %v1781_v37 = vld [vmem:[%s3392_s2 + $0xe0] sm:$0xff] }
 0x131   : > { %1402 = vrot.lane.b32.xlu0 %v1350_v38, %s2425_s8 }
 0x132   : > { %v1387_v43 = vpop.permute.xlu1 %1386 }
 0x133   : > { %v1244_v45 = vpop.permute.xlu0 %1243  ;;  %1433 = vst.msk [vmem:[#allocation2 + $0x40] sm:$0xff] %vm1424_vm9, %v1387_v43 }
 0x134   : > { %1289 = vst.msk [vmem:[#allocation2 + $0x48] sm:$0xff] %vm1279_vm8, %v1244_v45  ;;  %1796 = vperm.xlu1 %2406, %v1754_v42   ;;  %v1783_v42 = vld [vmem:[%s3392_s2 + $0xf0] sm:$0xff] }
 0x135   : > { %1791 = vperm.xlu0 %2405, %v1753_v44   ;;  %v1784_v44 = vld [vmem:[%s3392_s2 + $0xf8] sm:$0xff] }
 0x136   : > { %v523_v47 = vpop.permute.xlu1 %522 }
 0x137   : > { %v1389_v49 = vpop.permute.xlu0 %1388  ;;  %566 = vst.msk [vmem:[#allocation2 + $0x58] sm:$0xff] %vm554_vm3, %v523_v47 }
 0x138   : > { %1434 = vst.msk [vmem:[#allocation2 + $0x48] sm:$0xff] %vm1424_vm9, %v1389_v49  ;;  %1801 = vperm.xlu1 %2406, %v1755_v46   ;;  %v1785_v46 = vld [vmem:[%s3392_s2 + $0x100] sm:$0xff]  ;;  %v1786_v49 = vld [vmem:[%s3392_s2 + $0x108] sm:$0xff] }
 0x139   : > { %1806 = vperm.xlu0 %2405, %v1756_v48  }
 0x13a   : > { %v668_v50 = vpop.permute.xlu1 %667  ;;  %v1451_v51 = vld [vmem:[#allocation2 + $0x40] sm:$0xff] }
 0x13b   : > { %v666_v54 = vpop.permute.xlu0 %665  ;;  %711 = vst.msk [vmem:[#allocation2 + $0x58] sm:$0xff] %vm699_vm4, %v668_v50  ;;  %2358 = vmatprep.mubr.msk.bf16.mxu0 %vm1481_vm10, %v1451_v51  ;;  %v1787_v51 = vld [vmem:[%s3392_s2 + $0x110] sm:$0xff] }
 0x13c   : > { %710 = vst.msk [vmem:[#allocation2 + $0x50] sm:$0xff] %vm699_vm4, %v666_v54  ;;  %1811 = vperm.xlu1 %2406, %v1757_v53   ;;  %v1788_v54 = vld [vmem:[%s3392_s2 + $0x118] sm:$0xff] }
 0x13d   : > { %1816 = vperm.xlu0 %2405, %v1758_v52  }
 0x13e   : > { %v813_v19 = vpop.permute.xlu1 %812 }
 0x13f   : > { %v811_v56 = vpop.permute.xlu0 %810  ;;  %856 = vst.msk [vmem:[#allocation2 + $0x58] sm:$0xff] %vm844_vm5, %v813_v19  ;;  %v1452_v57 = vld [vmem:[#allocation2 + $0x48] sm:$0xff] }
 0x140   : > { %855 = vst.msk [vmem:[#allocation2 + $0x50] sm:$0xff] %vm844_vm5, %v811_v56  ;;  %2359 = vmatmul.mubr.msk.bf16.gmra.mrb[16].mxu0 %vm1481_vm10, %v1452_v57  ;;  %1821 = vperm.xlu1 %2406, %v1759_v55  }
 0x141   : > { %1826 = vperm.xlu0 %2405, %v1760_v9  }
 0x142   : > { %v958_v60 = vpop.permute.xlu1 %957 }
 0x143   : > { %v956_v61 = vpop.permute.xlu0 %955  ;;  %1001 = vst.msk [vmem:[#allocation2 + $0x58] sm:$0xff] %vm989_vm6, %v958_v60 }
 0x144   : > { %1000 = vst.msk [vmem:[#allocation2 + $0x50] sm:$0xff] %vm989_vm6, %v956_v61  ;;  %1831 = vperm.xlu1 %2406, %v1761_v59  }
 0x145   : > { %1836 = vperm.xlu0 %2405, %v1762_v41  }
 0x146   : > { %v1103_v63 = vpop.permute.xlu1 %1102 }
 0x147   : > { %v1101_v1 = vpop.permute.xlu0 %1100  ;;  %1146 = vst.msk [vmem:[#allocation2 + $0x58] sm:$0xff] %vm1134_vm7, %v1103_v63 }
 0x148   : > { %1145 = vst.msk [vmem:[#allocation2 + $0x50] sm:$0xff] %vm1134_vm7, %v1101_v1  ;;  %1841 = vperm.xlu1 %2406, %v1763_v62  }
 0x149   : > { %1846 = vperm.xlu0 %2405, %v1764_v0  }
 0x14a   : > { %v1248_v4 = vpop.permute.xlu1 %1247 }
 0x14b   : > { %v1246_v7 = vpop.permute.xlu0 %1245  ;;  %1291 = vst.msk [vmem:[#allocation2 + $0x58] sm:$0xff] %vm1279_vm8, %v1248_v4 }
 0x14c   : > { %1290 = vst.msk [vmem:[#allocation2 + $0x50] sm:$0xff] %vm1279_vm8, %v1246_v7  ;;  %1851 = vperm.xlu1 %2406, %v1765_v2  }
 0x14d   : > { %1856 = vperm.xlu0 %2405, %v1766_v5  }
 0x14e   : > { %v1393_v10 = vpop.permute.xlu1 %1392 }
 0x14f   : > { %v1391_v12 = vpop.permute.xlu0 %1390  ;;  %1436 = vst.msk [vmem:[#allocation2 + $0x58] sm:$0xff] %vm1424_vm9, %v1393_v10 }
 0x150   : > { %1435 = vst.msk [vmem:[#allocation2 + $0x50] sm:$0xff] %vm1424_vm9, %v1391_v12  ;;  %1861 = vperm.xlu1 %2406, %v1767_v8  }
 0x151   : > { %1866 = vperm.xlu0 %2405, %v1768_v11  }
 0x152   : > { %v527_v15 = vpop.permute.xlu1 %526 }
 0x153   : > { %v525_v17 = vpop.permute.xlu0 %524  ;;  %568 = vst.msk [vmem:[#allocation2 + $0x68] sm:$0xff] %vm554_vm3, %v527_v15 }
 0x154   : > { %567 = vst.msk [vmem:[#allocation2 + $0x60] sm:$0xff] %vm554_vm3, %v525_v17  ;;  %1871 = vperm.xlu1 %2406, %v1769_v14  }
 0x155   : > { %1876 = vperm.xlu0 %2405, %v1770_v16  }
 0x156   : > { %v672_v36 = vpop.permute.xlu1 %671  ;;  %v1454_v20 = vld [vmem:[#allocation2 + $0x58] sm:$0xff] }
 0x157   : > { %v670_v22 = vpop.permute.xlu0 %669  ;;  %713 = vst.msk [vmem:[#allocation2 + $0x68] sm:$0xff] %vm699_vm4, %v672_v36  ;;  %v1453_v3 = vld [vmem:[#allocation2 + $0x50] sm:$0xff] }
 0x158   : > { %712 = vst.msk [vmem:[#allocation2 + $0x60] sm:$0xff] %vm699_vm4, %v670_v22  ;;  %2362 = vmatprep.mubr.msk.bf16.mxu1 %vm1481_vm10, %v1453_v3  ;;  %1881 = vperm.xlu1 %2406, %v1771_v18  }
 0x159   : > { %2363 = vmatmul.mubr.msk.bf16.vlgmr.msra.gmra.mrb[0].mxu1 %vm1481_vm10, %v1454_v20  ;;  %1886 = vperm.xlu0 %2405, %v1772_v21  }
 0x15a   : > { %v817_v6 = vpop.permute.xlu1 %816 }
 0x15b   : > { %v815_v58 = vpop.permute.xlu0 %814  ;;  %858 = vst.msk [vmem:[#allocation2 + $0x68] sm:$0xff] %vm844_vm5, %v817_v6 }
 0x15c   : > { %857 = vst.msk [vmem:[#allocation2 + $0x60] sm:$0xff] %vm844_vm5, %v815_v58  ;;  %1891 = vperm.xlu1 %2406, %v1773_v24  }
 0x15d   : > { %1896 = vperm.xlu0 %2405, %v1774_v25  }
 0x15e   : > { %v962_v27 = vpop.permute.xlu1 %961 }
 0x15f   : > { %v960_v13 = vpop.permute.xlu0 %959  ;;  %1003 = vst.msk [vmem:[#allocation2 + $0x68] sm:$0xff] %vm989_vm6, %v962_v27 }
 0x160   : > { %1002 = vst.msk [vmem:[#allocation2 + $0x60] sm:$0xff] %vm989_vm6, %v960_v13  ;;  %1901 = vperm.xlu1 %2406, %v1775_v26  }
 0x161   : > { %1906 = vperm.xlu0 %2405, %v1776_v28  }
 0x162   : > { %v1107_v23 = vpop.permute.xlu1 %1106 }
 0x163   : > { %v1105_v31 = vpop.permute.xlu0 %1104  ;;  %1148 = vst.msk [vmem:[#allocation2 + $0x68] sm:$0xff] %vm1134_vm7, %v1107_v23 }
 0x164   : > { %1147 = vst.msk [vmem:[#allocation2 + $0x60] sm:$0xff] %vm1134_vm7, %v1105_v31  ;;  %1911 = vperm.xlu1 %2406, %v1777_v29  }
 0x165   : > { %1916 = vperm.xlu0 %2405, %v1778_v30  }
 0x166   : > { %v1252_v33 = vpop.permute.xlu1 %1251 }
 0x167   : > { %v1250_v35 = vpop.permute.xlu0 %1249  ;;  %1293 = vst.msk [vmem:[#allocation2 + $0x68] sm:$0xff] %vm1279_vm8, %v1252_v33 }
 0x168   : > { %1292 = vst.msk [vmem:[#allocation2 + $0x60] sm:$0xff] %vm1279_vm8, %v1250_v35  ;;  %1921 = vperm.xlu1 %2406, %v1779_v32  }
 0x169   : > { %1926 = vperm.xlu0 %2405, %v1780_v34  }
 0x16a   : > { %v1397_v38 = vpop.permute.xlu1 %1396 }
 0x16b   : > { %v1395_v40 = vpop.permute.xlu0 %1394  ;;  %1438 = vst.msk [vmem:[#allocation2 + $0x68] sm:$0xff] %vm1424_vm9, %v1397_v38 }
 0x16c   : > { %1437 = vst.msk [vmem:[#allocation2 + $0x60] sm:$0xff] %vm1424_vm9, %v1395_v40  ;;  %1931 = vperm.xlu1 %2406, %v1781_v37  }
 0x16d   : > { %1936 = vperm.xlu0 %2405, %v1782_v39  }
 0x16e   : > { %v531_v43 = vpop.permute.xlu1 %530 }
 0x16f   : > { %v529_v45 = vpop.permute.xlu0 %528  ;;  %570 = vst.msk [vmem:[#allocation2 + $0x78] sm:$0xff] %vm554_vm3, %v531_v43 }
 0x170   : > { %569 = vst.msk [vmem:[#allocation2 + $0x70] sm:$0xff] %vm554_vm3, %v529_v45  ;;  %1941 = vperm.xlu1 %2406, %v1783_v42  }
 0x171   : > { %1946 = vperm.xlu0 %2405, %v1784_v44  }
 0x172   : > { %v676_v47 = vpop.permute.xlu1 %675  ;;  %v1456_v48 = vld [vmem:[#allocation2 + $0x68] sm:$0xff] }
 0x173   : > { %v674_v53 = vpop.permute.xlu0 %673  ;;  %715 = vst.msk [vmem:[#allocation2 + $0x78] sm:$0xff] %vm699_vm4, %v676_v47  ;;  %v1455_v50 = vld [vmem:[#allocation2 + $0x60] sm:$0xff] }
 0x174   : > { %714 = vst.msk [vmem:[#allocation2 + $0x70] sm:$0xff] %vm699_vm4, %v674_v53  ;;  %2366 = vmatprep.mubr.msk.bf16.mxu1 %vm1481_vm10, %v1455_v50  ;;  %1951 = vperm.xlu1 %2406, %v1785_v46  }
 0x175   : > { %2367 = vmatmul.mubr.msk.bf16.gmra.mrb[4].mxu1 %vm1481_vm10, %v1456_v48  ;;  %1956 = vperm.xlu0 %2405, %v1786_v49  }
 0x176   : > { %v821_v52 = vpop.permute.xlu1 %820 }
 0x177   : > { %v819_v55 = vpop.permute.xlu0 %818  ;;  %860 = vst.msk [vmem:[#allocation2 + $0x78] sm:$0xff] %vm844_vm5, %v821_v52 }
 0x178   : > { %859 = vst.msk [vmem:[#allocation2 + $0x70] sm:$0xff] %vm844_vm5, %v819_v55  ;;  %1961 = vperm.xlu1 %2406, %v1787_v51  }
 0x179   : > { %1966 = vperm.xlu0 %2405, %v1788_v54  }
 0x17a   : > { %v966_v19 = vpop.permute.xlu1 %965 }
 0x17b   : > { %v964_v9 = vpop.permute.xlu0 %963  ;;  %1005 = vst.msk [vmem:[#allocation2 + $0x78] sm:$0xff] %vm989_vm6, %v966_v19 }
 0x17c   : > { %1004 = vst.msk [vmem:[#allocation2 + $0x70] sm:$0xff] %vm989_vm6, %v964_v9 }
 0x17e   : > { %v1111_v56 = vpop.permute.xlu1 %1110 }
 0x17f   : > { %v1109_v57 = vpop.permute.xlu0 %1108  ;;  %1150 = vst.msk [vmem:[#allocation2 + $0x78] sm:$0xff] %vm1134_vm7, %v1111_v56 }
 0x180   : > { %1149 = vst.msk [vmem:[#allocation2 + $0x70] sm:$0xff] %vm1134_vm7, %v1109_v57 }
 0x182   : > { %v1256_v59 = vpop.permute.xlu1 %1255 }
 0x183   : > { %v1254_v60 = vpop.permute.xlu0 %1253  ;;  %1295 = vst.msk [vmem:[#allocation2 + $0x78] sm:$0xff] %vm1279_vm8, %v1256_v59 }
 0x184   : > { %1294 = vst.msk [vmem:[#allocation2 + $0x70] sm:$0xff] %vm1279_vm8, %v1254_v60 }
 0x186   : > { %v1401_v41 = vpop.permute.xlu1 %1400 }
 0x187   : > { %v1399_v61 = vpop.permute.xlu0 %1398  ;;  %1440 = vst.msk [vmem:[#allocation2 + $0x78] sm:$0xff] %vm1424_vm9, %v1401_v41 }
 0x188   : > { %1439 = vst.msk [vmem:[#allocation2 + $0x70] sm:$0xff] %vm1424_vm9, %v1399_v61 }
 0x18a   : > { %v535_v62 = vpop.permute.xlu1 %534 }
 0x18b   : > { %v533_v63 = vpop.permute.xlu0 %532  ;;  %572 = vst.msk [vmem:[#allocation2 + $0x88] sm:$0xff] %vm554_vm3, %v535_v62 }
 0x18c   : > { %571 = vst.msk [vmem:[#allocation2 + $0x80] sm:$0xff] %vm554_vm3, %v533_v63 }
 0x18e   : > { %v680_v0 = vpop.permute.xlu1 %679  ;;  %v1458_v1 = vld [vmem:[#allocation2 + $0x78] sm:$0xff] }
 0x18f   : > { %v678_v2 = vpop.permute.xlu0 %677  ;;  %717 = vst.msk [vmem:[#allocation2 + $0x88] sm:$0xff] %vm699_vm4, %v680_v0  ;;  %v1457_v4 = vld [vmem:[#allocation2 + $0x70] sm:$0xff] }
 0x190   : > { %716 = vst.msk [vmem:[#allocation2 + $0x80] sm:$0xff] %vm699_vm4, %v678_v2  ;;  %2370 = vmatprep.mubr.msk.bf16.mxu1 %vm1481_vm10, %v1457_v4 }
 0x191   : > { %2371 = vmatmul.mubr.msk.bf16.gmra.mrb[8].mxu1 %vm1481_vm10, %v1458_v1 }
 0x192   : > { %v825_v5 = vpop.permute.xlu1 %824 }
 0x193   : > { %v823_v7 = vpop.permute.xlu0 %822  ;;  %862 = vst.msk [vmem:[#allocation2 + $0x88] sm:$0xff] %vm844_vm5, %v825_v5 }
 0x194   : > { %861 = vst.msk [vmem:[#allocation2 + $0x80] sm:$0xff] %vm844_vm5, %v823_v7 }
 0x196   : > { %v970_v8 = vpop.permute.xlu1 %969 }
 0x197   : > { %v968_v10 = vpop.permute.xlu0 %967  ;;  %1007 = vst.msk [vmem:[#allocation2 + $0x88] sm:$0xff] %vm989_vm6, %v970_v8 }
 0x198   : > { %1006 = vst.msk [vmem:[#allocation2 + $0x80] sm:$0xff] %vm989_vm6, %v968_v10 }
 0x19a   : > { %v1115_v11 = vpop.permute.xlu1 %1114 }
 0x19b   : > { %v1113_v12 = vpop.permute.xlu0 %1112  ;;  %1152 = vst.msk [vmem:[#allocation2 + $0x88] sm:$0xff] %vm1134_vm7, %v1115_v11 }
 0x19c   : > { %1151 = vst.msk [vmem:[#allocation2 + $0x80] sm:$0xff] %vm1134_vm7, %v1113_v12 }
 0x19e   : > { %v1260_v14 = vpop.permute.xlu1 %1259 }
 0x19f   : > { %v1258_v15 = vpop.permute.xlu0 %1257  ;;  %1297 = vst.msk [vmem:[#allocation2 + $0x88] sm:$0xff] %vm1279_vm8, %v1260_v14 }
 0x1a0   : > { %1296 = vst.msk [vmem:[#allocation2 + $0x80] sm:$0xff] %vm1279_vm8, %v1258_v15 }
 0x1a2   : > { %v1405_v16 = vpop.permute.xlu1 %1404 }
 0x1a3   : > { %v1403_v17 = vpop.permute.xlu0 %1402  ;;  %1442 = vst.msk [vmem:[#allocation2 + $0x88] sm:$0xff] %vm1424_vm9, %v1405_v16 }
 0x1a4   : > { %1441 = vst.msk [vmem:[#allocation2 + $0x80] sm:$0xff] %vm1424_vm9, %v1403_v17 }
 0x1aa   : > { %v1460_v18 = vld [vmem:[#allocation2 + $0x88] sm:$0xff] }
 0x1ab   : > { %v1459_v36 = vld [vmem:[#allocation2 + $0x80] sm:$0xff] }
 0x1ac   : > { %2374 = vmatprep.mubr.msk.bf16.mxu1 %vm1481_vm10, %v1459_v36 }
 0x1ad   : > { %2375 = vmatmul.mubr.msk.bf16.gmra.mrb[12].mxu1 %vm1481_vm10, %v1460_v18 }
 0x1b3   : > { %v2344_v20 = vpop.f32.mrb[0].mxu0  ;;  %v1797_v21 = vpop.permute.xlu1 %1796 }
 0x1b4   : > { %1719 = vst.msk [vmem:[%s3237_s12 + $0x10] sm:$0xff] %vm264_vm0, %v2344_v20  ;;  %v1792_v22 = vpop.permute.xlu0 %1791  ;;  %v1574_v3 = vpop.f32.mrb[1].mxu0 }
 0x1b5   : > { %1717 = vst.msk [vmem:[%s3237_s12] sm:$0xff] %vm264_vm0, %v1574_v3  ;;  %v1969_v24 = vmul.f32 %v1792_v22, %v1574_v3  ;;  %v2345_v6 = vpop.f32.mrb[2].mxu0 }
 0x1b6   : > { %1720 = vst.msk [vmem:[%s3237_s12 + $0x18] sm:$0xff] %vm264_vm0, %v2345_v6  ;;  %v1577_v25 = vpop.f32.mrb[3].mxu0 }
 0x1b7   : > { %v2084_v58 = vmul.f32 %v1969_v24, %v1574_v3  ;;  %1718 = vst.msk [vmem:[%s3237_s12 + $0x8] sm:$0xff] %vm264_vm0, %v1577_v25  ;;  %v1970_v26 = vmul.f32 %v1797_v21, %v1577_v25  ;;  %v1802_v27 = vpop.permute.xlu1 %1801  ;;  %v2005_v29 = vsel %vm264_vm0, %v1969_v24, 0.0 }
 0x1b8   : > { %v1971_v28 = vmul.f32 %v2344_v20, %v1802_v27  ;;  %v1807_v13 = vpop.permute.xlu0 %1806 }
 0x1b9   : > { %v2006_v23 = vsel %vm264_vm0, %v1970_v26, 0.0  ;;  %v2085_v30 = vmul.f32 %v1970_v26, %v1577_v25  ;;  %v1972_v31 = vmul.f32 %v2345_v6, %v1807_v13  ;;  %v2120_v35 = vsel %vm264_vm0, %v2084_v58, 0.0 }
 0x1ba   : > { %v2007_v32 = vadd.f32 %v2006_v23, %v2005_v29  ;;  %v2008_v33 = vsel %vm264_vm0, %v1971_v28, 0.0  ;;  %v2086_v34 = vmul.f32 %v2344_v20, %v1971_v28 }
 0x1bb   : > { %v2121_v37 = vsel %vm264_vm0, %v2085_v30, 0.0  ;;  %v2087_v38 = vmul.f32 %v2345_v6, %v1972_v31  ;;  %v2010_v43 = vsel %vm264_vm0, %v1972_v31, 0.0  ;;  %v1812_v48 = vpop.permute.xlu1 %1811 }
 0x1bc   : > { %v2122_v39 = vadd.f32 %v2121_v37, %v2120_v35  ;;  %v2009_v40 = vadd.f32 %v2008_v33, %v2007_v32  ;;  %v2123_v42 = vsel %vm264_vm0, %v2086_v34, 0.0  ;;  %v1817_v49 = vpop.permute.xlu0 %1816 }
 0x1bd   : > { %v2125_v46 = vsel %vm264_vm0, %v2087_v38, 0.0 }
 0x1be   : > { %v2124_v44 = vadd.f32 %v2123_v42, %v2122_v39  ;;  %v2011_v45 = vadd.f32 %v2010_v43, %v2009_v40 }
 0x1bf   : > { %v1822_v53 = vpop.permute.xlu1 %1821 }
 0x1c0   : > { %v2126_v47 = vadd.f32 %v2125_v46, %v2124_v44  ;;  %v1827_v52 = vpop.permute.xlu0 %1826 }
 0x1c3   : > { %v1832_v18 = vpop.permute.xlu1 %1831 }
 0x1c4   : > { %v1837_v36 = vpop.permute.xlu0 %1836 }
 0x1c7   : > { %v1842_v20 = vpop.permute.xlu1 %1841 }
 0x1c8   : > { %v1847_v3 = vpop.permute.xlu0 %1846 }
 0x1cb   : > { %v2348_v50 = vpop.f32.mrb[4].mxu0 }
 0x1cc   : > { %1723 = vst.msk [vmem:[%s3237_s12 + $0x30] sm:$0xff] %vm264_vm0, %v2348_v50  ;;  %v1590_v51 = vpop.f32.mrb[5].mxu0  ;;  %v1975_v54 = vmul.f32 %v2348_v50, %v1822_v53 }
 0x1cd   : > { %1721 = vst.msk [vmem:[%s3237_s12 + $0x20] sm:$0xff] %vm264_vm0, %v1590_v51  ;;  %v1973_v55 = vmul.f32 %v1812_v48, %v1590_v51  ;;  %v2349_v19 = vpop.f32.mrb[6].mxu0  ;;  %v1852_v48 = vpop.permute.xlu1 %1851 }
 0x1ce   : > { %1724 = vst.msk [vmem:[%s3237_s12 + $0x38] sm:$0xff] %vm264_vm0, %v2349_v19  ;;  %v1593_v9 = vpop.f32.mrb[7].mxu0  ;;  %v1976_v59 = vmul.f32 %v2349_v19, %v1827_v52  ;;  %v2090_v61 = vmul.f32 %v2348_v50, %v1975_v54  ;;  %v2016_v4 = vsel %vm264_vm0, %v1975_v54, 0.0 }
 0x1cf   : > { %v2012_v56 = vsel %vm264_vm0, %v1973_v55, 0.0  ;;  %v2088_v57 = vmul.f32 %v1973_v55, %v1590_v51  ;;  %1722 = vst.msk [vmem:[%s3237_s12 + $0x28] sm:$0xff] %vm264_vm0, %v1593_v9  ;;  %v1974_v60 = vmul.f32 %v1817_v49, %v1593_v9  ;;  %v1857_v49 = vpop.permute.xlu0 %1856 }
 0x1d0   : > { %v2013_v41 = vadd.f32 %v2012_v56, %v2011_v45  ;;  %v2091_v5 = vmul.f32 %v2349_v19, %v1976_v59  ;;  %v2131_v11 = vsel %vm264_vm0, %v2090_v61, 0.0  ;;  %v2018_v12 = vsel %vm264_vm0, %v1976_v59, 0.0 }
 0x1d1   : > { %v2127_v62 = vsel %vm264_vm0, %v2088_v57, 0.0  ;;  %v2014_v63 = vsel %vm264_vm0, %v1974_v60, 0.0  ;;  %v2089_v0 = vmul.f32 %v1974_v60, %v1593_v9  ;;  %v1862_v53 = vpop.permute.xlu1 %1861 }
 0x1d2   : > { %v2128_v1 = vadd.f32 %v2127_v62, %v2126_v47  ;;  %v2015_v2 = vadd.f32 %v2014_v63, %v2013_v41  ;;  %v2133_v16 = vsel %vm264_vm0, %v2091_v5, 0.0 }
 0x1d3   : > { %v2129_v7 = vsel %vm264_vm0, %v2089_v0, 0.0  ;;  %v1867_v52 = vpop.permute.xlu0 %1866 }
 0x1d4   : > { %v2017_v8 = vadd.f32 %v2016_v4, %v2015_v2  ;;  %v2130_v10 = vadd.f32 %v2129_v7, %v2128_v1 }
 0x1d6   : > { %v2132_v14 = vadd.f32 %v2131_v11, %v2130_v10  ;;  %v2019_v15 = vadd.f32 %v2018_v12, %v2017_v8 }
 0x1d8   : > { %v2134_v17 = vadd.f32 %v2133_v16, %v2132_v14 }
 0x1e3   : > { %v2352_v21 = vpop.f32.mrb[8].mxu0 }
 0x1e4   : > { %1727 = vst.msk [vmem:[%s3237_s12 + $0x50] sm:$0xff] %vm264_vm0, %v2352_v21  ;;  %v1606_v22 = vpop.f32.mrb[9].mxu0  ;;  %v1979_v24 = vmul.f32 %v2352_v21, %v1842_v20 }
 0x1e5   : > { %1725 = vst.msk [vmem:[%s3237_s12 + $0x40] sm:$0xff] %vm264_vm0, %v1606_v22  ;;  %v1977_v6 = vmul.f32 %v1832_v18, %v1606_v22  ;;  %v2353_v25 = vpop.f32.mrb[10].mxu0  ;;  %v1872_v18 = vpop.permute.xlu1 %1871 }
 0x1e6   : > { %1728 = vst.msk [vmem:[%s3237_s12 + $0x58] sm:$0xff] %vm264_vm0, %v2353_v25  ;;  %v1609_v58 = vpop.f32.mrb[11].mxu0  ;;  %v1980_v28 = vmul.f32 %v2353_v25, %v1847_v3  ;;  %v2094_v23 = vmul.f32 %v2352_v21, %v1979_v24  ;;  %v2024_v35 = vsel %vm264_vm0, %v1979_v24, 0.0 }
 0x1e7   : > { %v2020_v26 = vsel %vm264_vm0, %v1977_v6, 0.0  ;;  %v2092_v27 = vmul.f32 %v1977_v6, %v1606_v22  ;;  %1726 = vst.msk [vmem:[%s3237_s12 + $0x48] sm:$0xff] %vm264_vm0, %v1609_v58  ;;  %v1978_v13 = vmul.f32 %v1837_v36, %v1609_v58  ;;  %v1877_v36 = vpop.permute.xlu0 %1876 }
 0x1e8   : > { %v2021_v29 = vadd.f32 %v2020_v26, %v2019_v15  ;;  %v2095_v37 = vmul.f32 %v2353_v25, %v1980_v28  ;;  %v2139_v42 = vsel %vm264_vm0, %v2094_v23, 0.0  ;;  %v2026_v43 = vsel %vm264_vm0, %v1980_v28, 0.0 }
 0x1e9   : > { %v2135_v30 = vsel %vm264_vm0, %v2092_v27, 0.0  ;;  %v2022_v31 = vsel %vm264_vm0, %v1978_v13, 0.0  ;;  %v2093_v32 = vmul.f32 %v1978_v13, %v1609_v58  ;;  %v1882_v20 = vpop.permute.xlu1 %1881 }
 0x1ea   : > { %v2136_v33 = vadd.f32 %v2135_v30, %v2134_v17  ;;  %v2023_v34 = vadd.f32 %v2022_v31, %v2021_v29  ;;  %v2141_v46 = vsel %vm264_vm0, %v2095_v37, 0.0 }
 0x1eb   : > { %v2137_v38 = vsel %vm264_vm0, %v2093_v32, 0.0  ;;  %v1887_v3 = vpop.permute.xlu0 %1886 }
 0x1ec   : > { %v2025_v39 = vadd.f32 %v2024_v35, %v2023_v34  ;;  %v2138_v40 = vadd.f32 %v2137_v38, %v2136_v33 }
 0x1ee   : > { %v2140_v44 = vadd.f32 %v2139_v42, %v2138_v40  ;;  %v2027_v45 = vadd.f32 %v2026_v43, %v2025_v39 }
 0x1f0   : > { %v2142_v47 = vadd.f32 %v2141_v46, %v2140_v44 }
 0x1fb   : > { %v2356_v50 = vpop.f32.mrb[12].mxu0 }
 0x1fc   : > { %1731 = vst.msk [vmem:[%s3237_s12 + $0x70] sm:$0xff] %vm264_vm0, %v2356_v50  ;;  %v1622_v51 = vpop.f32.mrb[13].mxu0  ;;  %v1983_v54 = vmul.f32 %v2356_v50, %v1862_v53 }
 0x1fd   : > { %1729 = vst.msk [vmem:[%s3237_s12 + $0x60] sm:$0xff] %vm264_vm0, %v1622_v51  ;;  %v1981_v55 = vmul.f32 %v1852_v48, %v1622_v51  ;;  %v2357_v19 = vpop.f32.mrb[14].mxu0  ;;  %v1892_v48 = vpop.permute.xlu1 %1891 }
 0x1fe   : > { %1732 = vst.msk [vmem:[%s3237_s12 + $0x78] sm:$0xff] %vm264_vm0, %v2357_v19  ;;  %v1625_v9 = vpop.f32.mrb[15].mxu0  ;;  %v1984_v59 = vmul.f32 %v2357_v19, %v1867_v52  ;;  %v2098_v61 = vmul.f32 %v2356_v50, %v1983_v54  ;;  %v2032_v4 = vsel %vm264_vm0, %v1983_v54, 0.0 }
 0x1ff   : > { %v2028_v56 = vsel %vm264_vm0, %v1981_v55, 0.0  ;;  %v2096_v57 = vmul.f32 %v1981_v55, %v1622_v51  ;;  %1730 = vst.msk [vmem:[%s3237_s12 + $0x68] sm:$0xff] %vm264_vm0, %v1625_v9  ;;  %v1982_v60 = vmul.f32 %v1857_v49, %v1625_v9  ;;  %v1897_v49 = vpop.permute.xlu0 %1896 }
 0x200   : > { %v2029_v41 = vadd.f32 %v2028_v56, %v2027_v45  ;;  %v2099_v5 = vmul.f32 %v2357_v19, %v1984_v59  ;;  %v2147_v11 = vsel %vm264_vm0, %v2098_v61, 0.0  ;;  %v2034_v12 = vsel %vm264_vm0, %v1984_v59, 0.0 }
 0x201   : > { %v2143_v62 = vsel %vm264_vm0, %v2096_v57, 0.0  ;;  %v2030_v63 = vsel %vm264_vm0, %v1982_v60, 0.0  ;;  %v2097_v0 = vmul.f32 %v1982_v60, %v1625_v9  ;;  %v1902_v50 = vpop.permute.xlu1 %1901 }
 0x202   : > { %v2144_v1 = vadd.f32 %v2143_v62, %v2142_v47  ;;  %v2031_v2 = vadd.f32 %v2030_v63, %v2029_v41  ;;  %v2149_v16 = vsel %vm264_vm0, %v2099_v5, 0.0 }
 0x203   : > { %v2145_v7 = vsel %vm264_vm0, %v2097_v0, 0.0  ;;  %v1907_v19 = vpop.permute.xlu0 %1906 }
 0x204   : > { %v2033_v8 = vadd.f32 %v2032_v4, %v2031_v2  ;;  %v2146_v10 = vadd.f32 %v2145_v7, %v2144_v1 }
 0x206   : > { %v2148_v14 = vadd.f32 %v2147_v11, %v2146_v10  ;;  %v2035_v15 = vadd.f32 %v2034_v12, %v2033_v8 }
 0x208   : > { %v2150_v17 = vadd.f32 %v2149_v16, %v2148_v14 }
 0x213   : > { %v2360_v21 = vpop.f32.mrb[16].mxu0 }
 0x214   : > { %1735 = vst.msk [vmem:[%s3237_s12 + $0x90] sm:$0xff] %vm264_vm0, %v2360_v21  ;;  %v1638_v22 = vpop.f32.mrb[17].mxu0  ;;  %v1987_v24 = vmul.f32 %v2360_v21, %v1882_v20 }
 0x215   : > { %1733 = vst.msk [vmem:[%s3237_s12 + $0x80] sm:$0xff] %vm264_vm0, %v1638_v22  ;;  %v1985_v6 = vmul.f32 %v1872_v18, %v1638_v22  ;;  %v2361_v25 = vpop.f32.mrb[18].mxu0  ;;  %v1912_v18 = vpop.permute.xlu1 %1911 }
 0x216   : > { %1736 = vst.msk [vmem:[%s3237_s12 + $0x98] sm:$0xff] %vm264_vm0, %v2361_v25  ;;  %v1641_v58 = vpop.f32.mrb[19].mxu0  ;;  %v1988_v28 = vmul.f32 %v2361_v25, %v1887_v3  ;;  %v2102_v23 = vmul.f32 %v2360_v21, %v1987_v24  ;;  %v2040_v35 = vsel %vm264_vm0, %v1987_v24, 0.0 }
 0x217   : > { %v2036_v26 = vsel %vm264_vm0, %v1985_v6, 0.0  ;;  %v2100_v27 = vmul.f32 %v1985_v6, %v1638_v22  ;;  %1734 = vst.msk [vmem:[%s3237_s12 + $0x88] sm:$0xff] %vm264_vm0, %v1641_v58  ;;  %v1986_v13 = vmul.f32 %v1877_v36, %v1641_v58  ;;  %v1917_v36 = vpop.permute.xlu0 %1916 }
 0x218   : > { %v2037_v29 = vadd.f32 %v2036_v26, %v2035_v15  ;;  %v2103_v37 = vmul.f32 %v2361_v25, %v1988_v28  ;;  %v2155_v42 = vsel %vm264_vm0, %v2102_v23, 0.0  ;;  %v2042_v43 = vsel %vm264_vm0, %v1988_v28, 0.0 }
 0x219   : > { %v2151_v30 = vsel %vm264_vm0, %v2100_v27, 0.0  ;;  %v2038_v31 = vsel %vm264_vm0, %v1986_v13, 0.0  ;;  %v2101_v32 = vmul.f32 %v1986_v13, %v1641_v58  ;;  %v1922_v21 = vpop.permute.xlu1 %1921 }
 0x21a   : > { %v2152_v33 = vadd.f32 %v2151_v30, %v2150_v17  ;;  %v2039_v34 = vadd.f32 %v2038_v31, %v2037_v29  ;;  %v2157_v46 = vsel %vm264_vm0, %v2103_v37, 0.0 }
 0x21b   : > { %v2153_v38 = vsel %vm264_vm0, %v2101_v32, 0.0  ;;  %v1927_v25 = vpop.permute.xlu0 %1926 }
 0x21c   : > { %v2041_v39 = vadd.f32 %v2040_v35, %v2039_v34  ;;  %v2154_v40 = vadd.f32 %v2153_v38, %v2152_v33 }
 0x21e   : > { %v2156_v44 = vadd.f32 %v2155_v42, %v2154_v40  ;;  %v2043_v45 = vadd.f32 %v2042_v43, %v2041_v39 }
 0x220   : > { %v2158_v47 = vadd.f32 %v2157_v46, %v2156_v44 }
 0x22c   : > { %v2364_v53 = vpop.f32.mrb[0].mxu1 }
 0x22d   : > { %1739 = vst.msk [vmem:[%s3237_s12 + $0xb0] sm:$0xff] %vm264_vm0, %v2364_v53  ;;  %v1654_v51 = vpop.f32.mrb[1].mxu1  ;;  %v1991_v52 = vmul.f32 %v2364_v53, %v1902_v50 }
 0x22e   : > { %1737 = vst.msk [vmem:[%s3237_s12 + $0xa0] sm:$0xff] %vm264_vm0, %v1654_v51  ;;  %v1989_v54 = vmul.f32 %v1892_v48, %v1654_v51  ;;  %v2365_v55 = vpop.f32.mrb[2].mxu1  ;;  %v1932_v48 = vpop.permute.xlu1 %1931 }
 0x22f   : > { %1740 = vst.msk [vmem:[%s3237_s12 + $0xb8] sm:$0xff] %vm264_vm0, %v2365_v55  ;;  %v1657_v9 = vpop.f32.mrb[3].mxu1  ;;  %v1992_v59 = vmul.f32 %v2365_v55, %v1907_v19  ;;  %v2106_v61 = vmul.f32 %v2364_v53, %v1991_v52  ;;  %v2048_v4 = vsel %vm264_vm0, %v1991_v52, 0.0 }
 0x230   : > { %v2044_v56 = vsel %vm264_vm0, %v1989_v54, 0.0  ;;  %v2104_v57 = vmul.f32 %v1989_v54, %v1654_v51  ;;  %1738 = vst.msk [vmem:[%s3237_s12 + $0xa8] sm:$0xff] %vm264_vm0, %v1657_v9  ;;  %v1990_v60 = vmul.f32 %v1897_v49, %v1657_v9  ;;  %v1937_v49 = vpop.permute.xlu0 %1936 }
 0x231   : > { %v2045_v41 = vadd.f32 %v2044_v56, %v2043_v45  ;;  %v2107_v5 = vmul.f32 %v2365_v55, %v1992_v59  ;;  %v2163_v11 = vsel %vm264_vm0, %v2106_v61, 0.0  ;;  %v2050_v12 = vsel %vm264_vm0, %v1992_v59, 0.0 }
 0x232   : > { %v2159_v62 = vsel %vm264_vm0, %v2104_v57, 0.0  ;;  %v2046_v63 = vsel %vm264_vm0, %v1990_v60, 0.0  ;;  %v2105_v0 = vmul.f32 %v1990_v60, %v1657_v9  ;;  %v1942_v50 = vpop.permute.xlu1 %1941 }
 0x233   : > { %v2160_v1 = vadd.f32 %v2159_v62, %v2158_v47  ;;  %v2047_v2 = vadd.f32 %v2046_v63, %v2045_v41  ;;  %v2165_v16 = vsel %vm264_vm0, %v2107_v5, 0.0 }
 0x234   : > { %v2161_v7 = vsel %vm264_vm0, %v2105_v0, 0.0  ;;  %v1947_v19 = vpop.permute.xlu0 %1946 }
 0x235   : > { %v2049_v8 = vadd.f32 %v2048_v4, %v2047_v2  ;;  %v2162_v10 = vadd.f32 %v2161_v7, %v2160_v1 }
 0x237   : > { %v2164_v14 = vadd.f32 %v2163_v11, %v2162_v10  ;;  %v2051_v15 = vadd.f32 %v2050_v12, %v2049_v8 }
 0x239   : > { %v2166_v17 = vadd.f32 %v2165_v16, %v2164_v14 }
 0x248   : > { %v2368_v20 = vpop.f32.mrb[4].mxu1 }
 0x249   : > { %1743 = vst.msk [vmem:[%s3237_s12 + $0xd0] sm:$0xff] %vm264_vm0, %v2368_v20  ;;  %v1670_v22 = vpop.f32.mrb[5].mxu1  ;;  %v1995_v3 = vmul.f32 %v2368_v20, %v1922_v21 }
 0x24a   : > { %1741 = vst.msk [vmem:[%s3237_s12 + $0xc0] sm:$0xff] %vm264_vm0, %v1670_v22  ;;  %v1993_v24 = vmul.f32 %v1912_v18, %v1670_v22  ;;  %v2369_v6 = vpop.f32.mrb[6].mxu1  ;;  %v1952_v18 = vpop.permute.xlu1 %1951 }
 0x24b   : > { %1744 = vst.msk [vmem:[%s3237_s12 + $0xd8] sm:$0xff] %vm264_vm0, %v2369_v6  ;;  %v1673_v58 = vpop.f32.mrb[7].mxu1  ;;  %v1996_v28 = vmul.f32 %v2369_v6, %v1927_v25  ;;  %v2110_v23 = vmul.f32 %v2368_v20, %v1995_v3  ;;  %v2056_v35 = vsel %vm264_vm0, %v1995_v3, 0.0 }
 0x24c   : > { %v2052_v26 = vsel %vm264_vm0, %v1993_v24, 0.0  ;;  %v2108_v27 = vmul.f32 %v1993_v24, %v1670_v22  ;;  %1742 = vst.msk [vmem:[%s3237_s12 + $0xc8] sm:$0xff] %vm264_vm0, %v1673_v58  ;;  %v1994_v13 = vmul.f32 %v1917_v36, %v1673_v58  ;;  %v1957_v36 = vpop.permute.xlu0 %1956 }
 0x24d   : > { %v2053_v29 = vadd.f32 %v2052_v26, %v2051_v15  ;;  %v2111_v37 = vmul.f32 %v2369_v6, %v1996_v28  ;;  %v2171_v42 = vsel %vm264_vm0, %v2110_v23, 0.0  ;;  %v2058_v43 = vsel %vm264_vm0, %v1996_v28, 0.0 }
 0x24e   : > { %v2167_v30 = vsel %vm264_vm0, %v2108_v27, 0.0  ;;  %v2054_v31 = vsel %vm264_vm0, %v1994_v13, 0.0  ;;  %v2109_v32 = vmul.f32 %v1994_v13, %v1673_v58  ;;  %v1962_v21 = vpop.permute.xlu1 %1961 }
 0x24f   : > { %v2168_v33 = vadd.f32 %v2167_v30, %v2166_v17  ;;  %v2055_v34 = vadd.f32 %v2054_v31, %v2053_v29  ;;  %v2173_v46 = vsel %vm264_vm0, %v2111_v37, 0.0 }
 0x250   : > { %v2169_v38 = vsel %vm264_vm0, %v2109_v32, 0.0  ;;  %v1967_v25 = vpop.permute.xlu0 %1966 }
 0x251   : > { %v2057_v39 = vadd.f32 %v2056_v35, %v2055_v34  ;;  %v2170_v40 = vadd.f32 %v2169_v38, %v2168_v33 }
 0x253   : > { %v2172_v44 = vadd.f32 %v2171_v42, %v2170_v40  ;;  %v2059_v45 = vadd.f32 %v2058_v43, %v2057_v39 }
 0x255   : > { %v2174_v47 = vadd.f32 %v2173_v46, %v2172_v44 }
 0x264   : > { %v2372_v53 = vpop.f32.mrb[8].mxu1 }
 0x265   : > { %1747 = vst.msk [vmem:[%s3237_s12 + $0xf0] sm:$0xff] %vm264_vm0, %v2372_v53  ;;  %v1686_v51 = vpop.f32.mrb[9].mxu1  ;;  %v1999_v52 = vmul.f32 %v2372_v53, %v1942_v50 }
 0x266   : > { %1745 = vst.msk [vmem:[%s3237_s12 + $0xe0] sm:$0xff] %vm264_vm0, %v1686_v51  ;;  %v1997_v54 = vmul.f32 %v1932_v48, %v1686_v51  ;;  %v2373_v55 = vpop.f32.mrb[10].mxu1 }
 0x267   : > { %1748 = vst.msk [vmem:[%s3237_s12 + $0xf8] sm:$0xff] %vm264_vm0, %v2373_v55  ;;  %v1689_v9 = vpop.f32.mrb[11].mxu1  ;;  %v2000_v59 = vmul.f32 %v2373_v55, %v1947_v19  ;;  %v2114_v61 = vmul.f32 %v2372_v53, %v1999_v52  ;;  %v2064_v4 = vsel %vm264_vm0, %v1999_v52, 0.0 }
 0x268   : > { %v2060_v56 = vsel %vm264_vm0, %v1997_v54, 0.0  ;;  %v2112_v57 = vmul.f32 %v1997_v54, %v1686_v51  ;;  %1746 = vst.msk [vmem:[%s3237_s12 + $0xe8] sm:$0xff] %vm264_vm0, %v1689_v9  ;;  %v1998_v60 = vmul.f32 %v1937_v49, %v1689_v9 }
 0x269   : > { %v2061_v41 = vadd.f32 %v2060_v56, %v2059_v45  ;;  %v2115_v5 = vmul.f32 %v2373_v55, %v2000_v59  ;;  %v2179_v11 = vsel %vm264_vm0, %v2114_v61, 0.0  ;;  %v2066_v12 = vsel %vm264_vm0, %v2000_v59, 0.0 }
 0x26a   : > { %v2175_v62 = vsel %vm264_vm0, %v2112_v57, 0.0  ;;  %v2062_v63 = vsel %vm264_vm0, %v1998_v60, 0.0  ;;  %v2113_v0 = vmul.f32 %v1998_v60, %v1689_v9 }
 0x26b   : > { %v2176_v1 = vadd.f32 %v2175_v62, %v2174_v47  ;;  %v2063_v2 = vadd.f32 %v2062_v63, %v2061_v41  ;;  %v2181_v16 = vsel %vm264_vm0, %v2115_v5, 0.0 }
 0x26c   : > { %v2177_v7 = vsel %vm264_vm0, %v2113_v0, 0.0 }
 0x26d   : > { %v2065_v8 = vadd.f32 %v2064_v4, %v2063_v2  ;;  %v2178_v10 = vadd.f32 %v2177_v7, %v2176_v1 }
 0x26f   : > { %v2180_v14 = vadd.f32 %v2179_v11, %v2178_v10  ;;  %v2067_v15 = vadd.f32 %v2066_v12, %v2065_v8 }
 0x271   : > { %v2182_v17 = vadd.f32 %v2181_v16, %v2180_v14 }
 0x280   : > { %v2376_v20 = vpop.f32.mrb[12].mxu1 }
 0x281   : > { %1751 = vst.msk [vmem:[%s3237_s12 + $0x110] sm:$0xff] %vm264_vm0, %v2376_v20  ;;  %v1702_v22 = vpop.f32.mrb[13].mxu1  ;;  %v2003_v3 = vmul.f32 %v2376_v20, %v1962_v21 }
 0x282   : > { %1749 = vst.msk [vmem:[%s3237_s12 + $0x100] sm:$0xff] %vm264_vm0, %v1702_v22  ;;  %v2001_v24 = vmul.f32 %v1952_v18, %v1702_v22  ;;  %v2377_v6 = vpop.f32.mrb[14].mxu1 }
 0x283   : > { %1752 = vst.msk [vmem:[%s3237_s12 + $0x118] sm:$0xff] %vm264_vm0, %v2377_v6  ;;  %v1705_v58 = vpop.f32.mrb[15].mxu1  ;;  %v2004_v28 = vmul.f32 %v2377_v6, %v1967_v25  ;;  %v2118_v23 = vmul.f32 %v2376_v20, %v2003_v3  ;;  %v2072_v35 = vsel %vm264_vm0, %v2003_v3, 0.0 }
 0x284   : > { %v2068_v26 = vsel %vm264_vm0, %v2001_v24, 0.0  ;;  %v2116_v27 = vmul.f32 %v2001_v24, %v1702_v22  ;;  %1750 = vst.msk [vmem:[%s3237_s12 + $0x108] sm:$0xff] %vm264_vm0, %v1705_v58  ;;  %v2002_v13 = vmul.f32 %v1957_v36, %v1705_v58 }
 0x285   : > { %v2069_v29 = vadd.f32 %v2068_v26, %v2067_v15  ;;  %v2119_v37 = vmul.f32 %v2377_v6, %v2004_v28  ;;  %v2187_v42 = vsel %vm264_vm0, %v2118_v23, 0.0  ;;  %v2074_v43 = vsel %vm264_vm0, %v2004_v28, 0.0 }
 0x286   : > { %v2183_v30 = vsel %vm264_vm0, %v2116_v27, 0.0  ;;  %v2070_v31 = vsel %vm264_vm0, %v2002_v13, 0.0  ;;  %v2117_v32 = vmul.f32 %v2002_v13, %v1705_v58 }
 0x287   : > { %v2184_v33 = vadd.f32 %v2183_v30, %v2182_v17  ;;  %v2071_v34 = vadd.f32 %v2070_v31, %v2069_v29  ;;  %v2189_v46 = vsel %vm264_vm0, %v2119_v37, 0.0 }
 0x288   : > { %v2185_v38 = vsel %vm264_vm0, %v2117_v32, 0.0 }
 0x289   : > { %v2073_v39 = vadd.f32 %v2072_v35, %v2071_v34  ;;  %v2186_v40 = vadd.f32 %v2185_v38, %v2184_v33 }
 0x28b   : > { %v2075_v44 = vadd.f32 %v2074_v43, %v2073_v39  ;;  %v2188_v45 = vadd.f32 %v2187_v42, %v2186_v40 }
 0x28d   : > { %v2076_v47 = vrot.slane %v2075_v44, 4  ;;  %v2190_v48 = vadd.f32 %v2189_v46, %v2188_v45 }
 0x28f   : > { %v2077_v49 = vadd.f32 %v2076_v47, %v2075_v44  ;;  %v2191_v53 = vrot.slane %v2190_v48, 4 }
 0x291   : > { %v2078_v50 = vrot.slane %v2077_v49, 2  ;;  %v2192_v51 = vadd.f32 %v2191_v53, %v2190_v48 }
 0x293   : > { %v2079_v52 = vadd.f32 %v2078_v50, %v2077_v49  ;;  %v2193_v54 = vrot.slane %v2192_v51, 2 }
 0x295   : > { %v2080_v55 = vrot.slane %v2079_v52, 1  ;;  %v2194_v19 = vadd.f32 %v2193_v54, %v2192_v51 }
 0x297   : > { %v2081_v9 = vadd.f32 %v2080_v55, %v2079_v52  ;;  %v2195_v56 = vrot.slane %v2194_v19, 1 }
 0x299   : > { %2083 = vst.msk [vmem:[%s208_s18] sm:$0x1] %vm2082_vm11, %v2081_v9  ;;  %v2196_v57 = vadd.f32 %v2195_v56, %v2194_v19 }
 0x29b   : > { %2197 = vst.msk [vmem:[%s208_s18 + $0x1] sm:$0x1] %vm2082_vm11, %v2196_v57 }
 0x29c PF: > { %s15_s15 = sadd.s32 1, %s2416_s15  }
 0x29d   : > { %p12_p4 = scmp.ge.s32.totalorder %s15_s15, 4  }
 0x29f   :  { %14 = sbr.rel (!%p12_p4) target bundleno = 1 (0x1), region = 74 }

</bundles_post_ra>
